<compile_context>
chip_gen: v7x
topology: tpu7x:2x2x1
jax: 0.10.0
libtpu: 0.0.40
codegen_flags: <defaults>
</compile_context>

<pallas_src>
import functools
import math

import jax
import jax.numpy as jnp
from jax.experimental import pallas as pl
from jax.experimental.pallas import tpu as pltpu


# ----------------------------- in-kernel helpers ----------------------------

def _layer_norm(x, gamma, beta, eps):
    mean = jnp.mean(x, axis=-1, keepdims=True)
    var = jnp.mean((x - mean) ** 2, axis=-1, keepdims=True)
    return (x - mean) * jax.lax.rsqrt(var + eps) * gamma + beta


def _gelu_tanh(x):
    # TODO(synk): BERT uses exact erf-GELU; tanh approximation used here
    # (tanh lowers cleanly to the EUP on TPU).
    c = math.sqrt(2.0 / math.pi)
    return 0.5 * x * (1.0 + jnp.tanh(c * (x + 0.044715 * x * x * x)))


def _relu(x):
    return jnp.maximum(x, 0.0)


# ------------------------------- Pallas kernels ------------------------------

def embed_ln_kernel(we_ref, pe_ref, te_ref, g_ref, b_ref, o_ref, *, eps):
    """word_emb + pos_emb + type_emb, then LayerNorm (BERT embeddings).

    we/te: (B, S, H), pe: (S, H) (broadcast over batch), LN params: (1, H).
    """
    x = we_ref[...] + pe_ref[...] + te_ref[...]
    o_ref[...] = _layer_norm(x, g_ref[...], b_ref[...], eps)


def encoder_stack_kernel(x_ref, bias_ref,
                         wq_ref, bq_ref, wk_ref, bk_ref, wv_ref, bv_ref,
                         wo_ref, bo_ref, g1_ref, bl1_ref,
                         w1_ref, b1_ref, w2_ref, b2_ref, g2_ref, bl2_ref,
                         o_ref, act_ref, ctx_ref,
                         *, batch, seq, nhead, head_dim, eps, act):
    """One grid step == one post-LN transformer encoder layer.

    grid = (num_layers,), "arbitrary".  The running activation lives in the
    VMEM scratch `act_ref` across layers; per-layer weights are streamed in via
    the (None, ...) leading-layer-axis BlockSpecs.

    x_ref   : (B*S, H) input activation (consumed only at layer 0)
    bias_ref: (B, 1, S) additive attention bias over keys
    wq/wk/wv/wo : (H, H) kernel-layout (in, out) full-width projections
    w1 : (H, F), w2 : (F, H); all biases / LN params : (1, *)
    """
    layer = pl.program_id(0)

    @pl.when(layer == 0)
    def _():
        act_ref[...] = x_ref[...]

    hidden = nhead * head_dim
    rows = batch * seq
    scale = 1.0 / math.sqrt(head_dim)

    x = act_ref[...]                                   # (B*S, H)
    bias = bias_ref[...]                               # (B, 1, S)
    # hoisted broadcast operands (read once per layer)
    bq = bq_ref[...]; bk = bk_ref[...]; bv = bv_ref[...]; bo = bo_ref[...]
    g1 = g1_ref[...]; bl1 = bl1_ref[...]; g2 = g2_ref[...]; bl2 = bl2_ref[...]
    b1 = b1_ref[...]; b2 = b2_ref[...]

    # fused full-width projections, batch folded into the sublane dimension
    q = jnp.dot(x, wq_ref[...], preferred_element_type=jnp.float32) + bq
    k = jnp.dot(x, wk_ref[...], preferred_element_type=jnp.float32) + bk
    v = jnp.dot(x, wv_ref[...], preferred_element_type=jnp.float32) + bv

    q3 = q.reshape(batch, seq, hidden)
    k3 = k.reshape(batch, seq, hidden)
    v3 = v.reshape(batch, seq, hidden)

    # scaled dot-product attention: batched over batch, small loop over heads;
    # per-head contexts assembled into ctx_ref so the output projection is one
    # full-width matmul.
    for n in range(nhead):
        lo = n * head_dim
        qh = q3[:, :, lo:lo + head_dim]
        kh = k3[:, :, lo:lo + head_dim]
        vh = v3[:, :, lo:lo + head_dim]
        s = jnp.einsum('bqd,bkd->bqk', qh, kh,
                       preferred_element_type=jnp.float32) * scale + bias
        m = jnp.max(s, axis=-1, keepdims=True)
        e = jnp.exp(s - m)
        p = e * pl.reciprocal(jnp.sum(e, axis=-1, keepdims=True), approx=True)
        ctx_h = jnp.einsum('bqk,bkd->bqd', p, vh,
                           preferred_element_type=jnp.float32)
        ctx_ref[:, lo:lo + head_dim] = ctx_h.reshape(rows, head_dim)

    attn = jnp.dot(ctx_ref[...], wo_ref[...],
                   preferred_element_type=jnp.float32) + bo
    h = _layer_norm(x + attn, g1, bl1, eps)

    ff = act(jnp.dot(h, w1_ref[...], preferred_element_type=jnp.float32) + b1)
    ff = jnp.dot(ff, w2_ref[...], preferred_element_type=jnp.float32) + b2
    new_x = _layer_norm(h + ff, g2, bl2, eps)

    act_ref[...] = new_x
    o_ref[...] = new_x          # output block index constant -> written back once


def total_loss_kernel(xe_ref, we_ref, be_ref, ye_ref,
                      xr_ref, wr_ref, br_ref, yr_ref,
                      mask_ref, o_ref, *, rel_classes):
    """Fused sb1+sb2 and ob1+ob2 heads + BCEWithLogits + masked-mean reductions.

    xe/xr: (B*S, H)  (BERT encoder output / RelNET encoder output)
    we: (H, 2), ye: (B*S, 2);  wr: (H, 2C), yr: (B*S, 2C);  mask: (B*S, 1)
    Output: (1, 1) total loss = ent_loss + rel_loss.
    """
    mask = mask_ref[...]                                   # (B*S, 1)

    # entity heads (sb1 | sb2)
    ze = jnp.dot(xe_ref[...], we_ref[...],
                 preferred_element_type=jnp.float32) + be_ref[...]
    ye = ye_ref[...]
    le = jnp.maximum(ze, 0.0) - ze * ye + jnp.log(1.0 + jnp.exp(-jnp.abs(ze)))
    ent_sum = jnp.sum(le * mask, keepdims=True)            # (1, 1)

    # relation heads (ob1 | ob2)
    zr = jnp.dot(xr_ref[...], wr_ref[...],
                 preferred_element_type=jnp.float32) + br_ref[...]
    yr = yr_ref[...]
    lr = jnp.maximum(zr, 0.0) - zr * yr + jnp.log(1.0 + jnp.exp(-jnp.abs(zr)))
    rel_sum = jnp.sum(lr * mask, keepdims=True)            # (1, 1)

    msum = jnp.sum(mask, keepdims=True)                    # (1, 1)
    # NOTE: matches PyTorch exactly (no guard for an all-padding batch).
    o_ref[...] = (ent_sum + rel_sum / float(rel_classes)) / msum


# ------------------------------ pallas_call glue -----------------------------

_VMEM = pl.BlockSpec(memory_space=pltpu.MemorySpace.VMEM)


def _rep_spec(shape):
    """Whole array, same block every grid step."""
    zeros = (0,) * len(shape)

    def idx(l):
        return zeros

    return pl.BlockSpec(tuple(shape), idx)


def _layer_spec(shape):
    """Per-layer block of a layer-stacked parameter; leading layer dim squeezed."""
    zeros = (0,) * len(shape)

    def idx(l):
        return (l,) + zeros

    return pl.BlockSpec((None,) + tuple(shape), idx)


def run_embed_ln(we, pe, te, gamma, beta, *, eps):
    B, S, H = we.shape
    return pl.pallas_call(
        functools.partial(embed_ln_kernel, eps=eps),
        out_shape=jax.ShapeDtypeStruct((B, S, H), jnp.float32),
        in_specs=[_VMEM] * 5,
        out_specs=_VMEM,
    )(we, pe, te, gamma, beta)


def run_encoder_stack(x2d, bias, stack, *, B, S, nhead, eps, act):
    """Run a whole stack of encoder layers in a single pallas_call."""
    BS, H = x2d.shape
    L = stack["wq"].shape[0]
    F = stack["w1"].shape[-1]
    kernel = functools.partial(encoder_stack_kernel, batch=B, seq=S,
                               nhead=nhead, head_dim=H // nhead,
                               eps=eps, act=act)
    in_specs = [
        _rep_spec((BS, H)),                    # x (used at layer 0)
        _rep_spec((B, 1, S)),                  # attention bias
        _layer_spec((H, H)), _layer_spec((1, H)),   # wq, bq
        _layer_spec((H, H)), _layer_spec((1, H)),   # wk, bk
        _layer_spec((H, H)), _layer_spec((1, H)),   # wv, bv
        _layer_spec((H, H)), _layer_spec((1, H)),   # wo, bo
        _layer_spec((1, H)), _layer_spec((1, H)),   # g1, bl1
        _layer_spec((H, F)), _layer_spec((1, F)),   # w1, b1
        _layer_spec((F, H)), _layer_spec((1, H)),   # w2, b2
        _layer_spec((1, H)), _layer_spec((1, H)),   # g2, bl2
    ]
    args = (x2d, bias,
            stack["wq"], stack["bq"], stack["wk"], stack["bk"],
            stack["wv"], stack["bv"], stack["wo"], stack["bo"],
            stack["g1"], stack["bl1"], stack["w1"], stack["b1"],
            stack["w2"], stack["b2"], stack["g2"], stack["bl2"])
    return pl.pallas_call(
        kernel,
        out_shape=jax.ShapeDtypeStruct((BS, H), jnp.float32),
        grid=(L,),
        in_specs=in_specs,
        out_specs=_rep_spec((BS, H)),
        scratch_shapes=[pltpu.VMEM((BS, H), jnp.float32),   # resident activation
                        pltpu.VMEM((BS, H), jnp.float32)],  # per-layer attn ctx
        compiler_params=pltpu.CompilerParams(
            dimension_semantics=("arbitrary",)),
    )(*args)


def run_total_loss(xe, we, be, ye, xr, wr, br, yr, mask, *, rel_classes):
    kernel = functools.partial(total_loss_kernel, rel_classes=rel_classes)
    return pl.pallas_call(
        kernel,
        out_shape=jax.ShapeDtypeStruct((1, 1), jnp.float32),
        in_specs=[_VMEM] * 9,
        out_specs=_VMEM,
    )(xe, we, be, ye, xr, wr, br, yr, mask)


# --------------------------------- parameters --------------------------------

def init_params(key, cfg):
    H, V, S, C = cfg["H"], cfg["V"], cfg["S"], cfg["C"]
    keys = iter(jax.random.split(key, 256))

    def nrm(shape, scale=0.02):
        return scale * jax.random.normal(next(keys), shape, jnp.float32)

    def enc_stack(num_layers, ff):
        """Stack of encoder layers: torch-layout weights -> kernel (in, out) layout,
        stacked along a leading layer axis."""
        names = ("wq", "bq", "wk", "bk", "wv", "bv", "wo", "bo",
                 "g1", "bl1", "w1", "b1", "w2", "b2", "g2", "bl2")
        acc = {n: [] for n in names}
        for _ in range(num_layers):
            acc["wq"].append(nrm((H, H)).T); acc["bq"].append(nrm((H,)).reshape(1, H))
            acc["wk"].append(nrm((H, H)).T); acc["bk"].append(nrm((H,)).reshape(1, H))
            acc["wv"].append(nrm((H, H)).T); acc["bv"].append(nrm((H,)).reshape(1, H))
            acc["wo"].append(nrm((H, H)).T); acc["bo"].append(nrm((H,)).reshape(1, H))
            acc["w1"].append(nrm((ff, H)).T); acc["b1"].append(nrm((ff,)).reshape(1, ff))
            acc["w2"].append(nrm((H, ff)).T); acc["b2"].append(nrm((H,)).reshape(1, H))
            acc["g1"].append(jnp.ones((1, H), jnp.float32))
            acc["bl1"].append(jnp.zeros((1, H), jnp.float32))
            acc["g2"].append(jnp.ones((1, H), jnp.float32))
            acc["bl2"].append(jnp.zeros((1, H), jnp.float32))
        return {n: jnp.stack(v) for n, v in acc.items()}

    params = {
        # synthetic mini-BERT
        "word_emb": nrm((V, H)),
        "pos_emb": nrm((S, H)),
        "type_emb": nrm((2, H)),
        "emb_ln_g": jnp.ones((1, H), jnp.float32),
        "emb_ln_b": jnp.zeros((1, H), jnp.float32),
        "bert_stack": enc_stack(cfg["bert_layers"], 4 * H),
        # EntityNET: sb1, sb2 = Linear(H, 1) fused into one (H, 2) head
        "ent_w": jnp.concatenate([nrm((1, H)).T, nrm((1, H)).T], axis=1),
        "ent_b": jnp.concatenate([nrm((1,)), nrm((1,))]).reshape(1, 2),
        # RelNET
        "token_entity_emb": nrm((2, H)).at[0].set(0.0),   # padding_idx=0 row zeroed
        "rel_stack": enc_stack(cfg["rel_layers"], cfg["rel_ff"]),
        # ob1, ob2 = Linear(H, C) fused into one (H, 2C) head
        "rel_w": jnp.concatenate([nrm((C, H)).T, nrm((C, H)).T], axis=1),
        "rel_b": jnp.concatenate([nrm((C,)), nrm((C,))]).reshape(1, 2 * C),
    }
    return params


# --------------------------------- forward -----------------------------------

def ere_forward(params, passages, token_type_ids, segment_ids, s1, s2, po1, po2, cfg):
    """EREdNet.forward, training path (is_eval=False) -> total_loss (scalar)."""
    B, S = passages.shape
    H, nhead, C = cfg["H"], cfg["nhead"], cfg["C"]
    BS = B * S

    mask_f = (passages != 0).astype(jnp.float32)           # sequence_mask
    mask2 = mask_f.reshape(BS, 1)

    # ---- BERT encoder (synthetic mini-BERT) ----
    we = jnp.take(params["word_emb"], passages, axis=0)        # (B, S, H)
    te = jnp.take(params["type_emb"], segment_ids, axis=0)     # (B, S, H)
    pe = params["pos_emb"][:S]                                 # (S, H)
    x = run_embed_ln(we, pe, te, params["emb_ln_g"], params["emb_ln_b"], eps=1e-12)
    x = x.reshape(BS, H)

    bert_bias = ((1.0 - mask_f) * -10000.0)[:, None, :]        # (B, 1, S)
    sent = run_encoder_stack(x, bert_bias, params["bert_stack"],
                             B=B, S=S, nhead=nhead, eps=1e-12, act=_gelu_tanh)

    # ---- RelNET encoder ----
    subj = sent + jnp.take(params["token_entity_emb"], token_type_ids,
                           axis=0).reshape(BS, H)
    # key-padding mask (PyTorch uses -inf; -1e9 avoids NaN on fully-masked rows)
    rel_bias = jnp.where(passages == 0, -1e9, 0.0).astype(jnp.float32)[:, None, :]
    h = run_encoder_stack(subj, rel_bias, params["rel_stack"],
                          B=B, S=S, nhead=nhead, eps=1e-5, act=_relu)

    # ---- fused loss heads (sb1|sb2 and ob1|ob2) ----
    y_ent = jnp.stack([s1, s2], axis=-1).reshape(BS, 2)
    y_rel = jnp.concatenate([po1, po2], axis=-1).reshape(BS, 2 * C)
    total = run_total_loss(sent, params["ent_w"], params["ent_b"], y_ent,
                           h, params["rel_w"], params["rel_b"], y_rel,
                           mask2, rel_classes=C)
    return total[0, 0]


# ----------------------------------- main -------------------------------------

if __name__ == "__main__":
    cfg = dict(B=2, S=8, H=32, V=50, nhead=2, C=4,
               bert_layers=2, rel_layers=2, rel_ff=2048)   # torch default dim_feedforward

    key = jax.random.PRNGKey(0)
    k_param, k_pass, k_seg, k_s1, k_s2, k_p1, k_p2 = jax.random.split(key, 7)

    params = init_params(k_param, cfg)

    B, S, C = cfg["B"], cfg["S"], cfg["C"]
    passages = jax.random.randint(k_pass, (B, S), 1, cfg["V"], dtype=jnp.int32)
    passages = passages.at[1, 6:].set(0)                   # some padding
    segment_ids = jnp.zeros((B, S), jnp.int32)
    token_type_ids = jnp.zeros((B, S), jnp.int32).at[:, 2:4].set(1)   # subject span
    s1 = jax.random.bernoulli(k_s1, 0.3, (B, S)).astype(jnp.float32)
    s2 = jax.random.bernoulli(k_s2, 0.3, (B, S)).astype(jnp.float32)
    po1 = jax.random.bernoulli(k_p1, 0.3, (B, S, C)).astype(jnp.float32)
    po2 = jax.random.bernoulli(k_p2, 0.3, (B, S, C)).astype(jnp.float32)

    fwd = jax.jit(functools.partial(ere_forward, cfg=cfg))
    loss = fwd(params, passages, token_type_ids, segment_ids, s1, s2, po1, po2)
    jax.block_until_ready(loss)
    assert jnp.isfinite(loss)
    print("KERNEL_OK")
</pallas_src>

<mosaic_0001>
module attributes {stable_mosaic.version = 11 : i64} {
  func.func @embed_ln_kernel(%arg0: memref<2x8x32xf32, #tpu.memory_space<vmem>>, %arg1: memref<8x32xf32, #tpu.memory_space<vmem>>, %arg2: memref<2x8x32xf32, #tpu.memory_space<vmem>>, %arg3: memref<1x32xf32, #tpu.memory_space<vmem>>, %arg4: memref<1x32xf32, #tpu.memory_space<vmem>>, %arg5: memref<2x8x32xf32, #tpu.memory_space<vmem>>) attributes {dimension_semantics = [], scalar_prefetch = 0 : i64, scratch_operands = 0 : i64, tpu.core_type = #tpu.core_type<tc>} {
    %c0 = arith.constant 0 : index
    %c0_0 = arith.constant 0 : index
    %c0_1 = arith.constant 0 : index
    %0 = vector.load %arg0[%c0, %c0_0, %c0_1] : memref<2x8x32xf32, #tpu.memory_space<vmem>>, vector<2x8x32xf32>
    %c0_2 = arith.constant 0 : index
    %c0_3 = arith.constant 0 : index
    %1 = vector.load %arg1[%c0_2, %c0_3] : memref<8x32xf32, #tpu.memory_space<vmem>>, vector<8x32xf32>
    %2 = vector.shape_cast %1 : vector<8x32xf32> to vector<1x8x32xf32>
    %3 = vector.broadcast %2 : vector<1x8x32xf32> to vector<2x8x32xf32>
    %4 = arith.addf %0, %3 : vector<2x8x32xf32>
    %c0_4 = arith.constant 0 : index
    %c0_5 = arith.constant 0 : index
    %c0_6 = arith.constant 0 : index
    %5 = vector.load %arg2[%c0_4, %c0_5, %c0_6] : memref<2x8x32xf32, #tpu.memory_space<vmem>>, vector<2x8x32xf32>
    %6 = arith.addf %4, %5 : vector<2x8x32xf32>
    %c0_7 = arith.constant 0 : index
    %c0_8 = arith.constant 0 : index
    %7 = vector.load %arg3[%c0_7, %c0_8] : memref<1x32xf32, #tpu.memory_space<vmem>>, vector<1x32xf32>
    %c0_9 = arith.constant 0 : index
    %c0_10 = arith.constant 0 : index
    %8 = vector.load %arg4[%c0_9, %c0_10] : memref<1x32xf32, #tpu.memory_space<vmem>>, vector<1x32xf32>
    %cst = arith.constant dense<0.000000e+00> : vector<2x8xf32>
    %9 = vector.multi_reduction <add>, %6, %cst [2] : vector<2x8x32xf32> to vector<2x8xf32>
    %10 = vector.shape_cast %9 : vector<2x8xf32> to vector<2x8x1xf32>
    %cst_11 = arith.constant 3.200000e+01 : f32
    %11 = vector.broadcast %cst_11 : f32 to vector<2x8x1xf32>
    %12 = arith.divf %10, %11 : vector<2x8x1xf32>
    %13 = vector.broadcast %12 : vector<2x8x1xf32> to vector<2x8x32xf32>
    %14 = arith.subf %6, %13 : vector<2x8x32xf32>
    %15 = arith.mulf %14, %14 : vector<2x8x32xf32>
    %cst_12 = arith.constant dense<0.000000e+00> : vector<2x8xf32>
    %16 = vector.multi_reduction <add>, %15, %cst_12 [2] : vector<2x8x32xf32> to vector<2x8xf32>
    %17 = vector.shape_cast %16 : vector<2x8xf32> to vector<2x8x1xf32>
    %cst_13 = arith.constant 3.200000e+01 : f32
    %18 = vector.broadcast %cst_13 : f32 to vector<2x8x1xf32>
    %19 = arith.divf %17, %18 : vector<2x8x1xf32>
    %20 = vector.broadcast %12 : vector<2x8x1xf32> to vector<2x8x32xf32>
    %21 = arith.subf %6, %20 : vector<2x8x32xf32>
    %cst_14 = arith.constant 9.99999996E-13 : f32
    %22 = vector.broadcast %cst_14 : f32 to vector<2x8x1xf32>
    %23 = arith.addf %19, %22 : vector<2x8x1xf32>
    %24 = math.rsqrt %23 : vector<2x8x1xf32>
    %25 = vector.broadcast %24 : vector<2x8x1xf32> to vector<2x8x32xf32>
    %26 = arith.mulf %21, %25 : vector<2x8x32xf32>
    %27 = vector.shape_cast %7 : vector<1x32xf32> to vector<1x1x32xf32>
    %28 = vector.broadcast %27 : vector<1x1x32xf32> to vector<2x8x32xf32>
    %29 = arith.mulf %26, %28 : vector<2x8x32xf32>
    %30 = vector.shape_cast %8 : vector<1x32xf32> to vector<1x1x32xf32>
    %31 = vector.broadcast %30 : vector<1x1x32xf32> to vector<2x8x32xf32>
    %32 = arith.addf %29, %31 : vector<2x8x32xf32>
    %c0_15 = arith.constant 0 : index
    %c0_16 = arith.constant 0 : index
    %c0_17 = arith.constant 0 : index
    %33 = vector.load %arg5[%c0_15, %c0_16, %c0_17] : memref<2x8x32xf32, #tpu.memory_space<vmem>>, vector<2x8x32xf32>
    tpu.vector_store %arg5[%c0_15, %c0_16, %c0_17], %32 {strides = array<i32>} : memref<2x8x32xf32, #tpu.memory_space<vmem>>, vector<2x8x32xf32>,
    return
  }
}

module attributes {stable_mosaic.version = 11 : i64} {
  func.func @encoder_stack_kernel(%arg0: i32, %arg1: memref<16x32xf32, #tpu.memory_space<vmem>>, %arg2: memref<2x1x8xf32, #tpu.memory_space<vmem>>, %arg3: memref<1x32x32xf32, #tpu.memory_space<vmem>>, %arg4: memref<1x1x32xf32, #tpu.memory_space<vmem>>, %arg5: memref<1x32x32xf32, #tpu.memory_space<vmem>>, %arg6: memref<1x1x32xf32, #tpu.memory_space<vmem>>, %arg7: memref<1x32x32xf32, #tpu.memory_space<vmem>>, %arg8: memref<1x1x32xf32, #tpu.memory_space<vmem>>, %arg9: memref<1x32x32xf32, #tpu.memory_space<vmem>>, %arg10: memref<1x1x32xf32, #tpu.memory_space<vmem>>, %arg11: memref<1x1x32xf32, #tpu.memory_space<vmem>>, %arg12: memref<1x1x32xf32, #tpu.memory_space<vmem>>, %arg13: memref<1x32x128xf32, #tpu.memory_space<vmem>>, %arg14: memref<1x1x128xf32, #tpu.memory_space<vmem>>, %arg15: memref<1x128x32xf32, #tpu.memory_space<vmem>>, %arg16: memref<1x1x32xf32, #tpu.memory_space<vmem>>, %arg17: memref<1x1x32xf32, #tpu.memory_space<vmem>>, %arg18: memref<1x1x32xf32, #tpu.memory_space<vmem>>, %arg19: memref<16x32xf32, #tpu.memory_space<vmem>>, %arg20: memref<16x32xf32, #tpu.memory_space<vmem>>, %arg21: memref<16x32xf32, #tpu.memory_space<vmem>>) attributes {dimension_semantics = [#tpu.dimension_semantics<arbitrary>], iteration_bounds = array<i64: 2>, scalar_prefetch = 0 : i64, scratch_operands = 2 : i64, tpu.core_type = #tpu.core_type<tc>, window_params = [{pipeline_mode = #tpu.pipeline_mode<synchronous>, transform_indices = @transform_0, window_bounds = array<i64: 16, 32>}, {pipeline_mode = #tpu.pipeline_mode<synchronous>, transform_indices = @transform_1, window_bounds = array<i64: 2, 1, 8>}, {transform_indices = @transform_2, window_bounds = array<i64: 1, 32, 32>}, {transform_indices = @transform_3, window_bounds = array<i64: 1, 1, 32>}, {transform_indices = @transform_4, window_bounds = array<i64: 1, 32, 32>}, {transform_indices = @transform_5, window_bounds = array<i64: 1, 1, 32>}, {transform_indices = @transform_6, window_bounds = array<i64: 1, 32, 32>}, {transform_indices = @transform_7, window_bounds = array<i64: 1, 1, 32>}, {transform_indices = @transform_8, window_bounds = array<i64: 1, 32, 32>}, {transform_indices = @transform_9, window_bounds = array<i64: 1, 1, 32>}, {transform_indices = @transform_10, window_bounds = array<i64: 1, 1, 32>}, {transform_indices = @transform_11, window_bounds = array<i64: 1, 1, 32>}, {transform_indices = @transform_12, window_bounds = array<i64: 1, 32, 128>}, {transform_indices = @transform_13, window_bounds = array<i64: 1, 1, 128>}, {transform_indices = @transform_14, window_bounds = array<i64: 1, 128, 32>}, {transform_indices = @transform_15, window_bounds = array<i64: 1, 1, 32>}, {transform_indices = @transform_16, window_bounds = array<i64: 1, 1, 32>}, {transform_indices = @transform_17, window_bounds = array<i64: 1, 1, 32>}, {pipeline_mode = #tpu.pipeline_mode<synchronous>, transform_indices = @transform_18, window_bounds = array<i64: 16, 32>}]} {
    %c0_i32 = arith.constant 0 : i32
    %0 = arith.cmpi eq, %arg0, %c0_i32 : i32
    %1 = arith.extui %0 : i1 to i32
    %c0_i32_0 = arith.constant 0 : i32
    %2 = arith.cmpi ne, %1, %c0_i32_0 : i32
    scf.if %2 {
      %c0_91 = arith.constant 0 : index
      %c0_92 = arith.constant 0 : index
      %162 = vector.load %arg1[%c0_91, %c0_92] : memref<16x32xf32, #tpu.memory_space<vmem>>, vector<16x32xf32>
      %c0_93 = arith.constant 0 : index
      %c0_94 = arith.constant 0 : index
      %163 = vector.load %arg20[%c0_93, %c0_94] : memref<16x32xf32, #tpu.memory_space<vmem>>, vector<16x32xf32>
      tpu.vector_store %arg20[%c0_93, %c0_94], %162 {strides = array<i32>} : memref<16x32xf32, #tpu.memory_space<vmem>>, vector<16x32xf32>,
    } else {
    }
    %c0 = arith.constant 0 : index
    %c0_1 = arith.constant 0 : index
    %3 = vector.load %arg20[%c0, %c0_1] : memref<16x32xf32, #tpu.memory_space<vmem>>, vector<16x32xf32>
    %c0_2 = arith.constant 0 : index
    %c0_3 = arith.constant 0 : index
    %c0_4 = arith.constant 0 : index
    %4 = vector.load %arg2[%c0_2, %c0_3, %c0_4] : memref<2x1x8xf32, #tpu.memory_space<vmem>>, vector<2x1x8xf32>
    %c0_5 = arith.constant 0 : index
    %c0_6 = arith.constant 0 : index
    %c0_7 = arith.constant 0 : index
    %5 = vector.load %arg4[%c0_5, %c0_6, %c0_7] : memref<1x1x32xf32, #tpu.memory_space<vmem>>, vector<1x1x32xf32>
    %6 = vector.shape_cast %5 : vector<1x1x32xf32> to vector<1x32xf32>
    %c0_8 = arith.constant 0 : index
    %c0_9 = arith.constant 0 : index
    %c0_10 = arith.constant 0 : index
    %7 = vector.load %arg6[%c0_8, %c0_9, %c0_10] : memref<1x1x32xf32, #tpu.memory_space<vmem>>, vector<1x1x32xf32>
    %8 = vector.shape_cast %7 : vector<1x1x32xf32> to vector<1x32xf32>
    %c0_11 = arith.constant 0 : index
    %c0_12 = arith.constant 0 : index
    %c0_13 = arith.constant 0 : index
    %9 = vector.load %arg8[%c0_11, %c0_12, %c0_13] : memref<1x1x32xf32, #tpu.memory_space<vmem>>, vector<1x1x32xf32>
    %10 = vector.shape_cast %9 : vector<1x1x32xf32> to vector<1x32xf32>
    %c0_14 = arith.constant 0 : index
    %c0_15 = arith.constant 0 : index
    %c0_16 = arith.constant 0 : index
    %11 = vector.load %arg10[%c0_14, %c0_15, %c0_16] : memref<1x1x32xf32, #tpu.memory_space<vmem>>, vector<1x1x32xf32>
    %12 = vector.shape_cast %11 : vector<1x1x32xf32> to vector<1x32xf32>
    %c0_17 = arith.constant 0 : index
    %c0_18 = arith.constant 0 : index
    %c0_19 = arith.constant 0 : index
    %13 = vector.load %arg11[%c0_17, %c0_18, %c0_19] : memref<1x1x32xf32, #tpu.memory_space<vmem>>, vector<1x1x32xf32>
    %14 = vector.shape_cast %13 : vector<1x1x32xf32> to vector<1x32xf32>
    %c0_20 = arith.constant 0 : index
    %c0_21 = arith.constant 0 : index
    %c0_22 = arith.constant 0 : index
    %15 = vector.load %arg12[%c0_20, %c0_21, %c0_22] : memref<1x1x32xf32, #tpu.memory_space<vmem>>, vector<1x1x32xf32>
    %16 = vector.shape_cast %15 : vector<1x1x32xf32> to vector<1x32xf32>
    %c0_23 = arith.constant 0 : index
    %c0_24 = arith.constant 0 : index
    %c0_25 = arith.constant 0 : index
    %17 = vector.load %arg17[%c0_23, %c0_24, %c0_25] : memref<1x1x32xf32, #tpu.memory_space<vmem>>, vector<1x1x32xf32>
    %18 = vector.shape_cast %17 : vector<1x1x32xf32> to vector<1x32xf32>
    %c0_26 = arith.constant 0 : index
    %c0_27 = arith.constant 0 : index
    %c0_28 = arith.constant 0 : index
    %19 = vector.load %arg18[%c0_26, %c0_27, %c0_28] : memref<1x1x32xf32, #tpu.memory_space<vmem>>, vector<1x1x32xf32>
    %20 = vector.shape_cast %19 : vector<1x1x32xf32> to vector<1x32xf32>
    %c0_29 = arith.constant 0 : index
    %c0_30 = arith.constant 0 : index
    %c0_31 = arith.constant 0 : index
    %21 = vector.load %arg14[%c0_29, %c0_30, %c0_31] : memref<1x1x128xf32, #tpu.memory_space<vmem>>, vector<1x1x128xf32>
    %22 = vector.shape_cast %21 : vector<1x1x128xf32> to vector<1x128xf32>
    %c0_32 = arith.constant 0 : index
    %c0_33 = arith.constant 0 : index
    %c0_34 = arith.constant 0 : index
    %23 = vector.load %arg16[%c0_32, %c0_33, %c0_34] : memref<1x1x32xf32, #tpu.memory_space<vmem>>, vector<1x1x32xf32>
    %24 = vector.shape_cast %23 : vector<1x1x32xf32> to vector<1x32xf32>
    %c0_35 = arith.constant 0 : index
    %c0_36 = arith.constant 0 : index
    %c0_37 = arith.constant 0 : index
    %25 = vector.load %arg3[%c0_35, %c0_36, %c0_37] : memref<1x32x32xf32, #tpu.memory_space<vmem>>, vector<1x32x32xf32>
    %26 = vector.shape_cast %25 : vector<1x32x32xf32> to vector<32x32xf32>
    %cst = arith.constant dense<0.000000e+00> : vector<16x32xf32>
    %27 = tpu.matmul %3, %26, %cst {dimension_numbers = #tpu.dot_dimension_numbers<[1], [0], [0], [1], [0, 0, 1, 1], [], []>} : vector<16x32xf32>, vector<32x32xf32>, vector<16x32xf32> -> vector<16x32xf32>
    %28 = vector.broadcast %6 : vector<1x32xf32> to vector<16x32xf32>
    %29 = arith.addf %27, %28 : vector<16x32xf32>
    %c0_38 = arith.constant 0 : index
    %c0_39 = arith.constant 0 : index
    %c0_40 = arith.constant 0 : index
    %30 = vector.load %arg5[%c0_38, %c0_39, %c0_40] : memref<1x32x32xf32, #tpu.memory_space<vmem>>, vector<1x32x32xf32>
    %31 = vector.shape_cast %30 : vector<1x32x32xf32> to vector<32x32xf32>
    %cst_41 = arith.constant dense<0.000000e+00> : vector<16x32xf32>
    %32 = tpu.matmul %3, %31, %cst_41 {dimension_numbers = #tpu.dot_dimension_numbers<[1], [0], [0], [1], [0, 0, 1, 1], [], []>} : vector<16x32xf32>, vector<32x32xf32>, vector<16x32xf32> -> vector<16x32xf32>
    %33 = vector.broadcast %8 : vector<1x32xf32> to vector<16x32xf32>
    %34 = arith.addf %32, %33 : vector<16x32xf32>
    %c0_42 = arith.constant 0 : index
    %c0_43 = arith.constant 0 : index
    %c0_44 = arith.constant 0 : index
    %35 = vector.load %arg7[%c0_42, %c0_43, %c0_44] : memref<1x32x32xf32, #tpu.memory_space<vmem>>, vector<1x32x32xf32>
    %36 = vector.shape_cast %35 : vector<1x32x32xf32> to vector<32x32xf32>
    %cst_45 = arith.constant dense<0.000000e+00> : vector<16x32xf32>
    %37 = tpu.matmul %3, %36, %cst_45 {dimension_numbers = #tpu.dot_dimension_numbers<[1], [0], [0], [1], [0, 0, 1, 1], [], []>} : vector<16x32xf32>, vector<32x32xf32>, vector<16x32xf32> -> vector<16x32xf32>
    %38 = vector.broadcast %10 : vector<1x32xf32> to vector<16x32xf32>
    %39 = arith.addf %37, %38 : vector<16x32xf32>
    %40 = vector.shape_cast %29 : vector<16x32xf32> to vector<2x8x32xf32>
    %41 = vector.shape_cast %34 : vector<16x32xf32> to vector<2x8x32xf32>
    %42 = vector.shape_cast %39 : vector<16x32xf32> to vector<2x8x32xf32>
    %43 = vector.extract_strided_slice %40 {offsets = [0, 0, 0], sizes = [2, 8, 16], strides = [1, 1, 1]} : vector<2x8x32xf32> to vector<2x8x16xf32>
    %44 = vector.extract_strided_slice %41 {offsets = [0, 0, 0], sizes = [2, 8, 16], strides = [1, 1, 1]} : vector<2x8x32xf32> to vector<2x8x16xf32>
    %45 = vector.extract_strided_slice %42 {offsets = [0, 0, 0], sizes = [2, 8, 16], strides = [1, 1, 1]} : vector<2x8x32xf32> to vector<2x8x16xf32>
    "tpu.trace_start"() <{level = 10 : i32, message = "bqd,bkd->bqk"}> : () -> ()
    %cst_46 = arith.constant dense<0.000000e+00> : vector<2x8x8xf32>
    %46 = tpu.matmul %43, %44, %cst_46 {dimension_numbers = #tpu.dot_dimension_numbers<[2], [2], [1], [1], [0, 0, 0, 1, 1, 1], [0], [0]>} : vector<2x8x16xf32>, vector<2x8x16xf32>, vector<2x8x8xf32> -> vector<2x8x8xf32>
    "tpu.trace_stop"() : () -> ()
    %cst_47 = arith.constant 2.500000e-01 : f32
    %47 = vector.broadcast %cst_47 : f32 to vector<2x8x8xf32>
    %48 = arith.mulf %46, %47 : vector<2x8x8xf32>
    %49 = vector.broadcast %4 : vector<2x1x8xf32> to vector<2x8x8xf32>
    %50 = arith.addf %48, %49 : vector<2x8x8xf32>
    %cst_48 = arith.constant dense<0xFF800000> : vector<2x8xf32>
    %51 = vector.multi_reduction <maximumf>, %50, %cst_48 [2] : vector<2x8x8xf32> to vector<2x8xf32>
    %52 = vector.shape_cast %51 : vector<2x8xf32> to vector<2x8x1xf32>
    %53 = vector.broadcast %52 : vector<2x8x1xf32> to vector<2x8x8xf32>
    %54 = arith.subf %50, %53 : vector<2x8x8xf32>
    %55 = math.exp %54 : vector<2x8x8xf32>
    %cst_49 = arith.constant dense<0.000000e+00> : vector<2x8xf32>
    %56 = vector.multi_reduction <add>, %55, %cst_49 [2] : vector<2x8x8xf32> to vector<2x8xf32>
    %57 = vector.shape_cast %56 : vector<2x8xf32> to vector<2x8x1xf32>
    %58 = tpu.reciprocal %57 {approx = true} : vector<2x8x1xf32> -> vector<2x8x1xf32>
    %59 = vector.broadcast %58 : vector<2x8x1xf32> to vector<2x8x8xf32>
    %60 = arith.mulf %55, %59 : vector<2x8x8xf32>
    "tpu.trace_start"() <{level = 10 : i32, message = "bqk,bkd->bqd"}> : () -> ()
    %cst_50 = arith.constant dense<0.000000e+00> : vector<2x8x16xf32>
    %61 = tpu.matmul %60, %45, %cst_50 {dimension_numbers = #tpu.dot_dimension_numbers<[2], [1], [1], [2], [0, 0, 0, 1, 1, 2], [0], [0]>} : vector<2x8x8xf32>, vector<2x8x16xf32>, vector<2x8x16xf32> -> vector<2x8x16xf32>
    "tpu.trace_stop"() : () -> ()
    %62 = vector.shape_cast %61 : vector<2x8x16xf32> to vector<16x16xf32>
    %c0_51 = arith.constant 0 : index
    %c0_52 = arith.constant 0 : index
    %63 = vector.load %arg21[%c0_51, %c0_52] : memref<16x32xf32, #tpu.memory_space<vmem>>, vector<16x16xf32>
    tpu.vector_store %arg21[%c0_51, %c0_52], %62 {strides = array<i32>} : memref<16x32xf32, #tpu.memory_space<vmem>>, vector<16x16xf32>,
    %64 = vector.extract_strided_slice %40 {offsets = [0, 0, 16], sizes = [2, 8, 16], strides = [1, 1, 1]} : vector<2x8x32xf32> to vector<2x8x16xf32>
    %65 = vector.extract_strided_slice %41 {offsets = [0, 0, 16], sizes = [2, 8, 16], strides = [1, 1, 1]} : vector<2x8x32xf32> to vector<2x8x16xf32>
    %66 = vector.extract_strided_slice %42 {offsets = [0, 0, 16], sizes = [2, 8, 16], strides = [1, 1, 1]} : vector<2x8x32xf32> to vector<2x8x16xf32>
    "tpu.trace_start"() <{level = 10 : i32, message = "bqd,bkd->bqk"}> : () -> ()
    %cst_53 = arith.constant dense<0.000000e+00> : vector<2x8x8xf32>
    %67 = tpu.matmul %64, %65, %cst_53 {dimension_numbers = #tpu.dot_dimension_numbers<[2], [2], [1], [1], [0, 0, 0, 1, 1, 1], [0], [0]>} : vector<2x8x16xf32>, vector<2x8x16xf32>, vector<2x8x8xf32> -> vector<2x8x8xf32>
    "tpu.trace_stop"() : () -> ()
    %cst_54 = arith.constant 2.500000e-01 : f32
    %68 = vector.broadcast %cst_54 : f32 to vector<2x8x8xf32>
    %69 = arith.mulf %67, %68 : vector<2x8x8xf32>
    %70 = vector.broadcast %4 : vector<2x1x8xf32> to vector<2x8x8xf32>
    %71 = arith.addf %69, %70 : vector<2x8x8xf32>
    %cst_55 = arith.constant dense<0xFF800000> : vector<2x8xf32>
    %72 = vector.multi_reduction <maximumf>, %71, %cst_55 [2] : vector<2x8x8xf32> to vector<2x8xf32>
    %73 = vector.shape_cast %72 : vector<2x8xf32> to vector<2x8x1xf32>
    %74 = vector.broadcast %73 : vector<2x8x1xf32> to vector<2x8x8xf32>
    %75 = arith.subf %71, %74 : vector<2x8x8xf32>
    %76 = math.exp %75 : vector<2x8x8xf32>
    %cst_56 = arith.constant dense<0.000000e+00> : vector<2x8xf32>
    %77 = vector.multi_reduction <add>, %76, %cst_56 [2] : vector<2x8x8xf32> to vector<2x8xf32>
    %78 = vector.shape_cast %77 : vector<2x8xf32> to vector<2x8x1xf32>
    %79 = tpu.reciprocal %78 {approx = true} : vector<2x8x1xf32> -> vector<2x8x1xf32>
    %80 = vector.broadcast %79 : vector<2x8x1xf32> to vector<2x8x8xf32>
    %81 = arith.mulf %76, %80 : vector<2x8x8xf32>
    "tpu.trace_start"() <{level = 10 : i32, message = "bqk,bkd->bqd"}> : () -> ()
    %cst_57 = arith.constant dense<0.000000e+00> : vector<2x8x16xf32>
    %82 = tpu.matmul %81, %66, %cst_57 {dimension_numbers = #tpu.dot_dimension_numbers<[2], [1], [1], [2], [0, 0, 0, 1, 1, 2], [0], [0]>} : vector<2x8x8xf32>, vector<2x8x16xf32>, vector<2x8x16xf32> -> vector<2x8x16xf32>
    "tpu.trace_stop"() : () -> ()
    %83 = vector.shape_cast %82 : vector<2x8x16xf32> to vector<16x16xf32>
    %c0_58 = arith.constant 0 : index
    %c16 = arith.constant 16 : index
    %84 = vector.load %arg21[%c0_58, %c16] : memref<16x32xf32, #tpu.memory_space<vmem>>, vector<16x16xf32>
    tpu.vector_store %arg21[%c0_58, %c16], %83 {strides = array<i32>} : memref<16x32xf32, #tpu.memory_space<vmem>>, vector<16x16xf32>,
    %c0_59 = arith.constant 0 : index
    %c0_60 = arith.constant 0 : index
    %85 = vector.load %arg21[%c0_59, %c0_60] : memref<16x32xf32, #tpu.memory_space<vmem>>, vector<16x32xf32>
    %c0_61 = arith.constant 0 : index
    %c0_62 = arith.constant 0 : index
    %c0_63 = arith.constant 0 : index
    %86 = vector.load %arg9[%c0_61, %c0_62, %c0_63] : memref<1x32x32xf32, #tpu.memory_space<vmem>>, vector<1x32x32xf32>
    %87 = vector.shape_cast %86 : vector<1x32x32xf32> to vector<32x32xf32>
    %cst_64 = arith.constant dense<0.000000e+00> : vector<16x32xf32>
    %88 = tpu.matmul %85, %87, %cst_64 {dimension_numbers = #tpu.dot_dimension_numbers<[1], [0], [0], [1], [0, 0, 1, 1], [], []>} : vector<16x32xf32>, vector<32x32xf32>, vector<16x32xf32> -> vector<16x32xf32>
    %89 = vector.broadcast %12 : vector<1x32xf32> to vector<16x32xf32>
    %90 = arith.addf %88, %89 : vector<16x32xf32>
    %91 = arith.addf %3, %90 : vector<16x32xf32>
    %cst_65 = arith.constant dense<0.000000e+00> : vector<16xf32>
    %92 = vector.multi_reduction <add>, %91, %cst_65 [1] : vector<16x32xf32> to vector<16xf32>
    %93 = vector.shape_cast %92 : vector<16xf32> to vector<16x1xf32>
    %cst_66 = arith.constant 3.200000e+01 : f32
    %94 = vector.broadcast %cst_66 : f32 to vector<16x1xf32>
    %95 = arith.divf %93, %94 : vector<16x1xf32>
    %96 = vector.broadcast %95 : vector<16x1xf32> to vector<16x32xf32>
    %97 = arith.subf %91, %96 : vector<16x32xf32>
    %98 = arith.mulf %97, %97 : vector<16x32xf32>
    %cst_67 = arith.constant dense<0.000000e+00> : vector<16xf32>
    %99 = vector.multi_reduction <add>, %98, %cst_67 [1] : vector<16x32xf32> to vector<16xf32>
    %100 = vector.shape_cast %99 : vector<16xf32> to vector<16x1xf32>
    %cst_68 = arith.constant 3.200000e+01 : f32
    %101 = vector.broadcast %cst_68 : f32 to vector<16x1xf32>
    %102 = arith.divf %100, %101 : vector<16x1xf32>
    %103 = vector.broadcast %95 : vector<16x1xf32> to vector<16x32xf32>
    %104 = arith.subf %91, %103 : vector<16x32xf32>
    %cst_69 = arith.constant 9.99999996E-13 : f32
    %105 = vector.broadcast %cst_69 : f32 to vector<16x1xf32>
    %106 = arith.addf %102, %105 : vector<16x1xf32>
    %107 = math.rsqrt %106 : vector<16x1xf32>
    %108 = vector.broadcast %107 : vector<16x1xf32> to vector<16x32xf32>
    %109 = arith.mulf %104, %108 : vector<16x32xf32>
    %110 = vector.broadcast %14 : vector<1x32xf32> to vector<16x32xf32>
    %111 = arith.mulf %109, %110 : vector<16x32xf32>
    %112 = vector.broadcast %16 : vector<1x32xf32> to vector<16x32xf32>
    %113 = arith.addf %111, %112 : vector<16x32xf32>
    %c0_70 = arith.constant 0 : index
    %c0_71 = arith.constant 0 : index
    %c0_72 = arith.constant 0 : index
    %114 = vector.load %arg13[%c0_70, %c0_71, %c0_72] : memref<1x32x128xf32, #tpu.memory_space<vmem>>, vector<1x32x128xf32>
    %115 = vector.shape_cast %114 : vector<1x32x128xf32> to vector<32x128xf32>
    %cst_73 = arith.constant dense<0.000000e+00> : vector<16x128xf32>
    %116 = tpu.matmul %113, %115, %cst_73 {dimension_numbers = #tpu.dot_dimension_numbers<[1], [0], [0], [1], [0, 0, 1, 1], [], []>} : vector<16x32xf32>, vector<32x128xf32>, vector<16x128xf32> -> vector<16x128xf32>
    %117 = vector.broadcast %22 : vector<1x128xf32> to vector<16x128xf32>
    %118 = arith.addf %116, %117 : vector<16x128xf32>
    %cst_74 = arith.constant 5.000000e-01 : f32
    %119 = vector.broadcast %cst_74 : f32 to vector<16x128xf32>
    %120 = arith.mulf %119, %118 : vector<16x128xf32>
    %cst_75 = arith.constant 4.471500e-02 : f32
    %121 = vector.broadcast %cst_75 : f32 to vector<16x128xf32>
    %122 = arith.mulf %121, %118 : vector<16x128xf32>
    %123 = arith.mulf %122, %118 : vector<16x128xf32>
    %124 = arith.mulf %123, %118 : vector<16x128xf32>
    %125 = arith.addf %118, %124 : vector<16x128xf32>
    %cst_76 = arith.constant 0.797884583 : f32
    %126 = vector.broadcast %cst_76 : f32 to vector<16x128xf32>
    %127 = arith.mulf %126, %125 : vector<16x128xf32>
    %128 = math.tanh %127 : vector<16x128xf32>
    %cst_77 = arith.constant 1.000000e+00 : f32
    %129 = vector.broadcast %cst_77 : f32 to vector<16x128xf32>
    %130 = arith.addf %129, %128 : vector<16x128xf32>
    %131 = arith.mulf %120, %130 : vector<16x128xf32>
    %c0_78 = arith.constant 0 : index
    %c0_79 = arith.constant 0 : index
    %c0_80 = arith.constant 0 : index
    %132 = vector.load %arg15[%c0_78, %c0_79, %c0_80] : memref<1x128x32xf32, #tpu.memory_space<vmem>>, vector<1x128x32xf32>
    %133 = vector.shape_cast %132 : vector<1x128x32xf32> to vector<128x32xf32>
    %cst_81 = arith.constant dense<0.000000e+00> : vector<16x32xf32>
    %134 = tpu.matmul %131, %133, %cst_81 {dimension_numbers = #tpu.dot_dimension_numbers<[1], [0], [0], [1], [0, 0, 1, 1], [], []>} : vector<16x128xf32>, vector<128x32xf32>, vector<16x32xf32> -> vector<16x32xf32>
    %135 = vector.broadcast %24 : vector<1x32xf32> to vector<16x32xf32>
    %136 = arith.addf %134, %135 : vector<16x32xf32>
    %137 = arith.addf %113, %136 : vector<16x32xf32>
    %cst_82 = arith.constant dense<0.000000e+00> : vector<16xf32>
    %138 = vector.multi_reduction <add>, %137, %cst_82 [1] : vector<16x32xf32> to vector<16xf32>
    %139 = vector.shape_cast %138 : vector<16xf32> to vector<16x1xf32>
    %cst_83 = arith.constant 3.200000e+01 : f32
    %140 = vector.broadcast %cst_83 : f32 to vector<16x1xf32>
    %141 = arith.divf %139, %140 : vector<16x1xf32>
    %142 = vector.broadcast %141 : vector<16x1xf32> to vector<16x32xf32>
    %143 = arith.subf %137, %142 : vector<16x32xf32>
    %144 = arith.mulf %143, %143 : vector<16x32xf32>
    %cst_84 = arith.constant dense<0.000000e+00> : vector<16xf32>
    %145 = vector.multi_reduction <add>, %144, %cst_84 [1] : vector<16x32xf32> to vector<16xf32>
    %146 = vector.shape_cast %145 : vector<16xf32> to vector<16x1xf32>
    %cst_85 = arith.constant 3.200000e+01 : f32
    %147 = vector.broadcast %cst_85 : f32 to vector<16x1xf32>
    %148 = arith.divf %146, %147 : vector<16x1xf32>
    %149 = vector.broadcast %141 : vector<16x1xf32> to vector<16x32xf32>
    %150 = arith.subf %137, %149 : vector<16x32xf32>
    %cst_86 = arith.constant 9.99999996E-13 : f32
    %151 = vector.broadcast %cst_86 : f32 to vector<16x1xf32>
    %152 = arith.addf %148, %151 : vector<16x1xf32>
    %153 = math.rsqrt %152 : vector<16x1xf32>
    %154 = vector.broadcast %153 : vector<16x1xf32> to vector<16x32xf32>
    %155 = arith.mulf %150, %154 : vector<16x32xf32>
    %156 = vector.broadcast %18 : vector<1x32xf32> to vector<16x32xf32>
    %157 = arith.mulf %155, %156 : vector<16x32xf32>
    %158 = vector.broadcast %20 : vector<1x32xf32> to vector<16x32xf32>
    %159 = arith.addf %157, %158 : vector<16x32xf32>
    %c0_87 = arith.constant 0 : index
    %c0_88 = arith.constant 0 : index
    %160 = vector.load %arg20[%c0_87, %c0_88] : memref<16x32xf32, #tpu.memory_space<vmem>>, vector<16x32xf32>
    tpu.vector_store %arg20[%c0_87, %c0_88], %159 {strides = array<i32>} : memref<16x32xf32, #tpu.memory_space<vmem>>, vector<16x32xf32>,
    %c0_89 = arith.constant 0 : index
    %c0_90 = arith.constant 0 : index
    %161 = vector.load %arg19[%c0_89, %c0_90] : memref<16x32xf32, #tpu.memory_space<vmem>>, vector<16x32xf32>
    tpu.vector_store %arg19[%c0_89, %c0_90], %159 {strides = array<i32>} : memref<16x32xf32, #tpu.memory_space<vmem>>, vector<16x32xf32>,
    return
  }
  func.func @transform_0(%arg0: i32) -> (i32, i32) {
    %c0_i32 = arith.constant 0 : i32
    %c0_i32_0 = arith.constant 0 : i32
    %c0_i32_1 = arith.constant 0 : i32
    return %c0_i32, %c0_i32_0 : i32, i32
  }
  func.func @transform_1(%arg0: i32) -> (i32, i32, i32) {
    %c0_i32 = arith.constant 0 : i32
    %c0_i32_0 = arith.constant 0 : i32
    %c0_i32_1 = arith.constant 0 : i32
    %c0_i32_2 = arith.constant 0 : i32
    return %c0_i32, %c0_i32_0, %c0_i32_1 : i32, i32, i32
  }
  func.func @transform_2(%arg0: i32) -> (i32, i32, i32) {
    %c0_i32 = arith.constant 0 : i32
    %c0_i32_0 = arith.constant 0 : i32
    %c0_i32_1 = arith.constant 0 : i32
    return %arg0, %c0_i32, %c0_i32_0 : i32, i32, i32
  }
  func.func @transform_3(%arg0: i32) -> (i32, i32, i32) {
    %c0_i32 = arith.constant 0 : i32
    %c0_i32_0 = arith.constant 0 : i32
    %c0_i32_1 = arith.constant 0 : i32
    return %arg0, %c0_i32, %c0_i32_0 : i32, i32, i32
  }
  func.func @transform_4(%arg0: i32) -> (i32, i32, i32) {
    %c0_i32 = arith.constant 0 : i32
    %c0_i32_0 = arith.constant 0 : i32
    %c0_i32_1 = arith.constant 0 : i32
    return %arg0, %c0_i32, %c0_i32_0 : i32, i32, i32
  }
  func.func @transform_5(%arg0: i32) -> (i32, i32, i32) {
    %c0_i32 = arith.constant 0 : i32
    %c0_i32_0 = arith.constant 0 : i32
    %c0_i32_1 = arith.constant 0 : i32
    return %arg0, %c0_i32, %c0_i32_0 : i32, i32, i32
  }
  func.func @transform_6(%arg0: i32) -> (i32, i32, i32) {
    %c0_i32 = arith.constant 0 : i32
    %c0_i32_0 = arith.constant 0 : i32
    %c0_i32_1 = arith.constant 0 : i32
    return %arg0, %c0_i32, %c0_i32_0 : i32, i32, i32
  }
  func.func @transform_7(%arg0: i32) -> (i32, i32, i32) {
    %c0_i32 = arith.constant 0 : i32
    %c0_i32_0 = arith.constant 0 : i32
    %c0_i32_1 = arith.constant 0 : i32
    return %arg0, %c0_i32, %c0_i32_0 : i32, i32, i32
  }
  func.func @transform_8(%arg0: i32) -> (i32, i32, i32) {
    %c0_i32 = arith.constant 0 : i32
    %c0_i32_0 = arith.constant 0 : i32
    %c0_i32_1 = arith.constant 0 : i32
    return %arg0, %c0_i32, %c0_i32_0 : i32, i32, i32
  }
  func.func @transform_9(%arg0: i32) -> (i32, i32, i32) {
    %c0_i32 = arith.constant 0 : i32
    %c0_i32_0 = arith.constant 0 : i32
    %c0_i32_1 = arith.constant 0 : i32
    return %arg0, %c0_i32, %c0_i32_0 : i32, i32, i32
  }
  func.func @transform_10(%arg0: i32) -> (i32, i32, i32) {
    %c0_i32 = arith.constant 0 : i32
    %c0_i32_0 = arith.constant 0 : i32
    %c0_i32_1 = arith.constant 0 : i32
    return %arg0, %c0_i32, %c0_i32_0 : i32, i32, i32
  }
  func.func @transform_11(%arg0: i32) -> (i32, i32, i32) {
    %c0_i32 = arith.constant 0 : i32
    %c0_i32_0 = arith.constant 0 : i32
    %c0_i32_1 = arith.constant 0 : i32
    return %arg0, %c0_i32, %c0_i32_0 : i32, i32, i32
  }
  func.func @transform_12(%arg0: i32) -> (i32, i32, i32) {
    %c0_i32 = arith.constant 0 : i32
    %c0_i32_0 = arith.constant 0 : i32
    %c0_i32_1 = arith.constant 0 : i32
    return %arg0, %c0_i32, %c0_i32_0 : i32, i32, i32
  }
  func.func @transform_13(%arg0: i32) -> (i32, i32, i32) {
    %c0_i32 = arith.constant 0 : i32
    %c0_i32_0 = arith.constant 0 : i32
    %c0_i32_1 = arith.constant 0 : i32
    return %arg0, %c0_i32, %c0_i32_0 : i32, i32, i32
  }
  func.func @transform_14(%arg0: i32) -> (i32, i32, i32) {
    %c0_i32 = arith.constant 0 : i32
    %c0_i32_0 = arith.constant 0 : i32
    %c0_i32_1 = arith.constant 0 : i32
    return %arg0, %c0_i32, %c0_i32_0 : i32, i32, i32
  }
  func.func @transform_15(%arg0: i32) -> (i32, i32, i32) {
    %c0_i32 = arith.constant 0 : i32
    %c0_i32_0 = arith.constant 0 : i32
    %c0_i32_1 = arith.constant 0 : i32
    return %arg0, %c0_i32, %c0_i32_0 : i32, i32, i32
  }
  func.func @transform_16(%arg0: i32) -> (i32, i32, i32) {
    %c0_i32 = arith.constant 0 : i32
    %c0_i32_0 = arith.constant 0 : i32
    %c0_i32_1 = arith.constant 0 : i32
    return %arg0, %c0_i32, %c0_i32_0 : i32, i32, i32
  }
  func.func @transform_17(%arg0: i32) -> (i32, i32, i32) {
    %c0_i32 = arith.constant 0 : i32
    %c0_i32_0 = arith.constant 0 : i32
    %c0_i32_1 = arith.constant 0 : i32
    return %arg0, %c0_i32, %c0_i32_0 : i32, i32, i32
  }
  func.func @transform_18(%arg0: i32) -> (i32, i32) {
    %c0_i32 = arith.constant 0 : i32
    %c0_i32_0 = arith.constant 0 : i32
    %c0_i32_1 = arith.constant 0 : i32
    return %c0_i32, %c0_i32_0 : i32, i32
  }
}

module attributes {stable_mosaic.version = 11 : i64} {
  func.func @encoder_stack_kernel(%arg0: i32, %arg1: memref<16x32xf32, #tpu.memory_space<vmem>>, %arg2: memref<2x1x8xf32, #tpu.memory_space<vmem>>, %arg3: memref<1x32x32xf32, #tpu.memory_space<vmem>>, %arg4: memref<1x1x32xf32, #tpu.memory_space<vmem>>, %arg5: memref<1x32x32xf32, #tpu.memory_space<vmem>>, %arg6: memref<1x1x32xf32, #tpu.memory_space<vmem>>, %arg7: memref<1x32x32xf32, #tpu.memory_space<vmem>>, %arg8: memref<1x1x32xf32, #tpu.memory_space<vmem>>, %arg9: memref<1x32x32xf32, #tpu.memory_space<vmem>>, %arg10: memref<1x1x32xf32, #tpu.memory_space<vmem>>, %arg11: memref<1x1x32xf32, #tpu.memory_space<vmem>>, %arg12: memref<1x1x32xf32, #tpu.memory_space<vmem>>, %arg13: memref<1x32x2048xf32, #tpu.memory_space<vmem>>, %arg14: memref<1x1x2048xf32, #tpu.memory_space<vmem>>, %arg15: memref<1x2048x32xf32, #tpu.memory_space<vmem>>, %arg16: memref<1x1x32xf32, #tpu.memory_space<vmem>>, %arg17: memref<1x1x32xf32, #tpu.memory_space<vmem>>, %arg18: memref<1x1x32xf32, #tpu.memory_space<vmem>>, %arg19: memref<16x32xf32, #tpu.memory_space<vmem>>, %arg20: memref<16x32xf32, #tpu.memory_space<vmem>>, %arg21: memref<16x32xf32, #tpu.memory_space<vmem>>) attributes {dimension_semantics = [#tpu.dimension_semantics<arbitrary>], iteration_bounds = array<i64: 2>, scalar_prefetch = 0 : i64, scratch_operands = 2 : i64, tpu.core_type = #tpu.core_type<tc>, window_params = [{pipeline_mode = #tpu.pipeline_mode<synchronous>, transform_indices = @transform_0, window_bounds = array<i64: 16, 32>}, {pipeline_mode = #tpu.pipeline_mode<synchronous>, transform_indices = @transform_1, window_bounds = array<i64: 2, 1, 8>}, {transform_indices = @transform_2, window_bounds = array<i64: 1, 32, 32>}, {transform_indices = @transform_3, window_bounds = array<i64: 1, 1, 32>}, {transform_indices = @transform_4, window_bounds = array<i64: 1, 32, 32>}, {transform_indices = @transform_5, window_bounds = array<i64: 1, 1, 32>}, {transform_indices = @transform_6, window_bounds = array<i64: 1, 32, 32>}, {transform_indices = @transform_7, window_bounds = array<i64: 1, 1, 32>}, {transform_indices = @transform_8, window_bounds = array<i64: 1, 32, 32>}, {transform_indices = @transform_9, window_bounds = array<i64: 1, 1, 32>}, {transform_indices = @transform_10, window_bounds = array<i64: 1, 1, 32>}, {transform_indices = @transform_11, window_bounds = array<i64: 1, 1, 32>}, {transform_indices = @transform_12, window_bounds = array<i64: 1, 32, 2048>}, {transform_indices = @transform_13, window_bounds = array<i64: 1, 1, 2048>}, {transform_indices = @transform_14, window_bounds = array<i64: 1, 2048, 32>}, {transform_indices = @transform_15, window_bounds = array<i64: 1, 1, 32>}, {transform_indices = @transform_16, window_bounds = array<i64: 1, 1, 32>}, {transform_indices = @transform_17, window_bounds = array<i64: 1, 1, 32>}, {pipeline_mode = #tpu.pipeline_mode<synchronous>, transform_indices = @transform_18, window_bounds = array<i64: 16, 32>}]} {
    %c0_i32 = arith.constant 0 : i32
    %0 = arith.cmpi eq, %arg0, %c0_i32 : i32
    %1 = arith.extui %0 : i1 to i32
    %c0_i32_0 = arith.constant 0 : i32
    %2 = arith.cmpi ne, %1, %c0_i32_0 : i32
    scf.if %2 {
      %c0_88 = arith.constant 0 : index
      %c0_89 = arith.constant 0 : index
      %151 = vector.load %arg1[%c0_88, %c0_89] : memref<16x32xf32, #tpu.memory_space<vmem>>, vector<16x32xf32>
      %c0_90 = arith.constant 0 : index
      %c0_91 = arith.constant 0 : index
      %152 = vector.load %arg20[%c0_90, %c0_91] : memref<16x32xf32, #tpu.memory_space<vmem>>, vector<16x32xf32>
      tpu.vector_store %arg20[%c0_90, %c0_91], %151 {strides = array<i32>} : memref<16x32xf32, #tpu.memory_space<vmem>>, vector<16x32xf32>,
    } else {
    }
    %c0 = arith.constant 0 : index
    %c0_1 = arith.constant 0 : index
    %3 = vector.load %arg20[%c0, %c0_1] : memref<16x32xf32, #tpu.memory_space<vmem>>, vector<16x32xf32>
    %c0_2 = arith.constant 0 : index
    %c0_3 = arith.constant 0 : index
    %c0_4 = arith.constant 0 : index
    %4 = vector.load %arg2[%c0_2, %c0_3, %c0_4] : memref<2x1x8xf32, #tpu.memory_space<vmem>>, vector<2x1x8xf32>
    %c0_5 = arith.constant 0 : index
    %c0_6 = arith.constant 0 : index
    %c0_7 = arith.constant 0 : index
    %5 = vector.load %arg4[%c0_5, %c0_6, %c0_7] : memref<1x1x32xf32, #tpu.memory_space<vmem>>, vector<1x1x32xf32>
    %6 = vector.shape_cast %5 : vector<1x1x32xf32> to vector<1x32xf32>
    %c0_8 = arith.constant 0 : index
    %c0_9 = arith.constant 0 : index
    %c0_10 = arith.constant 0 : index
    %7 = vector.load %arg6[%c0_8, %c0_9, %c0_10] : memref<1x1x32xf32, #tpu.memory_space<vmem>>, vector<1x1x32xf32>
    %8 = vector.shape_cast %7 : vector<1x1x32xf32> to vector<1x32xf32>
    %c0_11 = arith.constant 0 : index
    %c0_12 = arith.constant 0 : index
    %c0_13 = arith.constant 0 : index
    %9 = vector.load %arg8[%c0_11, %c0_12, %c0_13] : memref<1x1x32xf32, #tpu.memory_space<vmem>>, vector<1x1x32xf32>
    %10 = vector.shape_cast %9 : vector<1x1x32xf32> to vector<1x32xf32>
    %c0_14 = arith.constant 0 : index
    %c0_15 = arith.constant 0 : index
    %c0_16 = arith.constant 0 : index
    %11 = vector.load %arg10[%c0_14, %c0_15, %c0_16] : memref<1x1x32xf32, #tpu.memory_space<vmem>>, vector<1x1x32xf32>
    %12 = vector.shape_cast %11 : vector<1x1x32xf32> to vector<1x32xf32>
    %c0_17 = arith.constant 0 : index
    %c0_18 = arith.constant 0 : index
    %c0_19 = arith.constant 0 : index
    %13 = vector.load %arg11[%c0_17, %c0_18, %c0_19] : memref<1x1x32xf32, #tpu.memory_space<vmem>>, vector<1x1x32xf32>
    %14 = vector.shape_cast %13 : vector<1x1x32xf32> to vector<1x32xf32>
    %c0_20 = arith.constant 0 : index
    %c0_21 = arith.constant 0 : index
    %c0_22 = arith.constant 0 : index
    %15 = vector.load %arg12[%c0_20, %c0_21, %c0_22] : memref<1x1x32xf32, #tpu.memory_space<vmem>>, vector<1x1x32xf32>
    %16 = vector.shape_cast %15 : vector<1x1x32xf32> to vector<1x32xf32>
    %c0_23 = arith.constant 0 : index
    %c0_24 = arith.constant 0 : index
    %c0_25 = arith.constant 0 : index
    %17 = vector.load %arg17[%c0_23, %c0_24, %c0_25] : memref<1x1x32xf32, #tpu.memory_space<vmem>>, vector<1x1x32xf32>
    %18 = vector.shape_cast %17 : vector<1x1x32xf32> to vector<1x32xf32>
    %c0_26 = arith.constant 0 : index
    %c0_27 = arith.constant 0 : index
    %c0_28 = arith.constant 0 : index
    %19 = vector.load %arg18[%c0_26, %c0_27, %c0_28] : memref<1x1x32xf32, #tpu.memory_space<vmem>>, vector<1x1x32xf32>
    %20 = vector.shape_cast %19 : vector<1x1x32xf32> to vector<1x32xf32>
    %c0_29 = arith.constant 0 : index
    %c0_30 = arith.constant 0 : index
    %c0_31 = arith.constant 0 : index
    %21 = vector.load %arg14[%c0_29, %c0_30, %c0_31] : memref<1x1x2048xf32, #tpu.memory_space<vmem>>, vector<1x1x2048xf32>
    %22 = vector.shape_cast %21 : vector<1x1x2048xf32> to vector<1x2048xf32>
    %c0_32 = arith.constant 0 : index
    %c0_33 = arith.constant 0 : index
    %c0_34 = arith.constant 0 : index
    %23 = vector.load %arg16[%c0_32, %c0_33, %c0_34] : memref<1x1x32xf32, #tpu.memory_space<vmem>>, vector<1x1x32xf32>
    %24 = vector.shape_cast %23 : vector<1x1x32xf32> to vector<1x32xf32>
    %c0_35 = arith.constant 0 : index
    %c0_36 = arith.constant 0 : index
    %c0_37 = arith.constant 0 : index
    %25 = vector.load %arg3[%c0_35, %c0_36, %c0_37] : memref<1x32x32xf32, #tpu.memory_space<vmem>>, vector<1x32x32xf32>
    %26 = vector.shape_cast %25 : vector<1x32x32xf32> to vector<32x32xf32>
    %cst = arith.constant dense<0.000000e+00> : vector<16x32xf32>
    %27 = tpu.matmul %3, %26, %cst {dimension_numbers = #tpu.dot_dimension_numbers<[1], [0], [0], [1], [0, 0, 1, 1], [], []>} : vector<16x32xf32>, vector<32x32xf32>, vector<16x32xf32> -> vector<16x32xf32>
    %28 = vector.broadcast %6 : vector<1x32xf32> to vector<16x32xf32>
    %29 = arith.addf %27, %28 : vector<16x32xf32>
    %c0_38 = arith.constant 0 : index
    %c0_39 = arith.constant 0 : index
    %c0_40 = arith.constant 0 : index
    %30 = vector.load %arg5[%c0_38, %c0_39, %c0_40] : memref<1x32x32xf32, #tpu.memory_space<vmem>>, vector<1x32x32xf32>
    %31 = vector.shape_cast %30 : vector<1x32x32xf32> to vector<32x32xf32>
    %cst_41 = arith.constant dense<0.000000e+00> : vector<16x32xf32>
    %32 = tpu.matmul %3, %31, %cst_41 {dimension_numbers = #tpu.dot_dimension_numbers<[1], [0], [0], [1], [0, 0, 1, 1], [], []>} : vector<16x32xf32>, vector<32x32xf32>, vector<16x32xf32> -> vector<16x32xf32>
    %33 = vector.broadcast %8 : vector<1x32xf32> to vector<16x32xf32>
    %34 = arith.addf %32, %33 : vector<16x32xf32>
    %c0_42 = arith.constant 0 : index
    %c0_43 = arith.constant 0 : index
    %c0_44 = arith.constant 0 : index
    %35 = vector.load %arg7[%c0_42, %c0_43, %c0_44] : memref<1x32x32xf32, #tpu.memory_space<vmem>>, vector<1x32x32xf32>
    %36 = vector.shape_cast %35 : vector<1x32x32xf32> to vector<32x32xf32>
    %cst_45 = arith.constant dense<0.000000e+00> : vector<16x32xf32>
    %37 = tpu.matmul %3, %36, %cst_45 {dimension_numbers = #tpu.dot_dimension_numbers<[1], [0], [0], [1], [0, 0, 1, 1], [], []>} : vector<16x32xf32>, vector<32x32xf32>, vector<16x32xf32> -> vector<16x32xf32>
    %38 = vector.broadcast %10 : vector<1x32xf32> to vector<16x32xf32>
    %39 = arith.addf %37, %38 : vector<16x32xf32>
    %40 = vector.shape_cast %29 : vector<16x32xf32> to vector<2x8x32xf32>
    %41 = vector.shape_cast %34 : vector<16x32xf32> to vector<2x8x32xf32>
    %42 = vector.shape_cast %39 : vector<16x32xf32> to vector<2x8x32xf32>
    %43 = vector.extract_strided_slice %40 {offsets = [0, 0, 0], sizes = [2, 8, 16], strides = [1, 1, 1]} : vector<2x8x32xf32> to vector<2x8x16xf32>
    %44 = vector.extract_strided_slice %41 {offsets = [0, 0, 0], sizes = [2, 8, 16], strides = [1, 1, 1]} : vector<2x8x32xf32> to vector<2x8x16xf32>
    %45 = vector.extract_strided_slice %42 {offsets = [0, 0, 0], sizes = [2, 8, 16], strides = [1, 1, 1]} : vector<2x8x32xf32> to vector<2x8x16xf32>
    "tpu.trace_start"() <{level = 10 : i32, message = "bqd,bkd->bqk"}> : () -> ()
    %cst_46 = arith.constant dense<0.000000e+00> : vector<2x8x8xf32>
    %46 = tpu.matmul %43, %44, %cst_46 {dimension_numbers = #tpu.dot_dimension_numbers<[2], [2], [1], [1], [0, 0, 0, 1, 1, 1], [0], [0]>} : vector<2x8x16xf32>, vector<2x8x16xf32>, vector<2x8x8xf32> -> vector<2x8x8xf32>
    "tpu.trace_stop"() : () -> ()
    %cst_47 = arith.constant 2.500000e-01 : f32
    %47 = vector.broadcast %cst_47 : f32 to vector<2x8x8xf32>
    %48 = arith.mulf %46, %47 : vector<2x8x8xf32>
    %49 = vector.broadcast %4 : vector<2x1x8xf32> to vector<2x8x8xf32>
    %50 = arith.addf %48, %49 : vector<2x8x8xf32>
    %cst_48 = arith.constant dense<0xFF800000> : vector<2x8xf32>
    %51 = vector.multi_reduction <maximumf>, %50, %cst_48 [2] : vector<2x8x8xf32> to vector<2x8xf32>
    %52 = vector.shape_cast %51 : vector<2x8xf32> to vector<2x8x1xf32>
    %53 = vector.broadcast %52 : vector<2x8x1xf32> to vector<2x8x8xf32>
    %54 = arith.subf %50, %53 : vector<2x8x8xf32>
    %55 = math.exp %54 : vector<2x8x8xf32>
    %cst_49 = arith.constant dense<0.000000e+00> : vector<2x8xf32>
    %56 = vector.multi_reduction <add>, %55, %cst_49 [2] : vector<2x8x8xf32> to vector<2x8xf32>
    %57 = vector.shape_cast %56 : vector<2x8xf32> to vector<2x8x1xf32>
    %58 = tpu.reciprocal %57 {approx = true} : vector<2x8x1xf32> -> vector<2x8x1xf32>
    %59 = vector.broadcast %58 : vector<2x8x1xf32> to vector<2x8x8xf32>
    %60 = arith.mulf %55, %59 : vector<2x8x8xf32>
    "tpu.trace_start"() <{level = 10 : i32, message = "bqk,bkd->bqd"}> : () -> ()
    %cst_50 = arith.constant dense<0.000000e+00> : vector<2x8x16xf32>
    %61 = tpu.matmul %60, %45, %cst_50 {dimension_numbers = #tpu.dot_dimension_numbers<[2], [1], [1], [2], [0, 0, 0, 1, 1, 2], [0], [0]>} : vector<2x8x8xf32>, vector<2x8x16xf32>, vector<2x8x16xf32> -> vector<2x8x16xf32>
    "tpu.trace_stop"() : () -> ()
    %62 = vector.shape_cast %61 : vector<2x8x16xf32> to vector<16x16xf32>
    %c0_51 = arith.constant 0 : index
    %c0_52 = arith.constant 0 : index
    %63 = vector.load %arg21[%c0_51, %c0_52] : memref<16x32xf32, #tpu.memory_space<vmem>>, vector<16x16xf32>
    tpu.vector_store %arg21[%c0_51, %c0_52], %62 {strides = array<i32>} : memref<16x32xf32, #tpu.memory_space<vmem>>, vector<16x16xf32>,
    %64 = vector.extract_strided_slice %40 {offsets = [0, 0, 16], sizes = [2, 8, 16], strides = [1, 1, 1]} : vector<2x8x32xf32> to vector<2x8x16xf32>
    %65 = vector.extract_strided_slice %41 {offsets = [0, 0, 16], sizes = [2, 8, 16], strides = [1, 1, 1]} : vector<2x8x32xf32> to vector<2x8x16xf32>
    %66 = vector.extract_strided_slice %42 {offsets = [0, 0, 16], sizes = [2, 8, 16], strides = [1, 1, 1]} : vector<2x8x32xf32> to vector<2x8x16xf32>
    "tpu.trace_start"() <{level = 10 : i32, message = "bqd,bkd->bqk"}> : () -> ()
    %cst_53 = arith.constant dense<0.000000e+00> : vector<2x8x8xf32>
    %67 = tpu.matmul %64, %65, %cst_53 {dimension_numbers = #tpu.dot_dimension_numbers<[2], [2], [1], [1], [0, 0, 0, 1, 1, 1], [0], [0]>} : vector<2x8x16xf32>, vector<2x8x16xf32>, vector<2x8x8xf32> -> vector<2x8x8xf32>
    "tpu.trace_stop"() : () -> ()
    %cst_54 = arith.constant 2.500000e-01 : f32
    %68 = vector.broadcast %cst_54 : f32 to vector<2x8x8xf32>
    %69 = arith.mulf %67, %68 : vector<2x8x8xf32>
    %70 = vector.broadcast %4 : vector<2x1x8xf32> to vector<2x8x8xf32>
    %71 = arith.addf %69, %70 : vector<2x8x8xf32>
    %cst_55 = arith.constant dense<0xFF800000> : vector<2x8xf32>
    %72 = vector.multi_reduction <maximumf>, %71, %cst_55 [2] : vector<2x8x8xf32> to vector<2x8xf32>
    %73 = vector.shape_cast %72 : vector<2x8xf32> to vector<2x8x1xf32>
    %74 = vector.broadcast %73 : vector<2x8x1xf32> to vector<2x8x8xf32>
    %75 = arith.subf %71, %74 : vector<2x8x8xf32>
    %76 = math.exp %75 : vector<2x8x8xf32>
    %cst_56 = arith.constant dense<0.000000e+00> : vector<2x8xf32>
    %77 = vector.multi_reduction <add>, %76, %cst_56 [2] : vector<2x8x8xf32> to vector<2x8xf32>
    %78 = vector.shape_cast %77 : vector<2x8xf32> to vector<2x8x1xf32>
    %79 = tpu.reciprocal %78 {approx = true} : vector<2x8x1xf32> -> vector<2x8x1xf32>
    %80 = vector.broadcast %79 : vector<2x8x1xf32> to vector<2x8x8xf32>
    %81 = arith.mulf %76, %80 : vector<2x8x8xf32>
    "tpu.trace_start"() <{level = 10 : i32, message = "bqk,bkd->bqd"}> : () -> ()
    %cst_57 = arith.constant dense<0.000000e+00> : vector<2x8x16xf32>
    %82 = tpu.matmul %81, %66, %cst_57 {dimension_numbers = #tpu.dot_dimension_numbers<[2], [1], [1], [2], [0, 0, 0, 1, 1, 2], [0], [0]>} : vector<2x8x8xf32>, vector<2x8x16xf32>, vector<2x8x16xf32> -> vector<2x8x16xf32>
    "tpu.trace_stop"() : () -> ()
    %83 = vector.shape_cast %82 : vector<2x8x16xf32> to vector<16x16xf32>
    %c0_58 = arith.constant 0 : index
    %c16 = arith.constant 16 : index
    %84 = vector.load %arg21[%c0_58, %c16] : memref<16x32xf32, #tpu.memory_space<vmem>>, vector<16x16xf32>
    tpu.vector_store %arg21[%c0_58, %c16], %83 {strides = array<i32>} : memref<16x32xf32, #tpu.memory_space<vmem>>, vector<16x16xf32>,
    %c0_59 = arith.constant 0 : index
    %c0_60 = arith.constant 0 : index
    %85 = vector.load %arg21[%c0_59, %c0_60] : memref<16x32xf32, #tpu.memory_space<vmem>>, vector<16x32xf32>
    %c0_61 = arith.constant 0 : index
    %c0_62 = arith.constant 0 : index
    %c0_63 = arith.constant 0 : index
    %86 = vector.load %arg9[%c0_61, %c0_62, %c0_63] : memref<1x32x32xf32, #tpu.memory_space<vmem>>, vector<1x32x32xf32>
    %87 = vector.shape_cast %86 : vector<1x32x32xf32> to vector<32x32xf32>
    %cst_64 = arith.constant dense<0.000000e+00> : vector<16x32xf32>
    %88 = tpu.matmul %85, %87, %cst_64 {dimension_numbers = #tpu.dot_dimension_numbers<[1], [0], [0], [1], [0, 0, 1, 1], [], []>} : vector<16x32xf32>, vector<32x32xf32>, vector<16x32xf32> -> vector<16x32xf32>
    %89 = vector.broadcast %12 : vector<1x32xf32> to vector<16x32xf32>
    %90 = arith.addf %88, %89 : vector<16x32xf32>
    %91 = arith.addf %3, %90 : vector<16x32xf32>
    %cst_65 = arith.constant dense<0.000000e+00> : vector<16xf32>
    %92 = vector.multi_reduction <add>, %91, %cst_65 [1] : vector<16x32xf32> to vector<16xf32>
    %93 = vector.shape_cast %92 : vector<16xf32> to vector<16x1xf32>
    %cst_66 = arith.constant 3.200000e+01 : f32
    %94 = vector.broadcast %cst_66 : f32 to vector<16x1xf32>
    %95 = arith.divf %93, %94 : vector<16x1xf32>
    %96 = vector.broadcast %95 : vector<16x1xf32> to vector<16x32xf32>
    %97 = arith.subf %91, %96 : vector<16x32xf32>
    %98 = arith.mulf %97, %97 : vector<16x32xf32>
    %cst_67 = arith.constant dense<0.000000e+00> : vector<16xf32>
    %99 = vector.multi_reduction <add>, %98, %cst_67 [1] : vector<16x32xf32> to vector<16xf32>
    %100 = vector.shape_cast %99 : vector<16xf32> to vector<16x1xf32>
    %cst_68 = arith.constant 3.200000e+01 : f32
    %101 = vector.broadcast %cst_68 : f32 to vector<16x1xf32>
    %102 = arith.divf %100, %101 : vector<16x1xf32>
    %103 = vector.broadcast %95 : vector<16x1xf32> to vector<16x32xf32>
    %104 = arith.subf %91, %103 : vector<16x32xf32>
    %cst_69 = arith.constant 9.99999974E-6 : f32
    %105 = vector.broadcast %cst_69 : f32 to vector<16x1xf32>
    %106 = arith.addf %102, %105 : vector<16x1xf32>
    %107 = math.rsqrt %106 : vector<16x1xf32>
    %108 = vector.broadcast %107 : vector<16x1xf32> to vector<16x32xf32>
    %109 = arith.mulf %104, %108 : vector<16x32xf32>
    %110 = vector.broadcast %14 : vector<1x32xf32> to vector<16x32xf32>
    %111 = arith.mulf %109, %110 : vector<16x32xf32>
    %112 = vector.broadcast %16 : vector<1x32xf32> to vector<16x32xf32>
    %113 = arith.addf %111, %112 : vector<16x32xf32>
    %c0_70 = arith.constant 0 : index
    %c0_71 = arith.constant 0 : index
    %c0_72 = arith.constant 0 : index
    %114 = vector.load %arg13[%c0_70, %c0_71, %c0_72] : memref<1x32x2048xf32, #tpu.memory_space<vmem>>, vector<1x32x2048xf32>
    %115 = vector.shape_cast %114 : vector<1x32x2048xf32> to vector<32x2048xf32>
    %cst_73 = arith.constant dense<0.000000e+00> : vector<16x2048xf32>
    %116 = tpu.matmul %113, %115, %cst_73 {dimension_numbers = #tpu.dot_dimension_numbers<[1], [0], [0], [1], [0, 0, 1, 1], [], []>} : vector<16x32xf32>, vector<32x2048xf32>, vector<16x2048xf32> -> vector<16x2048xf32>
    %117 = vector.broadcast %22 : vector<1x2048xf32> to vector<16x2048xf32>
    %118 = arith.addf %116, %117 : vector<16x2048xf32>
    %cst_74 = arith.constant 0.000000e+00 : f32
    %119 = vector.broadcast %cst_74 : f32 to vector<16x2048xf32>
    %120 = arith.maximumf %118, %119 : vector<16x2048xf32>
    %c0_75 = arith.constant 0 : index
    %c0_76 = arith.constant 0 : index
    %c0_77 = arith.constant 0 : index
    %121 = vector.load %arg15[%c0_75, %c0_76, %c0_77] : memref<1x2048x32xf32, #tpu.memory_space<vmem>>, vector<1x2048x32xf32>
    %122 = vector.shape_cast %121 : vector<1x2048x32xf32> to vector<2048x32xf32>
    %cst_78 = arith.constant dense<0.000000e+00> : vector<16x32xf32>
    %123 = tpu.matmul %120, %122, %cst_78 {dimension_numbers = #tpu.dot_dimension_numbers<[1], [0], [0], [1], [0, 0, 1, 1], [], []>} : vector<16x2048xf32>, vector<2048x32xf32>, vector<16x32xf32> -> vector<16x32xf32>
    %124 = vector.broadcast %24 : vector<1x32xf32> to vector<16x32xf32>
    %125 = arith.addf %123, %124 : vector<16x32xf32>
    %126 = arith.addf %113, %125 : vector<16x32xf32>
    %cst_79 = arith.constant dense<0.000000e+00> : vector<16xf32>
    %127 = vector.multi_reduction <add>, %126, %cst_79 [1] : vector<16x32xf32> to vector<16xf32>
    %128 = vector.shape_cast %127 : vector<16xf32> to vector<16x1xf32>
    %cst_80 = arith.constant 3.200000e+01 : f32
    %129 = vector.broadcast %cst_80 : f32 to vector<16x1xf32>
    %130 = arith.divf %128, %129 : vector<16x1xf32>
    %131 = vector.broadcast %130 : vector<16x1xf32> to vector<16x32xf32>
    %132 = arith.subf %126, %131 : vector<16x32xf32>
    %133 = arith.mulf %132, %132 : vector<16x32xf32>
    %cst_81 = arith.constant dense<0.000000e+00> : vector<16xf32>
    %134 = vector.multi_reduction <add>, %133, %cst_81 [1] : vector<16x32xf32> to vector<16xf32>
    %135 = vector.shape_cast %134 : vector<16xf32> to vector<16x1xf32>
    %cst_82 = arith.constant 3.200000e+01 : f32
    %136 = vector.broadcast %cst_82 : f32 to vector<16x1xf32>
    %137 = arith.divf %135, %136 : vector<16x1xf32>
    %138 = vector.broadcast %130 : vector<16x1xf32> to vector<16x32xf32>
    %139 = arith.subf %126, %138 : vector<16x32xf32>
    %cst_83 = arith.constant 9.99999974E-6 : f32
    %140 = vector.broadcast %cst_83 : f32 to vector<16x1xf32>
    %141 = arith.addf %137, %140 : vector<16x1xf32>
    %142 = math.rsqrt %141 : vector<16x1xf32>
    %143 = vector.broadcast %142 : vector<16x1xf32> to vector<16x32xf32>
    %144 = arith.mulf %139, %143 : vector<16x32xf32>
    %145 = vector.broadcast %18 : vector<1x32xf32> to vector<16x32xf32>
    %146 = arith.mulf %144, %145 : vector<16x32xf32>
    %147 = vector.broadcast %20 : vector<1x32xf32> to vector<16x32xf32>
    %148 = arith.addf %146, %147 : vector<16x32xf32>
    %c0_84 = arith.constant 0 : index
    %c0_85 = arith.constant 0 : index
    %149 = vector.load %arg20[%c0_84, %c0_85] : memref<16x32xf32, #tpu.memory_space<vmem>>, vector<16x32xf32>
    tpu.vector_store %arg20[%c0_84, %c0_85], %148 {strides = array<i32>} : memref<16x32xf32, #tpu.memory_space<vmem>>, vector<16x32xf32>,
    %c0_86 = arith.constant 0 : index
    %c0_87 = arith.constant 0 : index
    %150 = vector.load %arg19[%c0_86, %c0_87] : memref<16x32xf32, #tpu.memory_space<vmem>>, vector<16x32xf32>
    tpu.vector_store %arg19[%c0_86, %c0_87], %148 {strides = array<i32>} : memref<16x32xf32, #tpu.memory_space<vmem>>, vector<16x32xf32>,
    return
  }
  func.func @transform_0(%arg0: i32) -> (i32, i32) {
    %c0_i32 = arith.constant 0 : i32
    %c0_i32_0 = arith.constant 0 : i32
    %c0_i32_1 = arith.constant 0 : i32
    return %c0_i32, %c0_i32_0 : i32, i32
  }
  func.func @transform_1(%arg0: i32) -> (i32, i32, i32) {
    %c0_i32 = arith.constant 0 : i32
    %c0_i32_0 = arith.constant 0 : i32
    %c0_i32_1 = arith.constant 0 : i32
    %c0_i32_2 = arith.constant 0 : i32
    return %c0_i32, %c0_i32_0, %c0_i32_1 : i32, i32, i32
  }
  func.func @transform_2(%arg0: i32) -> (i32, i32, i32) {
    %c0_i32 = arith.constant 0 : i32
    %c0_i32_0 = arith.constant 0 : i32
    %c0_i32_1 = arith.constant 0 : i32
    return %arg0, %c0_i32, %c0_i32_0 : i32, i32, i32
  }
  func.func @transform_3(%arg0: i32) -> (i32, i32, i32) {
    %c0_i32 = arith.constant 0 : i32
    %c0_i32_0 = arith.constant 0 : i32
    %c0_i32_1 = arith.constant 0 : i32
    return %arg0, %c0_i32, %c0_i32_0 : i32, i32, i32
  }
  func.func @transform_4(%arg0: i32) -> (i32, i32, i32) {
    %c0_i32 = arith.constant 0 : i32
    %c0_i32_0 = arith.constant 0 : i32
    %c0_i32_1 = arith.constant 0 : i32
    return %arg0, %c0_i32, %c0_i32_0 : i32, i32, i32
  }
  func.func @transform_5(%arg0: i32) -> (i32, i32, i32) {
    %c0_i32 = arith.constant 0 : i32
    %c0_i32_0 = arith.constant 0 : i32
    %c0_i32_1 = arith.constant 0 : i32
    return %arg0, %c0_i32, %c0_i32_0 : i32, i32, i32
  }
  func.func @transform_6(%arg0: i32) -> (i32, i32, i32) {
    %c0_i32 = arith.constant 0 : i32
    %c0_i32_0 = arith.constant 0 : i32
    %c0_i32_1 = arith.constant 0 : i32
    return %arg0, %c0_i32, %c0_i32_0 : i32, i32, i32
  }
  func.func @transform_7(%arg0: i32) -> (i32, i32, i32) {
    %c0_i32 = arith.constant 0 : i32
    %c0_i32_0 = arith.constant 0 : i32
    %c0_i32_1 = arith.constant 0 : i32
    return %arg0, %c0_i32, %c0_i32_0 : i32, i32, i32
  }
  func.func @transform_8(%arg0: i32) -> (i32, i32, i32) {
    %c0_i32 = arith.constant 0 : i32
    %c0_i32_0 = arith.constant 0 : i32
    %c0_i32_1 = arith.constant 0 : i32
    return %arg0, %c0_i32, %c0_i32_0 : i32, i32, i32
  }
  func.func @transform_9(%arg0: i32) -> (i32, i32, i32) {
    %c0_i32 = arith.constant 0 : i32
    %c0_i32_0 = arith.constant 0 : i32
    %c0_i32_1 = arith.constant 0 : i32
    return %arg0, %c0_i32, %c0_i32_0 : i32, i32, i32
  }
  func.func @transform_10(%arg0: i32) -> (i32, i32, i32) {
    %c0_i32 = arith.constant 0 : i32
    %c0_i32_0 = arith.constant 0 : i32
    %c0_i32_1 = arith.constant 0 : i32
    return %arg0, %c0_i32, %c0_i32_0 : i32, i32, i32
  }
  func.func @transform_11(%arg0: i32) -> (i32, i32, i32) {
    %c0_i32 = arith.constant 0 : i32
    %c0_i32_0 = arith.constant 0 : i32
    %c0_i32_1 = arith.constant 0 : i32
    return %arg0, %c0_i32, %c0_i32_0 : i32, i32, i32
  }
  func.func @transform_12(%arg0: i32) -> (i32, i32, i32) {
    %c0_i32 = arith.constant 0 : i32
    %c0_i32_0 = arith.constant 0 : i32
    %c0_i32_1 = arith.constant 0 : i32
    return %arg0, %c0_i32, %c0_i32_0 : i32, i32, i32
  }
  func.func @transform_13(%arg0: i32) -> (i32, i32, i32) {
    %c0_i32 = arith.constant 0 : i32
    %c0_i32_0 = arith.constant 0 : i32
    %c0_i32_1 = arith.constant 0 : i32
    return %arg0, %c0_i32, %c0_i32_0 : i32, i32, i32
  }
  func.func @transform_14(%arg0: i32) -> (i32, i32, i32) {
    %c0_i32 = arith.constant 0 : i32
    %c0_i32_0 = arith.constant 0 : i32
    %c0_i32_1 = arith.constant 0 : i32
    return %arg0, %c0_i32, %c0_i32_0 : i32, i32, i32
  }
  func.func @transform_15(%arg0: i32) -> (i32, i32, i32) {
    %c0_i32 = arith.constant 0 : i32
    %c0_i32_0 = arith.constant 0 : i32
    %c0_i32_1 = arith.constant 0 : i32
    return %arg0, %c0_i32, %c0_i32_0 : i32, i32, i32
  }
  func.func @transform_16(%arg0: i32) -> (i32, i32, i32) {
    %c0_i32 = arith.constant 0 : i32
    %c0_i32_0 = arith.constant 0 : i32
    %c0_i32_1 = arith.constant 0 : i32
    return %arg0, %c0_i32, %c0_i32_0 : i32, i32, i32
  }
  func.func @transform_17(%arg0: i32) -> (i32, i32, i32) {
    %c0_i32 = arith.constant 0 : i32
    %c0_i32_0 = arith.constant 0 : i32
    %c0_i32_1 = arith.constant 0 : i32
    return %arg0, %c0_i32, %c0_i32_0 : i32, i32, i32
  }
  func.func @transform_18(%arg0: i32) -> (i32, i32) {
    %c0_i32 = arith.constant 0 : i32
    %c0_i32_0 = arith.constant 0 : i32
    %c0_i32_1 = arith.constant 0 : i32
    return %c0_i32, %c0_i32_0 : i32, i32
  }
}

module attributes {stable_mosaic.version = 11 : i64} {
  func.func @total_loss_kernel(%arg0: memref<16x32xf32, #tpu.memory_space<vmem>>, %arg1: memref<32x2xf32, #tpu.memory_space<vmem>>, %arg2: memref<1x2xf32, #tpu.memory_space<vmem>>, %arg3: memref<16x2xf32, #tpu.memory_space<vmem>>, %arg4: memref<16x32xf32, #tpu.memory_space<vmem>>, %arg5: memref<32x8xf32, #tpu.memory_space<vmem>>, %arg6: memref<1x8xf32, #tpu.memory_space<vmem>>, %arg7: memref<16x8xf32, #tpu.memory_space<vmem>>, %arg8: memref<16x1xf32, #tpu.memory_space<vmem>>, %arg9: memref<1x1xf32, #tpu.memory_space<vmem>>) attributes {dimension_semantics = [], scalar_prefetch = 0 : i64, scratch_operands = 0 : i64, tpu.core_type = #tpu.core_type<tc>} {
    %c0 = arith.constant 0 : index
    %c0_0 = arith.constant 0 : index
    %0 = vector.load %arg8[%c0, %c0_0] : memref<16x1xf32, #tpu.memory_space<vmem>>, vector<16x1xf32>
    %c0_1 = arith.constant 0 : index
    %c0_2 = arith.constant 0 : index
    %1 = vector.load %arg0[%c0_1, %c0_2] : memref<16x32xf32, #tpu.memory_space<vmem>>, vector<16x32xf32>
    %c0_3 = arith.constant 0 : index
    %c0_4 = arith.constant 0 : index
    %2 = vector.load %arg1[%c0_3, %c0_4] : memref<32x2xf32, #tpu.memory_space<vmem>>, vector<32x2xf32>
    %cst = arith.constant dense<0.000000e+00> : vector<16x2xf32>
    %3 = tpu.matmul %1, %2, %cst {dimension_numbers = #tpu.dot_dimension_numbers<[1], [0], [0], [1], [0, 0, 1, 1], [], []>} : vector<16x32xf32>, vector<32x2xf32>, vector<16x2xf32> -> vector<16x2xf32>
    %c0_5 = arith.constant 0 : index
    %c0_6 = arith.constant 0 : index
    %4 = vector.load %arg2[%c0_5, %c0_6] : memref<1x2xf32, #tpu.memory_space<vmem>>, vector<1x2xf32>
    %5 = vector.broadcast %4 : vector<1x2xf32> to vector<16x2xf32>
    %6 = arith.addf %3, %5 : vector<16x2xf32>
    %c0_7 = arith.constant 0 : index
    %c0_8 = arith.constant 0 : index
    %7 = vector.load %arg3[%c0_7, %c0_8] : memref<16x2xf32, #tpu.memory_space<vmem>>, vector<16x2xf32>
    %cst_9 = arith.constant 0.000000e+00 : f32
    %8 = vector.broadcast %cst_9 : f32 to vector<16x2xf32>
    %9 = arith.maximumf %6, %8 : vector<16x2xf32>
    %10 = arith.mulf %6, %7 : vector<16x2xf32>
    %11 = arith.subf %9, %10 : vector<16x2xf32>
    %12 = math.absf %6 : vector<16x2xf32>
    %cst_10 = arith.constant 0.000000e+00 : f32
    %13 = vector.broadcast %cst_10 : f32 to vector<16x2xf32>
    %14 = arith.subf %13, %12 : vector<16x2xf32>
    %15 = math.exp %14 : vector<16x2xf32>
    %cst_11 = arith.constant 1.000000e+00 : f32
    %16 = vector.broadcast %cst_11 : f32 to vector<16x2xf32>
    %17 = arith.addf %16, %15 : vector<16x2xf32>
    %18 = math.log %17 : vector<16x2xf32>
    %19 = arith.addf %11, %18 : vector<16x2xf32>
    %20 = vector.broadcast %0 : vector<16x1xf32> to vector<16x2xf32>
    %21 = arith.mulf %19, %20 : vector<16x2xf32>
    %22 = vector.shape_cast %21 : vector<16x2xf32> to vector<1x16x2xf32>
    %cst_12 = arith.constant dense<0.000000e+00> : vector<1xf32>
    %23 = vector.multi_reduction <add>, %22, %cst_12 [1, 2] : vector<1x16x2xf32> to vector<1xf32>
    %24 = vector.shape_cast %23 : vector<1xf32> to vector<1x1x1xf32>
    %25 = vector.extract %24[0, 0, 0] : f32 from vector<1x1x1xf32>
    %26 = vector.broadcast %25 : f32 to vector<1x1xf32>
    %c0_13 = arith.constant 0 : index
    %c0_14 = arith.constant 0 : index
    %27 = vector.load %arg4[%c0_13, %c0_14] : memref<16x32xf32, #tpu.memory_space<vmem>>, vector<16x32xf32>
    %c0_15 = arith.constant 0 : index
    %c0_16 = arith.constant 0 : index
    %28 = vector.load %arg5[%c0_15, %c0_16] : memref<32x8xf32, #tpu.memory_space<vmem>>, vector<32x8xf32>
    %cst_17 = arith.constant dense<0.000000e+00> : vector<16x8xf32>
    %29 = tpu.matmul %27, %28, %cst_17 {dimension_numbers = #tpu.dot_dimension_numbers<[1], [0], [0], [1], [0, 0, 1, 1], [], []>} : vector<16x32xf32>, vector<32x8xf32>, vector<16x8xf32> -> vector<16x8xf32>
    %c0_18 = arith.constant 0 : index
    %c0_19 = arith.constant 0 : index
    %30 = vector.load %arg6[%c0_18, %c0_19] : memref<1x8xf32, #tpu.memory_space<vmem>>, vector<1x8xf32>
    %31 = vector.broadcast %30 : vector<1x8xf32> to vector<16x8xf32>
    %32 = arith.addf %29, %31 : vector<16x8xf32>
    %c0_20 = arith.constant 0 : index
    %c0_21 = arith.constant 0 : index
    %33 = vector.load %arg7[%c0_20, %c0_21] : memref<16x8xf32, #tpu.memory_space<vmem>>, vector<16x8xf32>
    %cst_22 = arith.constant 0.000000e+00 : f32
    %34 = vector.broadcast %cst_22 : f32 to vector<16x8xf32>
    %35 = arith.maximumf %32, %34 : vector<16x8xf32>
    %36 = arith.mulf %32, %33 : vector<16x8xf32>
    %37 = arith.subf %35, %36 : vector<16x8xf32>
    %38 = math.absf %32 : vector<16x8xf32>
    %cst_23 = arith.constant 0.000000e+00 : f32
    %39 = vector.broadcast %cst_23 : f32 to vector<16x8xf32>
    %40 = arith.subf %39, %38 : vector<16x8xf32>
    %41 = math.exp %40 : vector<16x8xf32>
    %cst_24 = arith.constant 1.000000e+00 : f32
    %42 = vector.broadcast %cst_24 : f32 to vector<16x8xf32>
    %43 = arith.addf %42, %41 : vector<16x8xf32>
    %44 = math.log %43 : vector<16x8xf32>
    %45 = arith.addf %37, %44 : vector<16x8xf32>
    %46 = vector.broadcast %0 : vector<16x1xf32> to vector<16x8xf32>
    %47 = arith.mulf %45, %46 : vector<16x8xf32>
    %48 = vector.shape_cast %47 : vector<16x8xf32> to vector<1x16x8xf32>
    %cst_25 = arith.constant dense<0.000000e+00> : vector<1xf32>
    %49 = vector.multi_reduction <add>, %48, %cst_25 [1, 2] : vector<1x16x8xf32> to vector<1xf32>
    %50 = vector.shape_cast %49 : vector<1xf32> to vector<1x1x1xf32>
    %51 = vector.extract %50[0, 0, 0] : f32 from vector<1x1x1xf32>
    %52 = vector.broadcast %51 : f32 to vector<1x1xf32>
    %53 = vector.shape_cast %0 : vector<16x1xf32> to vector<1x16x1xf32>
    %cst_26 = arith.constant dense<0.000000e+00> : vector<1xf32>
    %54 = vector.multi_reduction <add>, %53, %cst_26 [1, 2] : vector<1x16x1xf32> to vector<1xf32>
    %55 = vector.shape_cast %54 : vector<1xf32> to vector<1x1x1xf32>
    %56 = vector.extract %55[0, 0, 0] : f32 from vector<1x1x1xf32>
    %57 = vector.broadcast %56 : f32 to vector<1x1xf32>
    %cst_27 = arith.constant 4.000000e+00 : f32
    %58 = vector.broadcast %cst_27 : f32 to vector<1x1xf32>
    %59 = arith.divf %52, %58 : vector<1x1xf32>
    %60 = arith.addf %26, %59 : vector<1x1xf32>
    %61 = arith.divf %60, %57 : vector<1x1xf32>
    %c0_28 = arith.constant 0 : index
    %c0_29 = arith.constant 0 : index
    %62 = vector.load %arg9[%c0_28, %c0_29] : memref<1x1xf32, #tpu.memory_space<vmem>>, vector<1x1xf32>
    tpu.vector_store %arg9[%c0_28, %c0_29], %61 {strides = array<i32>} : memref<1x1xf32, #tpu.memory_space<vmem>>, vector<1x1xf32>,
    return
  }
}

</mosaic_0001>

<bundles_post_ra>
// kernel: ere_forward.4
= control target key start
LH: loop header
LB: loop body
LE: loop exit
PB: predicated region body
PF: predicated region fallthrough
CT: control target
= control target key end

     0   :  { %10 = vsyncpa [#allocation3], 0  ;;  %s290_s0 = inlined_call_operand.vmem [shape: f32[2,8,32], index: 0, kind: input, shape index: {}]   ;;  %s291_s1 = inlined_call_operand.hbm [shape: f32[8,32], index: 1, kind: input, shape index: {}]   ;;  %s292_s2 = inlined_call_operand.vmem [shape: f32[2,8,32], index: 2, kind: input, shape index: {}]   ;;  %s293_s3 = inlined_call_operand.hbm [shape: f32[1,32], index: 3, kind: input, shape index: {}]   ;;  %s294_s4 = inlined_call_operand.hbm [shape: f32[1,32], index: 4, kind: input, shape index: {}]   ;;  %s295_s5 = inlined_call_operand.vmem [shape: f32[2,8,32], index: 5, kind: output, shape index: {}]  }
   0x1   :  { %11 = vsyncpa [#allocation5], 0  ;;  %s197_s18 = smov [#allocation4]   ;;  %s198_s20 = smov [#allocation2]  }
   0x2   :  { %s32_s19 = sshll.u32 %s197_s18, 4  ;;  %s20_s21 = sshll.u32 %s198_s20, 4  ;;  %s33_s19 = int_to_ptr.vmem [resolvable:$true] %s32_s19  ;;  %s21_s21 = int_to_ptr.vmem [resolvable:$true] %s20_s21 }
   0x3   :  { %s127_s24 = scalar_lea.hbm %s293_s3, 16 }
   0x4   :  { %p128_p0 = scmp.ne.s32.totalorder %s293_s3, %s127_s24  ;;  %p131_p1 = scmp.lt.u32.totalorder %s127_s24, %s293_s3 }
   0x6   :  { %p133_p2 = pnand %p131_p1, %p128_p0 }
   0x8   :  { %136 = shalt.err (!%p133_p2)
}
   0x9   :  { %s137_s29 = scalar_lea.vmem %s33_s19, 16  ;;  %s141_s30 = scalar_lea.vmem %s33_s19, 32 }
   0xa   :  { %p138_p3 = scmp.ne.s32.totalorder %s33_s19, %s137_s29  ;;  %p142_p4 = scmp.lt.s32.totalorder %s33_s19, %s33_s19 }
   0xb   :  { %p143_p5 = scmp.lt.s32.totalorder %s141_s30, %s137_s29 }
   0xd   :  { %p144_p6 = por %p143_p5, %p142_p4 }
   0xf   :  { %p145_p7 = pnand %p144_p6, %p138_p3 }
  0x11   :  { %148 = shalt.err (!%p145_p7)
}
  0x12   :  { %35 = dma.hbm_to_vmem [thread:$0]  %s293_s3, 16, %s33_s19, [#allocation5]  }
  0x13   :  { %s149_s10 = scalar_lea.hbm %s291_s1, 128 }
  0x14   :  { %p150_p8 = scmp.ne.s32.totalorder %s291_s1, %s149_s10  ;;  %p153_p9 = scmp.lt.u32.totalorder %s149_s10, %s291_s1 }
  0x16   :  { %p155_p10 = pnand %p153_p9, %p150_p8 }
  0x18   :  { %158 = shalt.err (!%p155_p10)
}
  0x19   :  { %s159_s15 = scalar_lea.vmem %s21_s21, 128  ;;  %p164_p12 = scmp.lt.s32.totalorder %s21_s21, %s21_s21 }
  0x1a   :  { %p160_p11 = scmp.ne.s32.totalorder %s21_s21, %s159_s15  ;;  %p165_p13 = scmp.lt.s32.totalorder %s159_s15, %s159_s15 }
  0x1c   :  { %p166_p0 = por %p165_p13, %p164_p12 }
  0x1e   :  { %p167_p1 = pnand %p166_p0, %p160_p11 }
  0x20   :  { %170 = shalt.err (!%p167_p1)
}
  0x21   :  { %23 = dma.hbm_to_vmem [thread:$0]  %s291_s1, 128, %s21_s21, [#allocation3]  }
  0x22   :  { %s199_s17 = smov [#allocation6]   ;;  %s171_s22 = scalar_lea.hbm %s294_s4, 16 }
  0x23   :  { %s42_s18 = sshll.u32 %s199_s17, 4  ;;  %p172_p2 = scmp.ne.s32.totalorder %s294_s4, %s171_s22  ;;  %s43_s18 = int_to_ptr.vmem [resolvable:$true] %s42_s18 }
  0x24   :  { %p175_p3 = scmp.lt.u32.totalorder %s171_s22, %s294_s4 }
  0x26   :  { %p177_p4 = pnand %p175_p3, %p172_p2 }
  0x28   :  { %180 = shalt.err (!%p177_p4)
}
  0x29   :  { %s181_s27 = scalar_lea.vmem %s43_s18, 16  ;;  %s185_s1 = scalar_lea.vmem %s43_s18, 32 }
  0x2a   :  { %p182_p5 = scmp.ne.s32.totalorder %s43_s18, %s181_s27  ;;  %p186_p6 = scmp.lt.s32.totalorder %s43_s18, %s43_s18 }
  0x2b   :  { %p187_p7 = scmp.lt.s32.totalorder %s185_s1, %s181_s27 }
  0x2d   :  { %p188_p8 = por %p187_p7, %p186_p6 }
  0x2f   :  { %p189_p9 = pnand %p188_p8, %p182_p5 }
  0x31   :  { %192 = shalt.err (!%p189_p9)
}
  0x32   :  { %45 = dma.hbm_to_vmem [thread:$0]  %s294_s4, 16, %s43_s18, [#allocation5]  }
  0x33   :  { %193 = dma.done.wait [#allocation3], 128  }
  0x34   :  { %194 = vsyncadd [#allocation3], 4294967168 }
  0x35   :  { %195 = dma.done.wait [#allocation5], 32  }
  0x36   :  { %196 = vsyncadd [#allocation5], 4294967264  ;;  %v55_v0 = vld [vmem:[%s290_s0] sm:$0xff]  ;;  %v56_v4 = vld [vmem:[%s290_s0 + $0x8] sm:$0xff]  ;;  %vm66_vm0 = vcmask 261120  }
  0x37   :  { %v57_v1 = vld [vmem:[#allocation2] sm:$0xff]  ;;  %v61_v5 = vld [vmem:[%s292_s2 + $0x8] sm:$0xff] }
  0x38   :  { %v60_v2 = vld [vmem:[%s292_s2] sm:$0xff]  ;;  %v58_v3 = vadd.f32 %v57_v1, %v55_v0  ;;  %v59_v6 = vadd.f32 %v57_v1, %v56_v4  ;;  %v118_v28 = vld [vmem:[#allocation4] ss:$0 sm:$0xff]  ;;  %v119_v30 = vld [vmem:[#allocation6] ss:$0 sm:$0xff] }
  0x3a   :  { %v62_v7 = vadd.f32 %v60_v2, %v58_v3  ;;  %v63_v8 = vadd.f32 %v61_v5, %v59_v6 }
  0x3c   :  { %v67_v9 = vsel %vm66_vm0, %v62_v7, 0.0  ;;  %v70_v10 = vsel %vm66_vm0, %v63_v8, 0.0 }
  0x3d   :  { %68 = vadd.xlane.f32.xlu0 %v67_v9 }
  0x41   :  { %71 = vadd.xlane.f32.xlu0 %v70_v10 }
  0xca   :  { %v69_v11 = vpop.xlane.xlu0 %68 }
  0xcb   :  { %v74_v12 = vmul.f32 0.03125, %v69_v11 }
  0xcd   :  { %v76_v13 = vsub.f32 %v62_v7, %v74_v12 }
  0xce   :  { %v72_v14 = vpop.xlane.xlu0 %71 }
  0xcf   :  { %v75_v15 = vmul.f32 0.03125, %v72_v14  ;;  %v78_v16 = vmul.f32 %v76_v13, %v76_v13 }
  0xd1   :  { %v77_v17 = vsub.f32 %v63_v8, %v75_v15  ;;  %v80_v18 = vsel %vm66_vm0, %v78_v16, 0.0 }
  0xd2   :  { %81 = vadd.xlane.f32.xlu1 %v80_v18 }
  0xd3   :  { %v79_v19 = vmul.f32 %v77_v17, %v77_v17 }
  0xd5   :  { %v83_v20 = vsel %vm66_vm0, %v79_v19, 0.0 }
  0xd6   :  { %84 = vadd.xlane.f32.xlu1 %v83_v20 }
 0x15f   :  { %v82_v21 = vpop.xlane.xlu1 %81 }
 0x160   :  { %v86_v22 = vmul.f32 0.03125, %v82_v21 }
 0x162   :  { %v88_v23 = vadd.f32 1e-12, %v86_v22 }
 0x163   :  { %v85_v24 = vpop.xlane.xlu1 %84 }
 0x164   :  { %123 = vrsqrt.f32 %v88_v23  ;;  %v87_v25 = vmul.f32 0.03125, %v85_v24 }
 0x166   :  { %v89_v26 = vadd.f32 1e-12, %v87_v25 }
 0x168   :  { %125 = vrsqrt.f32 %v89_v26 }
 0x16e   :  { %v124_v27 = vpop.eup %123 }
 0x16f   :  { %v92_v29 = vmul.f32 %v124_v27, %v76_v13 }
 0x171   :  { %v100_v31 = vmul.f32 %v118_v28, %v92_v29 }
 0x172   :  { %v126_v32 = vpop.eup %125 }
 0x173   :  { %v108_v33 = vadd.f32 %v119_v30, %v100_v31  ;;  %v93_v34 = vmul.f32 %v126_v32, %v77_v17 }
 0x175   :  { %110 = vst.msk [vmem:[%s295_s5] sm:$0xff] %vm66_vm0, %v108_v33  ;;  %v101_v35 = vmul.f32 %v118_v28, %v93_v34 }
 0x177   :  { %v109_v36 = vadd.f32 %v119_v30, %v101_v35 }
 0x179   :  { %111 = vst.msk [vmem:[%s295_s5 + $0x8] sm:$0xff] %vm66_vm0, %v109_v36 }
 0x17a   :  { %116 = vsyncpa [#allocation3], 1 }
 0x17b   :  { %117 = vsyncpa [#allocation5], 1 }

// kernel: ere_forward.5
= control target key start
LH: loop header
LB: loop body
LE: loop exit
PB: predicated region body
PF: predicated region fallthrough
CT: control target
= control target key end

     0   :  { %s4596_s0 = inlined_call_operand.vmem [shape: f32[16,32], index: 0, kind: input, shape index: {}]   ;;  %s4597_s1 = inlined_call_operand.vmem [shape: f32[2,1,8], index: 1, kind: input, shape index: {}]   ;;  %s4598_s2 = inlined_call_operand.hbm [shape: f32[2,32,32], index: 2, kind: input, shape index: {}]   ;;  %s4599_s3 = inlined_call_operand.hbm [shape: f32[2,1,32], index: 3, kind: input, shape index: {}]   ;;  %s4600_s4 = inlined_call_operand.hbm [shape: f32[2,32,32], index: 4, kind: input, shape index: {}]   ;;  %s4601_s5 = inlined_call_operand.hbm [shape: f32[2,1,32], index: 5, kind: input, shape index: {}]   ;;  %s4602_s6 = inlined_call_operand.hbm [shape: f32[2,32,32], index: 6, kind: input, shape index: {}]   ;;  %s4603_s7 = inlined_call_operand.hbm [shape: f32[2,1,32], index: 7, kind: input, shape index: {}]   ;;  %s4604_s8 = inlined_call_operand.hbm [shape: f32[2,32,32], index: 8, kind: input, shape index: {}]   ;;  %s4605_s9 = inlined_call_operand.hbm [shape: f32[2,1,32], index: 9, kind: input, shape index: {}]   ;;  %s4606_s10 = inlined_call_operand.hbm [shape: f32[2,1,32], index: 10, kind: input, shape index: {}]   ;;  %s4607_s11 = inlined_call_operand.hbm [shape: f32[2,1,32], index: 11, kind: input, shape index: {}]   ;;  %s4608_s12 = inlined_call_operand.hbm [shape: f32[2,32,128], index: 12, kind: input, shape index: {}]   ;;  %s4609_s13 = inlined_call_operand.hbm [shape: f32[2,1,128], index: 13, kind: input, shape index: {}]   ;;  %s4610_s14 = inlined_call_operand.vmem [shape: f32[2,128,32], index: 14, kind: input, shape index: {}]   ;;  %s4611_s15 = inlined_call_operand.hbm [shape: f32[2,1,32], index: 15, kind: input, shape index: {}]   ;;  %s4612_s16 = inlined_call_operand.hbm [shape: f32[2,1,32], index: 16, kind: input, shape index: {}]   ;;  %s4613_s17 = inlined_call_operand.hbm [shape: f32[2,1,32], index: 17, kind: input, shape index: {}]   ;;  %s4614_s18 = inlined_call_operand.vmem [shape: f32[16,32], index: 18, kind: output, shape index: {}]  }
   0x1   :  { %4629 = sst [smem:[#allocation40_spill]] %s4596_s0 }
   0x2   :  { %4630 = sst [smem:[#allocation41_spill]] %s4597_s1 }
   0x3   :  { %4631 = sst [smem:[#allocation42_spill]] %s4598_s2 }
   0x4   :  { %4632 = sst [smem:[#allocation43_spill]] %s4599_s3 }
   0x5   :  { %4633 = sst [smem:[#allocation44_spill]] %s4600_s4 }
   0x6   :  { %4634 = sst [smem:[#allocation45_spill]] %s4601_s5 }
   0x7   :  { %4635 = sst [smem:[#allocation46_spill]] %s4603_s7 }
   0x8   :  { %4636 = sst [smem:[#allocation47_spill]] %s4610_s14 }
   0x9   :  { %4637 = sst [smem:[#allocation48_spill]] %s4614_s18 }
   0xa   :  { %23 = vsyncpa [#allocation5], 0 }
   0xb   :  { %25 = vsyncpa [#allocation5 + $0x1], 0 }
   0xc   :  { %26 = vsyncpa [#allocation7], 0 }
   0xd   :  { %28 = vsyncpa [#allocation7 + $0x1], 0 }
   0xe   :  { %29 = vsyncpa [#allocation10], 0 }
   0xf   :  { %31 = vsyncpa [#allocation10 + $0x1], 0 }
  0x10   :  { %32 = vsyncpa [#allocation13], 0 }
  0x11   :  { %34 = vsyncpa [#allocation13 + $0x1], 0 }
  0x12   :  { %35 = vsyncpa [#allocation16], 0 }
  0x13   :  { %37 = vsyncpa [#allocation16 + $0x1], 0 }
  0x14   :  { %38 = vsyncpa [#allocation19], 0 }
  0x15   :  { %40 = vsyncpa [#allocation19 + $0x1], 0 }
  0x16   :  { %41 = vsyncpa [#allocation22], 0 }
  0x17   :  { %43 = vsyncpa [#allocation22 + $0x1], 0 }
  0x18   :  { %44 = vsyncpa [#allocation25], 0 }
  0x19   :  { %46 = vsyncpa [#allocation25 + $0x1], 0  ;;  %s3807_s27 = smov 0   ;;  %s3809_s28 = smov 0  }
  0x1a   :  { %s3811_s29 = smov 0   ;;  %s3813_s30 = smov 0  }
  0x1b LB: > { %4638 = sst [smem:[#allocation35_spill]] %s3685_s29  ;;  %s3826_s0 = sadd.s32 4294967295, %s3689_s30   ;;  %s3689_s30 = sphi %s3813_s30, %s4678_s30   ;;  %s3685_s29 = sphi %s3811_s29, %s4680_s29   ;;  %s3681_s28 = sphi %s3809_s28, %s4682_s28   ;;  %s3677_s27 = sphi %s3807_s27, %s4681_s27  }
  0x1c   : > { %4639 = sst [smem:[#allocation36_spill]] %s3826_s0  ;;  %s3829_s19 = sadd.s32 1, %s3689_s30  }
  0x1d   : > { %4640 = sst [smem:[#allocation37_spill]] %s3829_s19  ;;  %s98_s1 = ssub.s32 %s3689_s30, %s3829_s19 }
  0x1e   : > { %s101_s20 = sadd.s32 1, %s3685_s29  ;;  %p99_p0 = scmp.eq.s32.totalorder %s98_s1, 0 }
  0x1f   : > { %p108_p1 = scmp.ne.s32.totalorder %s3685_s29, %s3681_s28  ;;  %p109_p2 = scmp.eq.s32.totalorder %s3689_s30, 0 }
  0x20   : > { %p114_p3 = scmp.ne.s32.totalorder %s3681_s28, %s3677_s27  ;;  %p115_p5 = scmp.eq.s32.totalorder %s3826_s0, 0 }
  0x21   : > { %s3839_s21 = scalar_select %p99_p0, %s3685_s29, %s101_s20  }
  0x22   : > { %p3841_p4 = por %p109_p2, %p108_p1  ;;  %p3846_p6 = por %p115_p5, %p114_p3 }
  0x23   : > { %4641 = sst [smem:[#allocation38_spill]] %s3839_s21  ;;  %p2768_p7 = scmp.ge.s32.totalorder %s3689_s30, 2 }
  0x24   : > { %s4643_s2 = scalar_select %p3846_p6, 1, 0 }
  0x25   : > { %551 = sbr.rel (%p2768_p7) target bundleno = 421 (0x1a5), region = 24  ;;  %s3852_s23 = sand.u32 (!%p2768_p7), 1, %s3685_s29  }
  0x26   : > { %4644 = sst [smem:[#allocation39_spill]] %s4643_s2  ;;  %s3855_s24 = sand.u32 (!%p2768_p7), 1, %s3689_s30  }
  0x27   : > { %s3858_s25 = sshll.u32 (!%p2768_p7), %s3689_s30, 4  ;;  %s579_s26 = scalar_lea.vmem (!%p2768_p7), [#allocation6], %s3852_s23 }
  0x28   : > { %s586_s27 = sshll.u32 (!%p2768_p7), %s579_s26, 4  ;;  %s4645_s3 = sld [smem:[#allocation43_spill]] (!%p2768_p7)  ;;  %s587_s27 = int_to_ptr.vmem [resolvable:$true] %s586_s27 }
  0x2e   : > { %s3865_s21 = scalar_lea.hbm %s4645_s3, %s3858_s25  ;;  %s3211_s26 = scalar_lea.hbm %s4645_s3, 32 }
  0x2f   : > { %s3207_s19 = scalar_lea.hbm %s3865_s21, 16  ;;  %p3212_p11 = scmp.lt.u32.totalorder %s3865_s21, %s4645_s3 }
  0x30   : > { %p3208_p8 = scmp.ne.s32.totalorder %s3865_s21, %s3207_s19  ;;  %p3213_p12 = scmp.lt.u32.totalorder %s3211_s26, %s3207_s19 }
  0x31   : > { %p3215_p0 = scmp.lt.u32.totalorder %s3207_s19, %s3865_s21 }
  0x32   : > { %p3209_p9 = pnand %p3208_p8, %p3841_p4  ;;  %p3214_p13 = por %p3213_p12, %p3212_p11 }
  0x34   : > { %p3210_p10 = pneg %p3209_p9  ;;  %p3216_p1 = por %p3215_p0, %p3214_p13 }
  0x36   : > { %p3217_p2 = pnand %p3216_p1, %p3210_p10 }
  0x38   : > { %3220 = shalt.err (!%p3217_p2)
}
  0x39   : > { %s3221_s1 = scalar_lea.vmem %s587_s27, 16  ;;  %s3691_s20 = smov [#allocation6]  }
  0x3a   : > { %p3222_p3 = scmp.ne.s32.totalorder %s587_s27, %s3221_s1  ;;  %s3225_s29 = sshll.u32 %s3691_s20, 4  ;;  %s3226_s29 = int_to_ptr.vmem [resolvable:$false] %s3225_s29 }
  0x3b   : > { %s3227_s14 = scalar_lea.vmem %s3226_s29, 32  ;;  %p3228_p8 = scmp.lt.s32.totalorder %s587_s27, %s3226_s29 }
  0x3c   : > { %p3223_p5 = pnand %p3222_p3, %p3841_p4  ;;  %p3229_p9 = scmp.lt.s32.totalorder %s3227_s14, %s3221_s1 }
  0x3e   : > { %p3224_p7 = pneg %p3223_p5  ;;  %p3230_p6 = por %p3229_p9, %p3228_p8 }
  0x40   : > { %p3231_p11 = pnand %p3230_p6, %p3224_p7 }
  0x42   : > { %3234 = shalt.err (!%p3231_p11)
}
  0x43   : > { %s4646_s18 = scalar_lea.sflag [#allocation7], %s3855_s24  ;;  %s4647_s5 = sld [smem:[#allocation45_spill]] }
  0x44   : > { %3112 = dma.hbm_to_vmem [thread:$0]  (%p3841_p4), %s3865_s21, 16, %s587_s27, %s4646_s18  }
  0x45   : > { %s617_s29 = scalar_lea.vmem [#allocation9], %s3852_s23 }
  0x46   : > { %s624_s26 = sshll.u32 %s617_s29, 4  ;;  %s625_s26 = int_to_ptr.vmem [resolvable:$true] %s624_s26 }
  0x49   : > { %s3891_s2 = scalar_lea.hbm %s4647_s5, %s3858_s25  ;;  %s3239_s27 = scalar_lea.hbm %s4647_s5, 32 }
  0x4a   : > { %s3235_s20 = scalar_lea.hbm %s3891_s2, 16  ;;  %p3240_p13 = scmp.lt.u32.totalorder %s3891_s2, %s4647_s5 }
  0x4b   : > { %p3236_p6 = scmp.ne.s32.totalorder %s3891_s2, %s3235_s20  ;;  %p3241_p0 = scmp.lt.u32.totalorder %s3239_s27, %s3235_s20 }
  0x4c   : > { %p3243_p2 = scmp.lt.u32.totalorder %s3235_s20, %s3891_s2 }
  0x4d   : > { %p3237_p10 = pnand %p3236_p6, %p3841_p4  ;;  %p3242_p1 = por %p3241_p0, %p3240_p13 }
  0x4f   : > { %p3238_p12 = pneg %p3237_p10  ;;  %p3244_p3 = por %p3243_p2, %p3242_p1 }
  0x51   : > { %p3245_p5 = pnand %p3244_p3, %p3238_p12 }
  0x53   : > { %3248 = shalt.err (!%p3245_p5)
}
  0x54   : > { %s3249_s19 = scalar_lea.vmem %s625_s26, 16  ;;  %s3692_s29 = smov [#allocation9]  }
  0x55   : > { %p3250_p7 = scmp.ne.s32.totalorder %s625_s26, %s3249_s19  ;;  %s3253_s1 = sshll.u32 %s3692_s29, 4  ;;  %s3254_s1 = int_to_ptr.vmem [resolvable:$false] %s3253_s1 }
  0x56   : > { %s3255_s14 = scalar_lea.vmem %s3254_s1, 32  ;;  %p3256_p11 = scmp.lt.s32.totalorder %s625_s26, %s3254_s1 }
  0x57   : > { %p3251_p8 = pnand %p3250_p7, %p3841_p4  ;;  %p3257_p6 = scmp.lt.s32.totalorder %s3255_s14, %s3249_s19 }
  0x59   : > { %p3252_p9 = pneg %p3251_p8  ;;  %p3258_p10 = por %p3257_p6, %p3256_p11 }
  0x5b   : > { %p3259_p0 = pnand %p3258_p10, %p3252_p9 }
  0x5d   : > { %3262 = shalt.err (!%p3259_p0)
}
  0x5e   : > { %s4648_s20 = scalar_lea.sflag [#allocation10], %s3855_s24  ;;  %s4649_s7 = sld [smem:[#allocation46_spill]] }
  0x5f   : > { %3114 = dma.hbm_to_vmem [thread:$0]  (%p3841_p4), %s3891_s2, 16, %s625_s26, %s4648_s20  }
  0x60   : > { %s655_s1 = scalar_lea.vmem [#allocation12], %s3852_s23 }
  0x61   : > { %s662_s0 = sshll.u32 %s655_s1, 4  ;;  %s663_s0 = int_to_ptr.vmem [resolvable:$true] %s662_s0 }
  0x64   : > { %s3918_s18 = scalar_lea.hbm %s4649_s7, %s3858_s25  ;;  %s3267_s26 = scalar_lea.hbm %s4649_s7, 32 }
  0x65   : > { %s3263_s29 = scalar_lea.hbm %s3918_s18, 16  ;;  %p3268_p2 = scmp.lt.u32.totalorder %s3918_s18, %s4649_s7 }
  0x66   : > { %p3264_p12 = scmp.ne.s32.totalorder %s3918_s18, %s3263_s29  ;;  %p3269_p3 = scmp.lt.u32.totalorder %s3267_s26, %s3263_s29 }
  0x67   : > { %p3271_p7 = scmp.lt.u32.totalorder %s3263_s29, %s3918_s18 }
  0x68   : > { %p3265_p13 = pnand %p3264_p12, %p3841_p4  ;;  %p3270_p5 = por %p3269_p3, %p3268_p2 }
  0x6a   : > { %p3266_p1 = pneg %p3265_p13  ;;  %p3272_p8 = por %p3271_p7, %p3270_p5 }
  0x6c   : > { %p3273_p9 = pnand %p3272_p8, %p3266_p1 }
  0x6e   : > { %3276 = shalt.err (!%p3273_p9)
}
  0x6f   : > { %s3277_s27 = scalar_lea.vmem %s663_s0, 16  ;;  %s3693_s1 = smov [#allocation12]  }
  0x70   : > { %p3278_p11 = scmp.ne.s32.totalorder %s663_s0, %s3277_s27  ;;  %s3281_s19 = sshll.u32 %s3693_s1, 4  ;;  %s3282_s19 = int_to_ptr.vmem [resolvable:$false] %s3281_s19 }
  0x71   : > { %s3283_s14 = scalar_lea.vmem %s3282_s19, 32  ;;  %p3284_p0 = scmp.lt.s32.totalorder %s663_s0, %s3282_s19 }
  0x72   : > { %p3279_p6 = pnand %p3278_p11, %p3841_p4  ;;  %p3285_p12 = scmp.lt.s32.totalorder %s3283_s14, %s3277_s27 }
  0x74   : > { %p3280_p10 = pneg %p3279_p6  ;;  %p3286_p13 = por %p3285_p12, %p3284_p0 }
  0x76   : > { %p3287_p2 = pnand %p3286_p13, %p3280_p10 }
  0x78   : > { %3290 = shalt.err (!%p3287_p2)
}
  0x79   : > { %s4650_s29 = scalar_lea.sflag [#allocation13], %s3855_s24  ;;  %s3945_s20 = scalar_lea.hbm %s4605_s9, %s3858_s25 }
  0x7a   : > { %3116 = dma.hbm_to_vmem [thread:$0]  (%p3841_p4), %s3918_s18, 16, %s663_s0, %s4650_s29  }
  0x7b   : > { %s693_s19 = scalar_lea.vmem [#allocation15], %s3852_s23  ;;  %s3291_s1 = scalar_lea.hbm %s3945_s20, 16 }
  0x7c   : > { %s700_s21 = sshll.u32 %s693_s19, 4  ;;  %p3292_p1 = scmp.ne.s32.totalorder %s3945_s20, %s3291_s1  ;;  %s701_s21 = int_to_ptr.vmem [resolvable:$true] %s700_s21 }
  0x7d   : > { %s3295_s0 = scalar_lea.hbm %s4605_s9, 32  ;;  %p3296_p7 = scmp.lt.u32.totalorder %s3945_s20, %s4605_s9 }
  0x7e   : > { %p3293_p3 = pnand %p3292_p1, %p3841_p4  ;;  %p3297_p8 = scmp.lt.u32.totalorder %s3295_s0, %s3291_s1 }
  0x7f   : > { %p3299_p11 = scmp.lt.u32.totalorder %s3291_s1, %s3945_s20 }
  0x80   : > { %p3294_p5 = pneg %p3293_p3  ;;  %p3298_p9 = por %p3297_p8, %p3296_p7 }
  0x82   : > { %p3300_p6 = por %p3299_p11, %p3298_p9 }
  0x84   : > { %p3301_p10 = pnand %p3300_p6, %p3294_p5 }
  0x86   : > { %3304 = shalt.err (!%p3301_p10)
}
  0x87   : > { %s3305_s26 = scalar_lea.vmem %s701_s21, 16  ;;  %s3694_s19 = smov [#allocation15]  }
  0x88   : > { %p3306_p0 = scmp.ne.s32.totalorder %s701_s21, %s3305_s26  ;;  %s3309_s27 = sshll.u32 %s3694_s19, 4  ;;  %s3310_s27 = int_to_ptr.vmem [resolvable:$false] %s3309_s27 }
  0x89   : > { %s3311_s14 = scalar_lea.vmem %s3310_s27, 32  ;;  %p3312_p2 = scmp.lt.s32.totalorder %s701_s21, %s3310_s27 }
  0x8a   : > { %p3307_p12 = pnand %p3306_p0, %p3841_p4  ;;  %p3313_p1 = scmp.lt.s32.totalorder %s3311_s14, %s3305_s26 }
  0x8c   : > { %p3308_p13 = pneg %p3307_p12  ;;  %p3314_p3 = por %p3313_p1, %p3312_p2 }
  0x8e   : > { %p3315_p7 = pnand %p3314_p3, %p3308_p13 }
  0x90   : > { %3318 = shalt.err (!%p3315_p7)
}
  0x91   : > { %s4651_s1 = scalar_lea.sflag [#allocation16], %s3855_s24  ;;  %s3972_s29 = scalar_lea.hbm %s4607_s11, %s3858_s25 }
  0x92   : > { %3118 = dma.hbm_to_vmem [thread:$0]  (%p3841_p4), %s3945_s20, 16, %s701_s21, %s4651_s1  }
  0x93   : > { %s727_s27 = scalar_lea.vmem [#allocation18], %s3852_s23  ;;  %s3319_s19 = scalar_lea.hbm %s3972_s29, 16 }
  0x94   : > { %s734_s2 = sshll.u32 %s727_s27, 4  ;;  %p3320_p5 = scmp.ne.s32.totalorder %s3972_s29, %s3319_s19  ;;  %s735_s2 = int_to_ptr.vmem [resolvable:$true] %s734_s2 }
  0x95   : > { %s3323_s21 = scalar_lea.hbm %s4607_s11, 32  ;;  %p3324_p11 = scmp.lt.u32.totalorder %s3972_s29, %s4607_s11 }
  0x96   : > { %p3321_p8 = pnand %p3320_p5, %p3841_p4  ;;  %p3325_p6 = scmp.lt.u32.totalorder %s3323_s21, %s3319_s19 }
  0x97   : > { %p3327_p0 = scmp.lt.u32.totalorder %s3319_s19, %s3972_s29 }
  0x98   : > { %p3322_p9 = pneg %p3321_p8  ;;  %p3326_p10 = por %p3325_p6, %p3324_p11 }
  0x9a   : > { %p3328_p12 = por %p3327_p0, %p3326_p10 }
  0x9c   : > { %p3329_p13 = pnand %p3328_p12, %p3322_p9 }
  0x9e   : > { %3332 = shalt.err (!%p3329_p13)
}
  0x9f   : > { %s3333_s0 = scalar_lea.vmem %s735_s2, 16  ;;  %s3695_s27 = smov [#allocation18]  }
  0xa0   : > { %p3334_p2 = scmp.ne.s32.totalorder %s735_s2, %s3333_s0  ;;  %s3337_s26 = sshll.u32 %s3695_s27, 4  ;;  %s3338_s26 = int_to_ptr.vmem [resolvable:$false] %s3337_s26 }
  0xa1   : > { %s3339_s14 = scalar_lea.vmem %s3338_s26, 32  ;;  %p3340_p7 = scmp.lt.s32.totalorder %s735_s2, %s3338_s26 }
  0xa2   : > { %p3335_p1 = pnand %p3334_p2, %p3841_p4  ;;  %p3341_p5 = scmp.lt.s32.totalorder %s3339_s14, %s3333_s0 }
  0xa4   : > { %p3336_p3 = pneg %p3335_p1  ;;  %p3342_p8 = por %p3341_p5, %p3340_p7 }
  0xa6   : > { %p3343_p6 = pnand %p3342_p8, %p3336_p3 }
  0xa8   : > { %3346 = shalt.err (!%p3343_p6)
}
  0xa9   : > { %s4652_s19 = scalar_lea.sflag [#allocation19], %s3855_s24  ;;  %s3999_s1 = scalar_lea.hbm %s4609_s13, %s3858_s25 }
  0xaa   : > { %3120 = dma.hbm_to_vmem [thread:$0]  (%p3841_p4), %s3972_s29, 16, %s735_s2, %s4652_s19  }
  0xab   : > { %s765_s26 = scalar_lea.vmem [#allocation21], %s3852_s23  ;;  %s3347_s27 = scalar_lea.hbm %s3999_s1, 16 }
  0xac   : > { %s772_s18 = sshll.u32 %s765_s26, 4  ;;  %p3348_p9 = scmp.ne.s32.totalorder %s3999_s1, %s3347_s27  ;;  %s773_s18 = int_to_ptr.vmem [resolvable:$true] %s772_s18 }
  0xad   : > { %s3351_s2 = scalar_lea.hbm %s4609_s13, 32  ;;  %p3352_p0 = scmp.lt.u32.totalorder %s3999_s1, %s4609_s13 }
  0xae   : > { %p3349_p11 = pnand %p3348_p9, %p3841_p4  ;;  %p3353_p12 = scmp.lt.u32.totalorder %s3351_s2, %s3347_s27 }
  0xaf   : > { %p3355_p2 = scmp.lt.u32.totalorder %s3347_s27, %s3999_s1 }
  0xb0   : > { %p3350_p10 = pneg %p3349_p11  ;;  %p3354_p13 = por %p3353_p12, %p3352_p0 }
  0xb2   : > { %p3356_p1 = por %p3355_p2, %p3354_p13 }
  0xb4   : > { %p3357_p3 = pnand %p3356_p1, %p3350_p10 }
  0xb6   : > { %3360 = shalt.err (!%p3357_p3)
}
  0xb7   : > { %s3361_s21 = scalar_lea.vmem %s773_s18, 16  ;;  %s3696_s26 = smov [#allocation21]  }
  0xb8   : > { %p3362_p7 = scmp.ne.s32.totalorder %s773_s18, %s3361_s21  ;;  %s3365_s0 = sshll.u32 %s3696_s26, 4  ;;  %s3366_s0 = int_to_ptr.vmem [resolvable:$false] %s3365_s0 }
  0xb9   : > { %s3367_s14 = scalar_lea.vmem %s3366_s0, 32  ;;  %p3368_p6 = scmp.lt.s32.totalorder %s773_s18, %s3366_s0 }
  0xba   : > { %p3363_p5 = pnand %p3362_p7, %p3841_p4  ;;  %p3369_p9 = scmp.lt.s32.totalorder %s3367_s14, %s3361_s21 }
  0xbc   : > { %p3364_p8 = pneg %p3363_p5  ;;  %p3370_p11 = por %p3369_p9, %p3368_p6 }
  0xbe   : > { %p3371_p0 = pnand %p3370_p11, %p3364_p8 }
  0xc0   : > { %3374 = shalt.err (!%p3371_p0)
}
  0xc1   : > { %s4653_s27 = scalar_lea.sflag [#allocation22], %s3855_s24  ;;  %s4026_s19 = scalar_lea.hbm %s4612_s16, %s3858_s25 }
  0xc2   : > { %3122 = dma.hbm_to_vmem [thread:$0]  (%p3841_p4), %s3999_s1, 16, %s773_s18, %s4653_s27  }
  0xc3   : > { %s807_s0 = scalar_lea.vmem [#allocation24], %s3852_s23  ;;  %s4032_s21 = sshll.u32 %s3852_s23, 5 }
  0xc4   : > { %s814_s20 = sshll.u32 %s807_s0, 4  ;;  %s4627_s26 = scalar_lea.sflag [#allocation25], %s3855_s24  ;;  %s4029_s20 = int_to_ptr.vmem [resolvable:$true] %s814_s20 }
  0xc5   : > { %s3375_s14 = scalar_lea.hbm %s4026_s19, 16  ;;  %s3379_s27 = scalar_lea.hbm %s4612_s16, 32 }
  0xc6   : > { %p3376_p10 = scmp.ne.s32.totalorder %s4026_s19, %s3375_s14  ;;  %p3380_p2 = scmp.lt.u32.totalorder %s4026_s19, %s4612_s16 }
  0xc7   : > { %p3381_p1 = scmp.lt.u32.totalorder %s3379_s27, %s3375_s14  ;;  %p3383_p7 = scmp.lt.u32.totalorder %s3375_s14, %s4026_s19 }
  0xc8   : > { %p3377_p12 = pnand %p3376_p10, %p3841_p4 }
  0xc9   : > { %p3382_p3 = por %p3381_p1, %p3380_p2 }
  0xca   : > { %p3378_p13 = pneg %p3377_p12 }
  0xcb   : > { %p3384_p5 = por %p3383_p7, %p3382_p3 }
  0xcd   : > { %p3385_p8 = pnand %p3384_p5, %p3378_p13 }
  0xcf   : > { %3388 = shalt.err (!%p3385_p8)
}
  0xd0   : > { %s3389_s0 = scalar_lea.vmem %s4029_s20, 16  ;;  %s3697_s1 = smov [#allocation24]  }
  0xd1   : > { %p3390_p6 = scmp.ne.s32.totalorder %s4029_s20, %s3389_s0  ;;  %s3393_s18 = sshll.u32 %s3697_s1, 4  ;;  %s3394_s18 = int_to_ptr.vmem [resolvable:$false] %s3393_s18 }
  0xd2   : > { %s3395_s29 = scalar_lea.vmem %s3394_s18, 32  ;;  %p3396_p0 = scmp.lt.s32.totalorder %s4029_s20, %s3394_s18 }
  0xd3   : > { %p3391_p9 = pnand %p3390_p6, %p3841_p4  ;;  %p3397_p10 = scmp.lt.s32.totalorder %s3395_s29, %s3389_s0 }
  0xd5   : > { %p3392_p11 = pneg %p3391_p9  ;;  %p3398_p12 = por %p3397_p10, %p3396_p0 }
  0xd7   : > { %p3399_p2 = pnand %p3398_p12, %p3392_p11 }
  0xd9   : > { %3402 = shalt.err (!%p3399_p2)
}
  0xda   : > { %3124 = dma.hbm_to_vmem [thread:$0]  (%p3841_p4), %s4026_s19, 16, %s4029_s20, %s4627_s26  }
  0xdb   : > { %s4059_s14 = sshll.u32 %s3689_s30, 9  ;;  %s4654_s0 = sld [smem:[#allocation42_spill]] }
  0xdc   : > { %s559_s18 = scalar_lea.vmem [#allocation4], %s4032_s21  ;;  %s556_s3 = scalar_lea.sflag [#allocation5], %s3852_s23 }
  0xdd   : > { %s566_s29 = sshll.u32 %s559_s18, 4  ;;  %s4068_s29 = int_to_ptr.vmem [resolvable:$true] %s566_s29 }
  0xe1   : > { %s4065_s1 = scalar_lea.hbm %s4654_s0, %s4059_s14  ;;  %s3407_s27 = scalar_lea.hbm %s4654_s0, 1024 }
  0xe2   : > { %s3403_s5 = scalar_lea.hbm %s4065_s1, 512  ;;  %p3408_p7 = scmp.lt.u32.totalorder %s4065_s1, %s4654_s0 }
  0xe3   : > { %p3404_p13 = scmp.ne.s32.totalorder %s4065_s1, %s3403_s5  ;;  %p3409_p5 = scmp.lt.u32.totalorder %s3407_s27, %s3403_s5 }
  0xe4   : > { %p3411_p6 = scmp.lt.u32.totalorder %s3403_s5, %s4065_s1 }
  0xe5   : > { %p3405_p1 = pnand %p3404_p13, %p3841_p4  ;;  %p3410_p8 = por %p3409_p5, %p3408_p7 }
  0xe7   : > { %p3406_p3 = pneg %p3405_p1  ;;  %p3412_p9 = por %p3411_p6, %p3410_p8 }
  0xe9   : > { %p3413_p11 = pnand %p3412_p9, %p3406_p3 }
  0xeb   : > { %3416 = shalt.err (!%p3413_p11)
}
  0xec   : > { %s3417_s18 = scalar_lea.vmem %s4068_s29, 512  ;;  %s3698_s19 = smov [#allocation4]  }
  0xed   : > { %p3418_p0 = scmp.ne.s32.totalorder %s4068_s29, %s3417_s18  ;;  %s3421_s20 = sshll.u32 %s3698_s19, 4  ;;  %s3422_s20 = int_to_ptr.vmem [resolvable:$false] %s3421_s20 }
  0xee   : > { %s3423_s26 = scalar_lea.vmem %s3422_s20, 1024  ;;  %p3424_p2 = scmp.lt.s32.totalorder %s4068_s29, %s3422_s20 }
  0xef   : > { %p3419_p10 = pnand %p3418_p0, %p3841_p4  ;;  %p3425_p13 = scmp.lt.s32.totalorder %s3423_s26, %s3417_s18 }
  0xf1   : > { %p3420_p12 = pneg %p3419_p10  ;;  %p3426_p1 = por %p3425_p13, %p3424_p2 }
  0xf3   : > { %p3427_p7 = pnand %p3426_p1, %p3420_p12 }
  0xf5   : > { %3430 = shalt.err (!%p3427_p7)
}
  0xf6   : > { %s3699_s5 = smov 128   ;;  %s3700_s27 = smov 8  }
  0xf7   : > { %3111 = dma.hbm_to_vmem [thread:$0]  (%p3841_p4), %s4065_s1, 512, %s4068_s29, %s556_s3, %s3699_s5, %s3699_s5, %s3700_s27  }
  0xf8   : > { %s4655_s4 = sld [smem:[#allocation44_spill]]  ;;  %s597_s20 = scalar_lea.vmem [#allocation8], %s4032_s21 }
  0xf9   : > { %s604_s26 = sshll.u32 %s597_s20, 4  ;;  %s4104_s26 = int_to_ptr.vmem [resolvable:$true] %s604_s26 }
  0xfe   : > { %s4101_s19 = scalar_lea.hbm %s4655_s4, %s4059_s14  ;;  %s3435_s1 = scalar_lea.hbm %s4655_s4, 1024 }
  0xff   : > { %s3431_s0 = scalar_lea.hbm %s4101_s19, 512  ;;  %p3436_p6 = scmp.lt.u32.totalorder %s4101_s19, %s4655_s4 }
 0x100   : > { %p3432_p3 = scmp.ne.s32.totalorder %s4101_s19, %s3431_s0  ;;  %p3437_p9 = scmp.lt.u32.totalorder %s3435_s1, %s3431_s0 }
 0x101   : > { %p3439_p0 = scmp.lt.u32.totalorder %s3431_s0, %s4101_s19 }
 0x102   : > { %p3433_p5 = pnand %p3432_p3, %p3841_p4  ;;  %p3438_p11 = por %p3437_p9, %p3436_p6 }
 0x104   : > { %p3434_p8 = pneg %p3433_p5  ;;  %p3440_p10 = por %p3439_p0, %p3438_p11 }
 0x106   : > { %p3441_p12 = pnand %p3440_p10, %p3434_p8 }
 0x108   : > { %3444 = shalt.err (!%p3441_p12)
}
 0x109   : > { %s3445_s18 = scalar_lea.vmem %s4104_s26, 512  ;;  %s3701_s7 = smov [#allocation8]  }
 0x10a   : > { %p3446_p2 = scmp.ne.s32.totalorder %s4104_s26, %s3445_s18  ;;  %s3449_s20 = sshll.u32 %s3701_s7, 4  ;;  %s3450_s20 = int_to_ptr.vmem [resolvable:$false] %s3449_s20 }
 0x10b   : > { %s3451_s3 = scalar_lea.vmem %s3450_s20, 1024  ;;  %p3452_p7 = scmp.lt.s32.totalorder %s4104_s26, %s3450_s20 }
 0x10c   : > { %p3447_p13 = pnand %p3446_p2, %p3841_p4  ;;  %p3453_p3 = scmp.lt.s32.totalorder %s3451_s3, %s3445_s18 }
 0x10e   : > { %p3448_p1 = pneg %p3447_p13  ;;  %p3454_p5 = por %p3453_p3, %p3452_p7 }
 0x110   : > { %p3455_p6 = pnand %p3454_p5, %p3448_p1 }
 0x112   : > { %3458 = shalt.err (!%p3455_p6)
}
 0x113   : > { %s4656_s0 = scalar_lea.sflag [#allocation7], %s3855_s24  ;;  %s4136_s2 = scalar_lea.hbm %s4602_s6, %s4059_s14 }
 0x114   : > { %3113 = dma.hbm_to_vmem [thread:$0]  (%p3841_p4), %s4101_s19, 512, %s4104_s26, %s4656_s0, %s3699_s5, %s3699_s5, %s3700_s27  }
 0x115   : > { %s635_s18 = scalar_lea.vmem [#allocation11], %s4032_s21  ;;  %s3459_s20 = scalar_lea.hbm %s4136_s2, 512 }
 0x116   : > { %s642_s7 = sshll.u32 %s635_s18, 4  ;;  %p3460_p8 = scmp.ne.s32.totalorder %s4136_s2, %s3459_s20  ;;  %s4139_s7 = int_to_ptr.vmem [resolvable:$true] %s642_s7 }
 0x117   : > { %s3463_s26 = scalar_lea.hbm %s4602_s6, 1024  ;;  %p3464_p0 = scmp.lt.u32.totalorder %s4136_s2, %s4602_s6 }
 0x118   : > { %p3461_p9 = pnand %p3460_p8, %p3841_p4  ;;  %p3465_p10 = scmp.lt.u32.totalorder %s3463_s26, %s3459_s20 }
 0x119   : > { %p3467_p2 = scmp.lt.u32.totalorder %s3459_s20, %s4136_s2 }
 0x11a   : > { %p3462_p11 = pneg %p3461_p9  ;;  %p3466_p12 = por %p3465_p10, %p3464_p0 }
 0x11c   : > { %p3468_p13 = por %p3467_p2, %p3466_p12 }
 0x11e   : > { %p3469_p1 = pnand %p3468_p13, %p3462_p11 }
 0x120   : > { %3472 = shalt.err (!%p3469_p1)
}
 0x121   : > { %s3473_s29 = scalar_lea.vmem %s4139_s7, 512  ;;  %s3702_s18 = smov [#allocation11]  }
 0x122   : > { %p3474_p7 = scmp.ne.s32.totalorder %s4139_s7, %s3473_s29  ;;  %s3477_s3 = sshll.u32 %s3702_s18, 4  ;;  %s3478_s3 = int_to_ptr.vmem [resolvable:$false] %s3477_s3 }
 0x123   : > { %s3479_s19 = scalar_lea.vmem %s3478_s3, 1024  ;;  %p3480_p6 = scmp.lt.s32.totalorder %s4139_s7, %s3478_s3 }
 0x124   : > { %p3475_p3 = pnand %p3474_p7, %p3841_p4  ;;  %p3481_p8 = scmp.lt.s32.totalorder %s3479_s19, %s3473_s29 }
 0x126   : > { %p3476_p5 = pneg %p3475_p3  ;;  %p3482_p9 = por %p3481_p8, %p3480_p6 }
 0x128   : > { %p3483_p0 = pnand %p3482_p9, %p3476_p5 }
 0x12a   : > { %3486 = shalt.err (!%p3483_p0)
}
 0x12b   : > { %s4657_s20 = scalar_lea.sflag [#allocation10], %s3855_s24  ;;  %s4171_s1 = scalar_lea.hbm %s4604_s8, %s4059_s14 }
 0x12c   : > { %3115 = dma.hbm_to_vmem [thread:$0]  (%p3841_p4), %s4136_s2, 512, %s4139_s7, %s4657_s20, %s3699_s5, %s3699_s5, %s3700_s27  }
 0x12d   : > { %s673_s29 = scalar_lea.vmem [#allocation14], %s4032_s21  ;;  %s3487_s3 = scalar_lea.hbm %s4171_s1, 512 }
 0x12e   : > { %s680_s18 = sshll.u32 %s673_s29, 4  ;;  %p3488_p11 = scmp.ne.s32.totalorder %s4171_s1, %s3487_s3  ;;  %s4174_s18 = int_to_ptr.vmem [resolvable:$true] %s680_s18 }
 0x12f   : > { %s3491_s7 = scalar_lea.hbm %s4604_s8, 1024  ;;  %p3492_p2 = scmp.lt.u32.totalorder %s4171_s1, %s4604_s8 }
 0x130   : > { %p3489_p10 = pnand %p3488_p11, %p3841_p4  ;;  %p3493_p13 = scmp.lt.u32.totalorder %s3491_s7, %s3487_s3 }
 0x131   : > { %p3495_p7 = scmp.lt.u32.totalorder %s3487_s3, %s4171_s1 }
 0x132   : > { %p3490_p12 = pneg %p3489_p10  ;;  %p3494_p1 = por %p3493_p13, %p3492_p2 }
 0x134   : > { %p3496_p3 = por %p3495_p7, %p3494_p1 }
 0x136   : > { %p3497_p5 = pnand %p3496_p3, %p3490_p12 }
 0x138   : > { %3500 = shalt.err (!%p3497_p5)
}
 0x139   : > { %s3501_s0 = scalar_lea.vmem %s4174_s18, 512  ;;  %s3703_s29 = smov [#allocation14]  }
 0x13a   : > { %p3502_p6 = scmp.ne.s32.totalorder %s4174_s18, %s3501_s0  ;;  %s3505_s19 = sshll.u32 %s3703_s29, 4  ;;  %s3506_s19 = int_to_ptr.vmem [resolvable:$false] %s3505_s19 }
 0x13b   : > { %s3507_s2 = scalar_lea.vmem %s3506_s19, 1024  ;;  %p3508_p0 = scmp.lt.s32.totalorder %s4174_s18, %s3506_s19 }
 0x13c   : > { %p3503_p8 = pnand %p3502_p6, %p3841_p4  ;;  %p3509_p11 = scmp.lt.s32.totalorder %s3507_s2, %s3501_s0 }
 0x13e   : > { %p3504_p9 = pneg %p3503_p8  ;;  %p3510_p10 = por %p3509_p11, %p3508_p0 }
 0x140   : > { %p3511_p2 = pnand %p3510_p10, %p3504_p9 }
 0x142   : > { %3514 = shalt.err (!%p3511_p2)
}
 0x143   : > { %s4658_s3 = scalar_lea.sflag [#allocation13], %s3855_s24  ;;  %s4206_s26 = scalar_lea.hbm %s4606_s10, %s3858_s25 }
 0x144   : > { %3117 = dma.hbm_to_vmem [thread:$0]  (%p3841_p4), %s4171_s1, 512, %s4174_s18, %s4658_s3, %s3699_s5, %s3699_s5, %s3700_s27  }
 0x145   : > { %s710_s0 = scalar_lea.vmem [#allocation17], %s3852_s23  ;;  %s3515_s19 = scalar_lea.hbm %s4206_s26, 16 }
 0x146   : > { %s717_s29 = sshll.u32 %s710_s0, 4  ;;  %p3516_p12 = scmp.ne.s32.totalorder %s4206_s26, %s3515_s19  ;;  %s718_s29 = int_to_ptr.vmem [resolvable:$true] %s717_s29 }
 0x147   : > { %s3519_s1 = scalar_lea.hbm %s4606_s10, 32  ;;  %p3520_p7 = scmp.lt.u32.totalorder %s4206_s26, %s4606_s10 }
 0x148   : > { %p3517_p13 = pnand %p3516_p12, %p3841_p4  ;;  %p3521_p3 = scmp.lt.u32.totalorder %s3519_s1, %s3515_s19 }
 0x149   : > { %p3523_p6 = scmp.lt.u32.totalorder %s3515_s19, %s4206_s26 }
 0x14a   : > { %p3518_p1 = pneg %p3517_p13  ;;  %p3522_p5 = por %p3521_p3, %p3520_p7 }
 0x14c   : > { %p3524_p8 = por %p3523_p6, %p3522_p5 }
 0x14e   : > { %p3525_p9 = pnand %p3524_p8, %p3518_p1 }
 0x150   : > { %3528 = shalt.err (!%p3525_p9)
}
 0x151   : > { %s3529_s7 = scalar_lea.vmem %s718_s29, 16  ;;  %s3704_s20 = smov [#allocation17]  }
 0x152   : > { %p3530_p0 = scmp.ne.s32.totalorder %s718_s29, %s3529_s7  ;;  %s3533_s0 = sshll.u32 %s3704_s20, 4  ;;  %s3534_s0 = int_to_ptr.vmem [resolvable:$false] %s3533_s0 }
 0x153   : > { %s3535_s4 = scalar_lea.vmem %s3534_s0, 32  ;;  %p3536_p2 = scmp.lt.s32.totalorder %s718_s29, %s3534_s0 }
 0x154   : > { %p3531_p11 = pnand %p3530_p0, %p3841_p4  ;;  %p3537_p12 = scmp.lt.s32.totalorder %s3535_s4, %s3529_s7 }
 0x156   : > { %p3532_p10 = pneg %p3531_p11  ;;  %p3538_p13 = por %p3537_p12, %p3536_p2 }
 0x158   : > { %p3539_p3 = pnand %p3538_p13, %p3532_p10 }
 0x15a   : > { %3542 = shalt.err (!%p3539_p3)
}
 0x15b   : > { %s4659_s19 = scalar_lea.sflag [#allocation16], %s3855_s24  ;;  %s4232_s18 = scalar_lea.hbm %s4608_s12, %s4059_s14 }
 0x15c   : > { %3119 = dma.hbm_to_vmem [thread:$0]  (%p3841_p4), %s4206_s26, 16, %s718_s29, %s4659_s19  }
 0x15d   : > { %s745_s3 = scalar_lea.vmem [#allocation20], %s4032_s21  ;;  %s3543_s20 = scalar_lea.hbm %s4232_s18, 512 }
 0x15e   : > { %s752_s7 = sshll.u32 %s745_s3, 4  ;;  %p3544_p1 = scmp.ne.s32.totalorder %s4232_s18, %s3543_s20  ;;  %s4235_s7 = int_to_ptr.vmem [resolvable:$true] %s752_s7 }
 0x15f   : > { %s3547_s29 = scalar_lea.hbm %s4608_s12, 1024  ;;  %p3548_p6 = scmp.lt.u32.totalorder %s4232_s18, %s4608_s12 }
 0x160   : > { %p3545_p7 = pnand %p3544_p1, %p3841_p4  ;;  %p3549_p8 = scmp.lt.u32.totalorder %s3547_s29, %s3543_s20 }
 0x161   : > { %p3551_p0 = scmp.lt.u32.totalorder %s3543_s20, %s4232_s18 }
 0x162   : > { %p3546_p5 = pneg %p3545_p7  ;;  %p3550_p9 = por %p3549_p8, %p3548_p6 }
 0x164   : > { %p3552_p11 = por %p3551_p0, %p3550_p9 }
 0x166   : > { %p3553_p10 = pnand %p3552_p11, %p3546_p5 }
 0x168   : > { %3556 = shalt.err (!%p3553_p10)
}
 0x169   : > { %s3557_s21 = scalar_lea.vmem %s4235_s7, 512  ;;  %s3705_s19 = smov [#allocation20]  }
 0x16a   : > { %p3558_p2 = scmp.ne.s32.totalorder %s4235_s7, %s3557_s21  ;;  %s3561_s2 = sshll.u32 %s3705_s19, 4  ;;  %s3562_s2 = int_to_ptr.vmem [resolvable:$false] %s3561_s2 }
 0x16b   : > { %s3563_s1 = scalar_lea.vmem %s3562_s2, 1024  ;;  %p3564_p3 = scmp.lt.s32.totalorder %s4235_s7, %s3562_s2 }
 0x16c   : > { %p3559_p12 = pnand %p3558_p2, %p3841_p4  ;;  %p3565_p1 = scmp.lt.s32.totalorder %s3563_s1, %s3557_s21 }
 0x16e   : > { %p3560_p13 = pneg %p3559_p12  ;;  %p3566_p7 = por %p3565_p1, %p3564_p3 }
 0x170   : > { %p3567_p6 = pnand %p3566_p7, %p3560_p13 }
 0x172   : > { %3570 = shalt.err (!%p3567_p6)
}
 0x173   : > { %s4660_s3 = scalar_lea.sflag [#allocation19], %s3855_s24  ;;  %s4267_s26 = scalar_lea.hbm %s4611_s15, %s3858_s25 }
 0x174   : > { %3121 = dma.hbm_to_vmem [thread:$0]  (%p3841_p4), %s4232_s18, 512, %s4235_s7, %s4660_s3, %s3699_s5, %s3699_s5, %s3700_s27  }
 0x175   : > { %s790_s29 = scalar_lea.vmem [#allocation23], %s3852_s23  ;;  %s3571_s14 = scalar_lea.hbm %s4267_s26, 16 }
 0x176   : > { %s797_s4 = sshll.u32 %s790_s29, 4  ;;  %p3572_p5 = scmp.ne.s32.totalorder %s4267_s26, %s3571_s14  ;;  %s798_s4 = int_to_ptr.vmem [resolvable:$true] %s797_s4 }
 0x177   : > { %s3575_s5 = scalar_lea.hbm %s4611_s15, 32  ;;  %p3576_p0 = scmp.lt.u32.totalorder %s4267_s26, %s4611_s15 }
 0x178   : > { %p3573_p8 = pnand %p3572_p5, %p3841_p4  ;;  %p3577_p11 = scmp.lt.u32.totalorder %s3575_s5, %s3571_s14 }
 0x179   : > { %p3579_p2 = scmp.lt.u32.totalorder %s3571_s14, %s4267_s26 }
 0x17a   : > { %p3574_p9 = pneg %p3573_p8  ;;  %p3578_p10 = por %p3577_p11, %p3576_p0 }
 0x17c   : > { %p3580_p12 = por %p3579_p2, %p3578_p10 }
 0x17e   : > { %p3581_p13 = pnand %p3580_p12, %p3574_p9 }
 0x180   : > { %3584 = shalt.err (!%p3581_p13)
}
 0x181   : > { %s3585_s7 = scalar_lea.vmem %s798_s4, 16  ;;  %s3706_s2 = smov [#allocation23]  }
 0x182   : > { %p3586_p3 = scmp.ne.s32.totalorder %s798_s4, %s3585_s7  ;;  %s3589_s1 = sshll.u32 %s3706_s2, 4  ;;  %s3590_s1 = int_to_ptr.vmem [resolvable:$false] %s3589_s1 }
 0x183   : > { %s3591_s3 = scalar_lea.vmem %s3590_s1, 32  ;;  %p3592_p6 = scmp.lt.s32.totalorder %s798_s4, %s3590_s1 }
 0x184   : > { %p3587_p1 = pnand %p3586_p3, %p3841_p4  ;;  %p3593_p5 = scmp.lt.s32.totalorder %s3591_s3, %s3585_s7 }
 0x186   : > { %p3588_p7 = pneg %p3587_p1  ;;  %p3594_p8 = por %p3593_p5, %p3592_p6 }
 0x188   : > { %p3595_p0 = pnand %p3594_p8, %p3588_p7 }
 0x18a   : > { %3598 = shalt.err (!%p3595_p0)
}
 0x18b   : > { %s4661_s20 = scalar_lea.sflag [#allocation22], %s3855_s24  ;;  %s4293_s14 = scalar_lea.hbm %s4613_s17, %s3858_s25 }
 0x18c   : > { %3123 = dma.hbm_to_vmem [thread:$0]  (%p3841_p4), %s4267_s26, 16, %s798_s4, %s4661_s20  }
 0x18d   : > { %s824_s21 = scalar_lea.vmem [#allocation26], %s3852_s23  ;;  %s3599_s5 = scalar_lea.hbm %s4293_s14, 16 }
 0x18e   : > { %s831_s19 = sshll.u32 %s824_s21, 4  ;;  %p3600_p9 = scmp.ne.s32.totalorder %s4293_s14, %s3599_s5  ;;  %s832_s19 = int_to_ptr.vmem [resolvable:$true] %s831_s19 }
 0x18f   : > { %s3603_s26 = scalar_lea.hbm %s4613_s17, 32  ;;  %p3604_p2 = scmp.lt.u32.totalorder %s4293_s14, %s4613_s17 }
 0x190   : > { %p3601_p11 = pnand %p3600_p9, %p3841_p4  ;;  %p3605_p12 = scmp.lt.u32.totalorder %s3603_s26, %s3599_s5 }
 0x191   : > { %p3607_p3 = scmp.lt.u32.totalorder %s3599_s5, %s4293_s14 }
 0x192   : > { %p3602_p10 = pneg %p3601_p11  ;;  %p3606_p13 = por %p3605_p12, %p3604_p2 }
 0x194   : > { %p3608_p1 = por %p3607_p3, %p3606_p13 }
 0x196   : > { %p3609_p7 = pnand %p3608_p1, %p3602_p10 }
 0x198   : > { %3612 = shalt.err (!%p3609_p7)
}
 0x199   : > { %s3613_s23 = scalar_lea.vmem %s832_s19, 16  ;;  %s3707_s25 = smov [#allocation26]  }
 0x19a   : > { %p3614_p6 = scmp.ne.s32.totalorder %s832_s19, %s3613_s23  ;;  %s3617_s2 = sshll.u32 %s3707_s25, 4  ;;  %s3618_s2 = int_to_ptr.vmem [resolvable:$false] %s3617_s2 }
 0x19b   : > { %s3619_s1 = scalar_lea.vmem %s3618_s2, 32  ;;  %p3620_p0 = scmp.lt.s32.totalorder %s832_s19, %s3618_s2 }
 0x19c   : > { %p3615_p5 = pnand %p3614_p6, %p3841_p4  ;;  %p3621_p9 = scmp.lt.s32.totalorder %s3619_s1, %s3613_s23 }
 0x19e   : > { %p3616_p8 = pneg %p3615_p5  ;;  %p3622_p11 = por %p3621_p9, %p3620_p0 }
 0x1a0   : > { %p3623_p2 = pnand %p3622_p11, %p3616_p8 }
 0x1a2   : > { %3626 = shalt.err (!%p3623_p2)
}
 0x1a3   : > { %s4662_s3 = scalar_lea.sflag [#allocation25], %s3855_s24 }
 0x1a4   : > { %3125 = dma.hbm_to_vmem [thread:$0]  (%p3841_p4), %s4293_s14, 16, %s832_s19, %s4662_s3  }
 0x1a5 PF: > { %p2794_p10 = scmp.ge.s32.totalorder %s3689_s30, 1  ;;  %p836_p12 = scmp.lt.s32.totalorder %s3689_s30, 3 }
 0x1a7   : > { %p837_p13 = pnand %p2794_p10, %p836_p12 }
 0x1a8   : > { %s4663_s20 = sld [smem:[#allocation39_spill]] (!%p837_p13)  ;;  %s4318_s0 = sand.u32 (!%p837_p13), 1, %s3681_s28  }
 0x1a9   : > { %840 = sbr.rel (%p837_p13) target bundleno = 3412 (0xd54), region = 92  ;;  %s4321_s29 = sshll.u32 (!%p837_p13), %s4318_s0, 5 }
 0x1aa   : > { %s843_s22 = scalar_lea.sflag (!%p837_p13), [#allocation5], %s4318_s0  ;;  %s4325_s24 = scalar_lea.vmem (!%p837_p13), [#allocation4], %s4321_s29 }
 0x1ae   : > { %p4664_p4 = scmp.ne.s32.totalorder (!%p837_p13), %s4663_s20, 0 }
 0x1b0   : > { %3644 = dma.done.wait (%p4664_p4), %s843_s22, 512  }
 0x1b1   : > { %3646 = vsyncadd (%p4664_p4), %s843_s22, 4294966784  ;;  %s4665_s30 = sld [smem:[#allocation36_spill]] }
 0x1b7   : > { %s4332_s14 = sand.u32 1, %s4665_s30  }
 0x1b8   : > { %s852_s21 = scalar_lea.sflag [#allocation7], %s4332_s14 }
 0x1b9   : > { %3648 = dma.done.wait (%p4664_p4), %s852_s21, 528  }
 0x1ba   : > { %3650 = vsyncadd (%p4664_p4), %s852_s21, 4294966768  ;;  %s4341_s5 = scalar_lea.vmem [#allocation8], %s4321_s29  ;;  %s869_s27 = scalar_lea.sflag [#allocation10], %s4332_s14 }
 0x1bb   : > { %s871_s18 = scalar_lea.vmem [#allocation9], %s4318_s0 }
 0x1bc   : > { %3652 = dma.done.wait (%p4664_p4), %s869_s27, 528  }
 0x1bd   : > { %3654 = vsyncadd (%p4664_p4), %s869_s27, 4294966768  ;;  %s4350_s26 = scalar_lea.vmem [#allocation11], %s4321_s29  ;;  %s886_s4 = scalar_lea.sflag [#allocation13], %s4332_s14 }
 0x1be   : > { %3656 = dma.done.wait (%p4664_p4), %s886_s4, 528  }
 0x1bf   : > { %3658 = vsyncadd (%p4664_p4), %s886_s4, 4294966768  ;;  %s4359_s23 = scalar_lea.vmem [#allocation14], %s4321_s29  ;;  %s903_s25 = scalar_lea.sflag [#allocation16], %s4332_s14 }
 0x1c0   : > { %3660 = dma.done.wait (%p4664_p4), %s903_s25, 32  }
 0x1c1   : > { %3662 = vsyncadd (%p4664_p4), %s903_s25, 4294967264  ;;  %s919_s3 = scalar_lea.sflag [#allocation19], %s4332_s14 }
 0x1c2   : > { %3664 = dma.done.wait (%p4664_p4), %s919_s3, 528  }
 0x1c3   : > { %3666 = vsyncadd (%p4664_p4), %s919_s3, 4294966768  ;;  %s4375_s21 = scalar_lea.vmem [#allocation20], %s4321_s29  ;;  %s936_s27 = scalar_lea.sflag [#allocation22], %s4332_s14 }
 0x1c4   : > { %3668 = dma.done.wait (%p4664_p4), %s936_s27, 32  }
 0x1c5   : > { %3670 = vsyncadd (%p4664_p4), %s936_s27, 4294967264  ;;  %s952_s22 = scalar_lea.sflag [#allocation25], %s4332_s14 }
 0x1c6   : > { %3672 = dma.done.wait (%p4664_p4), %s952_s22, 32  }
 0x1c7   : > { %3674 = vsyncadd (%p4664_p4), %s952_s22, 4294967264  ;;  %p1075_p3 = scmp.lt.s32.totalorder %s4665_s30, 1  ;;  %s4666_s2 = sld [smem:[#allocation47_spill]] }
 0x1c8   : > { %s962_s19 = scalar_lea.vmem [#allocation26], %s4318_s0  ;;  %p2802_p1 = scmp.ne.s32.totalorder %s4665_s30, 0 }
 0x1c9   : > { %s1076_s29 = scalar_select %p1075_p3, %s4665_s30, 1 }
 0x1ca   : > { %1083 = sbr.rel (%p2802_p1) target bundleno = 466 (0x1d2), region = 156  ;;  %s4667_s25 = sld [smem:[#allocation40_spill]] (!%p2802_p1)  ;;  %vm1086_vm0 = vcmask (!%p2802_p1), 261120  }
 0x1cb   : > { %s2844_s4 = sshll.u32 %s1076_s29, 7 }
 0x1cd   : > { %s4395_s7 = scalar_lea.vmem %s4666_s2, %s2844_s4 }
 0x1d0   : > { %v1084_v0 = vld [vmem:[%s4667_s25] sm:$0xff] (!%p2802_p1)  ;;  %v1085_v1 = vld [vmem:[%s4667_s25 + $0x8] sm:$0xff] (!%p2802_p1) }
 0x1d1   : > { %1087 = vst.msk [vmem:[#allocation2] sm:$0xff] %vm1086_vm0, %v1084_v0  ;;  %1088 = vst.msk [vmem:[#allocation2 + $0x8] sm:$0xff] %vm1086_vm0, %v1085_v1 }
 0x1d2 PF: > { %v1103_v2 = vld [vmem:[%s4325_s24] sm:$0xff]  ;;  %v1104_v3 = vld [vmem:[%s4325_s24 + $0x8] sm:$0xff]  ;;  %v1105_v4 = vld [vmem:[%s4325_s24 + $0x10] sm:$0xff]  ;;  %vm1113_vm1 = vcmask 261120   ;;  %v3708_v22 = vmov 0.0   ;;  %vm3709_vm2 = vmmov 0  }
 0x1d3   : > { %v3039_v5 = vpack.c.bf16 %v1104_v3, %v1103_v2  ;;  %v1106_v6 = vld [vmem:[%s4325_s24 + $0x18] sm:$0xff]  ;;  %v1195_v9 = vld [vmem:[%s4341_s5] sm:$0xff]  ;;  %v1196_v10 = vld [vmem:[%s4341_s5 + $0x8] sm:$0xff]  ;;  %2952 = vmatprep.subr.mxu0 %v3708_v22  ;;  %2954 = vmatprep.mubr.msk.f32.mxu0 %vm3709_vm2, %v3708_v22  ;;  %vm1365_vm3 = vcmask 130048   ;;  %s4668_s24 = scalar_lea.vmem [#allocation6], %s4318_s0  ;;  %s3710_s30 = smov 112  }
 0x1d4   : > { %v3043_v8 = vpack.c.bf16 %v1106_v6, %v1105_v4  ;;  %v3047_v11 = vpack.c.bf16 %v1196_v10, %v1195_v9  ;;  %v1197_v12 = vld [vmem:[%s4341_s5 + $0x10] sm:$0xff]  ;;  %v1198_v13 = vld [vmem:[%s4341_s5 + $0x18] sm:$0xff]  ;;  %v1280_v16 = vld [vmem:[%s4350_s26] sm:$0xff]  ;;  %s4669_s5 = scalar_lea.vmem [#allocation12], %s4318_s0  ;;  %s4670_s2 = sld [smem:[#allocation41_spill]]  ;;  %vm1534_vm4 = vcmask 64512  }
 0x1d5   : > { %3040 = vmatprep.subr.bf16.mxu1 %v3039_v5  ;;  %v3051_v15 = vpack.c.bf16 %v1198_v13, %v1197_v12  ;;  %v1281_v17 = vld [vmem:[%s4350_s26 + $0x8] sm:$0xff]  ;;  %v1282_v19 = vld [vmem:[%s4350_s26 + $0x10] sm:$0xff]  ;;  %v1283_v20 = vld [vmem:[%s4350_s26 + $0x18] sm:$0xff]  ;;  %s3711_s3 = smov 16   ;;  %vm2049_vm5 = vcmask 261248   ;;  %s4673_s29 = scalar_lea.vmem [#allocation18], %s4318_s0 }
 0x1d6   : > { %3042 = vmatpush3.bf16.msra.mxu1 %v3039_v5  ;;  %v3055_v18 = vpack.c.bf16 %v1281_v17, %v1280_v16  ;;  %v3059_v21 = vpack.c.bf16 %v1283_v20, %v1282_v19  ;;  %v2806_v25 = vld [vmem:[%s871_s18] ss:$0 sm:$0xff]  ;;  %s4674_s27 = scalar_lea.vmem [#allocation21], %s4318_s0  ;;  %s4676_s14 = scalar_lea.vmem [#allocation24], %s4318_s0 }
 0x1d7   : > { %3044 = vmatprep.subr.bf16.mxu1 %v3043_v8  ;;  %v2803_v29 = vld [vmem:[%s4668_s24] ss:$0 sm:$0xff]  ;;  %s4677_s24 = sld [smem:[#allocation48_spill]] }
 0x1d8   : > { %v4409_v7 = vld [vmem:[#allocation2] sm:$0xff]  ;;  %v4417_v14 = vld [vmem:[#allocation2 + $0x8] sm:$0xff] }
 0x1d9   : > { %2917 = vmatprep.mubr.msk.f32.mxu1 %vm1113_vm1, %v4409_v7  ;;  %v2809_v33 = vld [vmem:[%s4669_s5] ss:$0 sm:$0xff] }
 0x1da   : > { %3046 = vmatpush3.bf16.msra.mxu1 %v3043_v8  ;;  %v4468_v39 = vld [vmem:[%s4670_s2] ss:$0 sm:$0xff]  ;;  %v4474_v44 = vld [vmem:[%s4670_s2 + $0x1] ss:$0 sm:$0xff] }
 0x1db   : > { %3048 = vmatprep.subr.bf16.mxu1 %v3047_v11 }
 0x1dd   : > { %2918 = vmatmul.mubr.msk.f32.vlgmr.msra.gmra.mrb[0].mxu1 %vm1113_vm1, %v4417_v14 }
 0x1de   : > { %3050 = vmatpush3.bf16.msra.mxu1 %v3047_v11  ;;  %2928 = vmatprep.mubr.msk.f32.mxu1 %vm1113_vm1, %v4409_v7 }
 0x1df   : > { %3052 = vmatprep.subr.bf16.mxu1 %v3051_v15 }
 0x1e2   : > { %3054 = vmatpush3.bf16.msra.mxu1 %v3051_v15 }
 0x1e3   : > { %3056 = vmatprep.subr.bf16.mxu1 %v3055_v18 }
 0x1e5   : > { %2929 = vmatmul.mubr.msk.f32.vlgmr.msra.gmra.mrb[2].mxu1 %vm1113_vm1, %v4417_v14 }
 0x1e6   : > { %3058 = vmatpush3.bf16.msra.mxu1 %v3055_v18  ;;  %2939 = vmatprep.mubr.msk.f32.mxu1 %vm1113_vm1, %v4409_v7 }
 0x1e7   : > { %3060 = vmatprep.subr.bf16.mxu1 %v3059_v21 }
 0x1ea   : > { %3062 = vmatpush3.bf16.msra.mxu1 %v3059_v21 }
 0x1eb   : > { %2942 = vmatprep.subr.mxu1 %v3708_v22 }
 0x1ed   : > { %2940 = vmatmul.mubr.msk.f32.vlgmr.msra.gmra.mrb[4].mxu1 %vm1113_vm1, %v4417_v14 }
 0x1ee   : > { %2944 = vmatprep.mubr.msk.f32.mxu1 %vm3709_vm2, %v3708_v22 }
 0x2b0   : > { %v2919_v23 = vpop.f32.mrb[0].mxu1 }
 0x2b1   : > { %v1186_v24 = vpop.f32.mrb[1].mxu1  ;;  %v1192_v32 = vadd.f32 %v2919_v23, %v2803_v29 }
 0x2b2   : > { %v1187_v31 = vadd.f32 %v2803_v29, %v1186_v24 }
 0x2b8   : > { %v2930_v26 = vpop.f32.mrb[2].mxu1 }
 0x2b9   : > { %v1277_v27 = vadd.f32 %v2930_v26, %v2806_v25  ;;  %v1271_v28 = vpop.f32.mrb[3].mxu1 }
 0x2ba   : > { %v1272_v30 = vadd.f32 %v2806_v25, %v1271_v28 }
 0x2bb   : > { %1785 = vrot.lane.b32.xlu1 %v1277_v27, %s3710_s30 }
 0x2bc   : > { %2943 = vmatpush3.xpose.msk.msra.mxu1 %vm1365_vm3, %v1272_v30 }
 0x2bd   : > { %2947 = vmatprep.subr.mxu1 %v3708_v22 }
 0x2bf   : > { %1705 = vrot.lane.b32.xlu1 %v1187_v31, %s3710_s30  ;;  %2945 = vmatmul.mubr.msk.f32.vlgmr.msra.gmra.mrb[6].mxu1 %vm1365_vm3, %v1187_v31 }
 0x2c0   : > { %2948 = vmatpush3.xpose.msk.msra.mxu1 %vm1365_vm3, %v1277_v27  ;;  %2949 = vmatprep.mubr.msk.f32.mxu1 %vm3709_vm2, %v3708_v22  ;;  %v2941_v34 = vpop.f32.mrb[4].mxu1 }
 0x2c1   : > { %2957 = vmatprep.subr.mxu1 %v3708_v22  ;;  %v4457_v35 = vadd.f32 %v2941_v34, %v2809_v33  ;;  %v1356_v36 = vpop.f32.mrb[5].mxu1 }
 0x2c2   : > { %v4459_v37 = vadd.f32 %v2809_v33, %v1356_v36 }
 0x2c3   : > { %2950 = vmatmul.mubr.msk.f32.vlgmr.msra.gmra.mrb[8].mxu1 %vm1365_vm3, %v1192_v32 }
 0x2c4   : > { %2959 = vmatprep.mubr.msk.f32.mxu1 %vm3709_vm2, %v3708_v22  ;;  %2958 = vmatpush3.msra.mxu1 %v4457_v35 }
 0x2c5   : > { %2953 = vmatpush3.msra.mxu0 %v4459_v37  ;;  %2967 = vmatprep.subr.mxu1 %v3708_v22 }
 0x2c6   : > { %2962 = vmatprep.subr.mxu0 %v3708_v22 }
 0x32d   : > { %v1786_v60 = vpop.permute.xlu1 %1785 }
 0x331   : > { %v1706_v61 = vpop.permute.xlu1 %1705 }
 0x392   : > { %v1438_v38 = vpop.f32.mrb[6].mxu1 }
 0x393   : > { %v1518_v40 = vmul.f32 0.25, %v1438_v38  ;;  %v2946_v41 = vpop.f32.mrb[7].mxu1 }
 0x394   : > { %v2054_v41 = vld [vmem:[%s4359_s23] sm:$0xff] }
 0x395   : > { %v1532_v42 = vadd.f32 %v4468_v39, %v1518_v40 }
 0x396   : > { %v1514_v43 = vpop.f32.mrb[8].mxu1 }
 0x397   : > { %v1519_v45 = vmul.f32 0.25, %v1514_v43  ;;  %v2951_v46 = vpop.f32.mrb[9].mxu1  ;;  %v1535_v47 = vsel %vm1534_vm4, %v1532_v42, -inf }
 0x398   : > { %1536 = vmax.xlane.f32.xlu0 %v1535_v47 }
 0x399   : > { %v1533_v48 = vadd.f32 %v4474_v44, %v1519_v45 }
 0x39b   : > { %v1538_v49 = vsel %vm1534_vm4, %v1533_v48, -inf }
 0x39c   : > { %1539 = vmax.xlane.f32.xlu0 %v1538_v49 }
 0x3b2   : > { %1707 = vrot.lane.b32.xlu0 %v1272_v30, %s3710_s30 }
 0x425   : > { %v1537_v50 = vpop.xlane.xlu0 %1536 }
 0x426   : > { %v1541_v51 = vsub.f32 %v1532_v42, %v1537_v50  ;;  %v2055_v42 = vld [vmem:[%s4359_s23 + $0x8] sm:$0xff] }
 0x427   : > { %v3063_v43 = vpack.c.bf16 %v2055_v42, %v2054_v41  ;;  %v2305_v41 = vld [vmem:[%s4395_s7 + $0x30] sm:$0xff]  ;;  %v2306_v42 = vld [vmem:[%s4395_s7 + $0x38] sm:$0xff] }
 0x428   : > { %v1543_v52 = vmul.f32 1.442695, %v1541_v51 }
 0x429   : > { %v1540_v53 = vpop.xlane.xlu0 %1539 }
 0x42a   : > { %3179 = vpow2.f32 %v1543_v52  ;;  %v1542_v54 = vsub.f32 %v1533_v48, %v1540_v53 }
 0x42c   : > { %v1545_v55 = vmul.f32 1.442695, %v1542_v54 }
 0x42d   : > { %v1708_v2 = vpop.permute.xlu0 %1707 }
 0x42e   : > { %3181 = vpow2.f32 %v1545_v55 }
 0x434   : > { %v3180_v56 = vpop.eup %3179 }
 0x435   : > { %v1547_v57 = vsel %vm1534_vm4, %v3180_v56, 0.0 }
 0x436   : > { %1548 = vadd.xlane.f32.xlu1 %v1547_v57 }
 0x438   : > { %v3182_v58 = vpop.eup %3181 }
 0x439   : > { %v1550_v59 = vsel %vm1534_vm4, %v3182_v58, 0.0 }
 0x43a   : > { %1551 = vadd.xlane.f32.xlu1 %v1550_v59 }
 0x44b   : > { %1783 = vrot.lane.b32.xlu1 %v1192_v32, %s3710_s30 }
 0x4c3   : > { %v1549_v62 = vpop.xlane.xlu1 %1548 }
 0x4c4   : > { %3183 = vrcp.f32 %v1549_v62 }
 0x4c7   : > { %v1552_v63 = vpop.xlane.xlu1 %1551 }
 0x4c8   : > { %3185 = vrcp.f32 %v1552_v63 }
 0x4cb   : > { %v1784_v5 = vpop.permute.xlu1 %1783 }
 0x4ce   : > { %v3184_v0 = vpop.eup %3183 }
 0x4cf   : > { %v1555_v1 = vmul.f32 %v3184_v0, %v3180_v56 }
 0x4d1   : > { %2955 = vmatmul.mubr.msk.f32.vlgmr.msra.gmra.mrb[0].mxu0 %vm1534_vm4, %v1555_v1 }
 0x4d2   : > { %v3186_v3 = vpop.eup %3185  ;;  %2963 = vmatpush3.xpose.msk.msra.mxu0 %vm1365_vm3, %v1708_v2  ;;  %2964 = vmatprep.mubr.msk.f32.mxu0 %vm3709_vm2, %v3708_v22 }
 0x4d3   : > { %v1556_v4 = vmul.f32 %v3186_v3, %v3182_v58  ;;  %2972 = vmatprep.subr.mxu0 %v3708_v22 }
 0x4d5   : > { %2960 = vmatmul.mubr.msk.f32.vlgmr.msra.gmra.mrb[10].mxu1 %vm1534_vm4, %v1556_v4  ;;  %2965 = vmatmul.mubr.msk.f32.vlgmr.msra.gmra.mrb[2].mxu0 %vm1365_vm3, %v1706_v61 }
 0x4d6   : > { %2968 = vmatpush3.xpose.msk.msra.mxu1 %vm1365_vm3, %v1786_v60  ;;  %2969 = vmatprep.mubr.msk.f32.mxu1 %vm3709_vm2, %v3708_v22 }
 0x4d7   : > { %2977 = vmatprep.subr.mxu1 %v3708_v22  ;;  %2974 = vmatprep.mubr.msk.f32.mxu0 %vm3709_vm2, %v3708_v22 }
 0x4d9   : > { %2970 = vmatmul.mubr.msk.f32.vlgmr.msra.gmra.mrb[12].mxu1 %vm1365_vm3, %v1784_v5 }
 0x4da   : > { %2979 = vmatprep.mubr.msk.f32.mxu1 %vm3709_vm2, %v3708_v22 }
 0x5a4   : > { %v1626_v6 = vpop.f32.mrb[0].mxu0 }
 0x5a5   : > { %1703 = vst.msk [vmem:[#allocation3] sm:$0xff] %vm1365_vm3, %v1626_v6  ;;  %v2956_v8 = vpop.f32.mrb[1].mxu0 }
 0x5a6   : > { %v2190_v8 = vld [vmem:[%s4375_s21] sm:$0xff] }
 0x5a8   : > { %v1699_v9 = vpop.f32.mrb[10].mxu1  ;;  %v1779_v10 = vpop.f32.mrb[2].mxu0 }
 0x5a9   : > { %1704 = vst.msk [vmem:[#allocation3 + $0x8] sm:$0xff] %vm1365_vm3, %v1699_v9  ;;  %v1861_v11 = vmul.f32 0.25, %v1779_v10  ;;  %v2961_v12 = vpop.f32.mrb[11].mxu1  ;;  %v2966_v13 = vpop.f32.mrb[3].mxu0  ;;  %v2191_v9 = vld [vmem:[%s4375_s21 + $0x8] sm:$0xff] }
 0x5aa   : > { %v3071_v10 = vpack.c.bf16 %v2191_v9, %v2190_v8  ;;  %v2193_v12 = vld [vmem:[%s4375_s21 + $0x18] sm:$0xff] }
 0x5ab   : > { %v1863_v15 = vadd.f32 %v4468_v39, %v1861_v11  ;;  %v2192_v11 = vld [vmem:[%s4375_s21 + $0x10] sm:$0xff]  ;;  %s4672_s21 = scalar_lea.vmem [#allocation17], %s4318_s0 }
 0x5ac   : > { %v1857_v16 = vpop.f32.mrb[12].mxu1  ;;  %v3075_v13 = vpack.c.bf16 %v2193_v12, %v2192_v11 }
 0x5ad   : > { %v1862_v17 = vmul.f32 0.25, %v1857_v16  ;;  %v2971_v18 = vpop.f32.mrb[13].mxu1  ;;  %v1865_v19 = vsel %vm1534_vm4, %v1863_v15, -inf  ;;  %v2300_v16 = vld [vmem:[%s4395_s7 + $0x8] sm:$0xff] }
 0x5ae   : > { %1866 = vmax.xlane.f32.xlu0 %v1865_v19 }
 0x5af   : > { %v1864_v20 = vadd.f32 %v4474_v44, %v1862_v17  ;;  %v2057_v44 = vld [vmem:[%s4359_s23 + $0x18] sm:$0xff] }
 0x5b1   : > { %v1868_v21 = vsel %vm1534_vm4, %v1864_v20, -inf }
 0x5b2   : > { %1869 = vmax.xlane.f32.xlu1 %v1868_v21 }
 0x5c3   : > { %1965 = vrot.lane.b32.xlu1 %v4457_v35, %s3710_s30 }
 0x63b   : > { %v1867_v22 = vpop.xlane.xlu0 %1866 }
 0x63c   : > { %v1871_v23 = vsub.f32 %v1863_v15, %v1867_v22  ;;  %v2299_v15 = vld [vmem:[%s4395_s7] sm:$0xff] }
 0x63d   : > { %v3079_v17 = vpack.c.bf16 %v2300_v16, %v2299_v15 }
 0x63e   : > { %v1873_v24 = vmul.f32 1.442695, %v1871_v23 }
 0x63f   : > { %v1870_v25 = vpop.xlane.xlu1 %1869 }
 0x640   : > { %3187 = vpow2.f32 %v1873_v24  ;;  %v1872_v26 = vsub.f32 %v1864_v20, %v1870_v25  ;;  %v2829_v25 = vld [vmem:[%s4672_s21] ss:$0 sm:$0xff] }
 0x642   : > { %v1875_v27 = vmul.f32 1.442695, %v1872_v26 }
 0x643   : > { %v1966_v28 = vpop.permute.xlu1 %1965 }
 0x644   : > { %3189 = vpow2.f32 %v1875_v27  ;;  %2978 = vmatpush3.msra.mxu1 %v1966_v28  ;;  %v2830_v27 = vld [vmem:[%s4673_s29] ss:$0 sm:$0xff] }
 0x645   : > { %3072 = vmatprep.subr.bf16.mxu1 %v3071_v10 }
 0x64a   : > { %v3188_v29 = vpop.eup %3187 }
 0x64b   : > { %v1877_v30 = vsel %vm1534_vm4, %v3188_v29, 0.0 }
 0x64c   : > { %1878 = vadd.xlane.f32.xlu0 %v1877_v30 }
 0x64e   : > { %v3190_v31 = vpop.eup %3189 }
 0x64f   : > { %v1880_v32 = vsel %vm1534_vm4, %v3190_v31, 0.0 }
 0x650   : > { %1881 = vadd.xlane.f32.xlu0 %v1880_v32 }
 0x666   : > { %1888 = vrot.lane.b32.xlu0 %v4459_v37, %s3710_s30  ;;  %v2056_v37 = vld [vmem:[%s4359_s23 + $0x10] sm:$0xff]  ;;  %s4671_s23 = scalar_lea.vmem [#allocation15], %s4318_s0 }
 0x667   : > { %v3067_v45 = vpack.c.bf16 %v2057_v44, %v2056_v37  ;;  %v2826_v54 = vld [vmem:[%s4671_s23] ss:$0 sm:$0xff]  ;;  %v2308_v44 = vld [vmem:[%s4395_s7 + $0x48] sm:$0xff] }
 0x668   : > { %v2307_v37 = vld [vmem:[%s4395_s7 + $0x40] sm:$0xff] }
 0x6d9   : > { %v1879_v33 = vpop.xlane.xlu0 %1878 }
 0x6da   : > { %3191 = vrcp.f32 %v1879_v33 }
 0x6dd   : > { %v1882_v34 = vpop.xlane.xlu0 %1881 }
 0x6de   : > { %3193 = vrcp.f32 %v1882_v34  ;;  %v2301_v34 = vld [vmem:[%s4395_s7 + $0x10] sm:$0xff] }
 0x6e1   : > { %v1889_v35 = vpop.permute.xlu0 %1888 }
 0x6e2   : > { %2973 = vmatpush3.msra.mxu0 %v1889_v35  ;;  %v2302_v35 = vld [vmem:[%s4395_s7 + $0x18] sm:$0xff] }
 0x6e3   : > { %3064 = vmatprep.subr.bf16.mxu0 %v3063_v43 }
 0x6e4   : > { %v3192_v36 = vpop.eup %3191 }
 0x6e5   : > { %v1885_v38 = vmul.f32 %v3192_v36, %v3188_v29  ;;  %v3083_v36 = vpack.c.bf16 %v2302_v35, %v2301_v34 }
 0x6e7   : > { %2975 = vmatmul.mubr.msk.f32.vlgmr.msra.gmra.mrb[4].mxu0 %vm1534_vm4, %v1885_v38  ;;  %v2303_v38 = vld [vmem:[%s4395_s7 + $0x20] sm:$0xff] }
 0x6e8   : > { %v3194_v39 = vpop.eup %3193  ;;  %3066 = vmatpush3.bf16.msra.mxu0 %v3063_v43  ;;  %v3091_v43 = vpack.c.bf16 %v2306_v42, %v2305_v41  ;;  %v2835_v41 = vld [vmem:[%s4676_s14] ss:$0 sm:$0xff] }
 0x6e9   : > { %v1886_v40 = vmul.f32 %v3194_v39, %v3190_v31  ;;  %3068 = vmatprep.subr.bf16.mxu0 %v3067_v45  ;;  %v2304_v39 = vld [vmem:[%s4395_s7 + $0x28] sm:$0xff] }
 0x6eb   : > { %2980 = vmatmul.mubr.msk.f32.vlgmr.msra.gmra.mrb[14].mxu1 %vm1534_vm4, %v1886_v40  ;;  %v3087_v40 = vpack.c.bf16 %v2304_v39, %v2303_v38 }
 0x6ec   : > { %3070 = vmatpush3.bf16.msra.mxu0 %v3067_v45  ;;  %3074 = vmatpush3.bf16.msra.mxu1 %v3071_v10  ;;  %v3095_v45 = vpack.c.bf16 %v2308_v44, %v2307_v37  ;;  %v2836_v37 = vld [vmem:[%s962_s19] ss:$0 sm:$0xff] }
 0x6ed   : > { %3076 = vmatprep.subr.bf16.mxu1 %v3075_v13  ;;  %3080 = vmatprep.subr.bf16.mxu0 %v3079_v17 }
 0x6f0   : > { %3078 = vmatpush3.bf16.msra.mxu1 %v3075_v13 }
 0x7ba   : > { %v1960_v46 = vpop.f32.mrb[4].mxu0 }
 0x7bb   : > { %2043 = vrot.lane.b32.xlu1 %v1960_v46, %s3711_s3  ;;  %v2976_v47 = vpop.f32.mrb[5].mxu0  ;;  %v2309_v46 = vld [vmem:[%s4395_s7 + $0x50] sm:$0xff] }
 0x7bc   : > { %v2310_v47 = vld [vmem:[%s4395_s7 + $0x58] sm:$0xff] }
 0x7be   : > { %v2037_v48 = vpop.f32.mrb[14].mxu1 }
 0x7bf   : > { %2045 = vrot.lane.b32.xlu1 %v2037_v48, %s3711_s3  ;;  %v2981_v49 = vpop.f32.mrb[15].mxu1  ;;  %v3099_v48 = vpack.c.bf16 %v2310_v47, %v2309_v46 }
 0x7c0   : > { %v2311_v49 = vld [vmem:[%s4395_s7 + $0x60] sm:$0xff] }
 0x82d   : > { %v2044_v50 = vpop.permute.xlu1 %2043 }
 0x82e   : > { %2050 = vst.msk [vmem:[#allocation3] sm:$0xff] %vm2049_vm5, %v2044_v50  ;;  %v2312_v50 = vld [vmem:[%s4395_s7 + $0x68] sm:$0xff] }
 0x831   : > { %v2046_v51 = vpop.permute.xlu1 %2045 }
 0x832   : > { %2051 = vst.msk [vmem:[#allocation3 + $0x8] sm:$0xff] %vm2049_vm5, %v2046_v51  ;;  %v3103_v51 = vpack.c.bf16 %v2312_v50, %v2311_v49 }
 0x835   : > { %v2052_v52 = vld [vmem:[#allocation3] sm:$0xff] }
 0x836   : > { %2990 = vmatprep.mubr.msk.f32.mxu0 %vm1113_vm1, %v2052_v52  ;;  %v2313_v52 = vld [vmem:[%s4395_s7 + $0x70] sm:$0xff] }
 0x839   : > { %v2053_v53 = vld [vmem:[#allocation3 + $0x8] sm:$0xff] }
 0x83a   : > { %2991 = vmatmul.mubr.msk.f32.vlgmr.msra.gmra.mrb[6].mxu0 %vm1113_vm1, %v2053_v53  ;;  %v2314_v53 = vld [vmem:[%s4395_s7 + $0x78] sm:$0xff]  ;;  %s4675_s7 = scalar_lea.vmem [#allocation23], %s4318_s0 }
 0x83b   : > { %3082 = vmatpush3.bf16.msra.mxu0 %v3079_v17  ;;  %v2834_v13 = vld [vmem:[%s4675_s7] ss:$0 sm:$0xff] }
 0x83c   : > { %3084 = vmatprep.subr.bf16.mxu0 %v3083_v36 }
 0x83f   : > { %3086 = vmatpush3.bf16.msra.mxu0 %v3083_v36 }
 0x840   : > { %3088 = vmatprep.subr.bf16.mxu0 %v3087_v40 }
 0x843   : > { %3090 = vmatpush3.bf16.msra.mxu0 %v3087_v40 }
 0x844   : > { %3092 = vmatprep.subr.bf16.mxu0 %v3091_v43 }
 0x847   : > { %3094 = vmatpush3.bf16.msra.mxu0 %v3091_v43 }
 0x848   : > { %3096 = vmatprep.subr.bf16.mxu0 %v3095_v45 }
 0x84b   : > { %3098 = vmatpush3.bf16.msra.mxu0 %v3095_v45 }
 0x84c   : > { %3100 = vmatprep.subr.bf16.mxu0 %v3099_v48 }
 0x84f   : > { %3102 = vmatpush3.bf16.msra.mxu0 %v3099_v48 }
 0x850   : > { %3104 = vmatprep.subr.bf16.mxu0 %v3103_v51 }
 0x853   : > { %3106 = vmatpush3.bf16.msra.mxu0 %v3103_v51 }
 0x90d   : > { %v2992_v55 = vpop.f32.mrb[6].mxu0 }
 0x90e   : > { %v2142_v56 = vadd.f32 %v2992_v55, %v2826_v54  ;;  %v2136_v57 = vpop.f32.mrb[7].mxu0  ;;  %v2831_v55 = vld [vmem:[%s4674_s27] ss:$0 sm:$0xff] }
 0x90f   : > { %v2137_v58 = vadd.f32 %v2826_v54, %v2136_v57  ;;  %v3107_v54 = vpack.c.bf16 %v2314_v53, %v2313_v52 }
 0x910   : > { %v2146_v59 = vadd.f32 %v2142_v56, %v4417_v14 }
 0x911   : > { %v2145_v60 = vadd.f32 %v2137_v58, %v4409_v7  ;;  %3108 = vmatprep.subr.bf16.mxu0 %v3107_v54 }
 0x912   : > { %v2150_v61 = vsel %vm1113_vm1, %v2146_v59, 0.0  ;;  %3110 = vmatpush3.bf16.msra.mxu0 %v3107_v54 }
 0x913   : > { %2151 = vadd.xlane.f32.xlu1 %v2150_v61  ;;  %v2147_v62 = vsel %vm1113_vm1, %v2145_v60, 0.0 }
 0x914   : > { %2148 = vadd.xlane.f32.xlu0 %v2147_v62 }
 0x9a0   : > { %v2152_v63 = vpop.xlane.xlu1 %2151 }
 0x9a1   : > { %v2155_v0 = vmul.f32 0.03125, %v2152_v63  ;;  %v2149_v1 = vpop.xlane.xlu0 %2148 }
 0x9a2   : > { %v2154_v2 = vmul.f32 0.03125, %v2149_v1 }
 0x9a3   : > { %v2157_v3 = vsub.f32 %v2146_v59, %v2155_v0 }
 0x9a4   : > { %v2156_v4 = vsub.f32 %v2145_v60, %v2154_v2 }
 0x9a5   : > { %v2159_v14 = vmul.f32 %v2157_v3, %v2157_v3 }
 0x9a6   : > { %v2158_v5 = vmul.f32 %v2156_v4, %v2156_v4 }
 0x9a7   : > { %v2163_v6 = vsel %vm1113_vm1, %v2159_v14, 0.0 }
 0x9a8   : > { %v2160_v7 = vsel %vm1113_vm1, %v2158_v5, 0.0 }
 0x9a9   : > { %2161 = vadd.xlane.f32.xlu0 %v2160_v7 }
 0x9ad   : > { %2164 = vadd.xlane.f32.xlu0 %v2163_v6 }
 0xa36   : > { %v2162_v18 = vpop.xlane.xlu0 %2161 }
 0xa37   : > { %v2166_v19 = vmul.f32 0.03125, %v2162_v18 }
 0xa39   : > { %v2168_v20 = vadd.f32 1e-12, %v2166_v19 }
 0xa3a   : > { %v2165_v21 = vpop.xlane.xlu0 %2164 }
 0xa3b   : > { %3195 = vrsqrt.f32 %v2168_v20  ;;  %v2167_v22 = vmul.f32 0.03125, %v2165_v21 }
 0xa3d   : > { %v2169_v23 = vadd.f32 1e-12, %v2167_v22 }
 0xa3f   : > { %3197 = vrsqrt.f32 %v2169_v23 }
 0xa45   : > { %v3196_v24 = vpop.eup %3195 }
 0xa46   : > { %v2172_v26 = vmul.f32 %v3196_v24, %v2156_v4 }
 0xa48   : > { %v2180_v28 = vmul.f32 %v2829_v25, %v2172_v26 }
 0xa49   : > { %v3198_v29 = vpop.eup %3197 }
 0xa4a   : > { %v2173_v30 = vmul.f32 %v3198_v29, %v2157_v3  ;;  %v4537_v31 = vadd.f32 %v2830_v27, %v2180_v28 }
 0xa4c   : > { %v2181_v32 = vmul.f32 %v2829_v25, %v2173_v30  ;;  %3001 = vmatprep.mubr.msk.f32.mxu1 %vm1113_vm1, %v4537_v31 }
 0xa4e   : > { %v4541_v33 = vadd.f32 %v2830_v27, %v2181_v32 }
 0xa50   : > { %3002 = vmatmul.mubr.msk.f32.vlgmr.msra.gmra.mrb[16].mxu1 %vm1113_vm1, %v4541_v33 }
 0xb23   : > { %v3003_v56 = vpop.f32.mrb[16].mxu1 }
 0xb24   : > { %v2278_v57 = vadd.f32 %v3003_v56, %v2831_v55  ;;  %v2272_v58 = vpop.f32.mrb[17].mxu1 }
 0xb25   : > { %v2273_v59 = vadd.f32 %v2831_v55, %v2272_v58 }
 0xb26   : > { %v2284_v60 = vmul.f32 0.044715, %v2278_v57  ;;  %v2282_v10 = vmul.f32 0.5, %v2278_v57 }
 0xb27   : > { %v2283_v61 = vmul.f32 0.044715, %v2273_v59  ;;  %v2281_v8 = vmul.f32 0.5, %v2273_v59 }
 0xb28   : > { %v2286_v62 = vmul.f32 %v2284_v60, %v2278_v57 }
 0xb29   : > { %v2285_v63 = vmul.f32 %v2283_v61, %v2273_v59 }
 0xb2a   : > { %v2288_v0 = vmul.f32 %v2286_v62, %v2278_v57 }
 0xb2b   : > { %v2287_v1 = vmul.f32 %v2285_v63, %v2273_v59 }
 0xb2c   : > { %v2290_v2 = vadd.f32 %v2288_v0, %v2278_v57 }
 0xb2d   : > { %v2289_v3 = vadd.f32 %v2287_v1, %v2273_v59 }
 0xb2e   : > { %v2292_v4 = vmul.f32 0.7978846, %v2290_v2 }
 0xb2f   : > { %v2291_v5 = vmul.f32 0.7978846, %v2289_v3 }
 0xb30   : > { %3199 = vtanh.f32 %v2292_v4 }
 0xb31   : > { %3201 = vtanh.f32 %v2291_v5 }
 0xb3a   : > { %v3200_v7 = vpop.eup %3199 }
 0xb3b   : > { %v3202_v14 = vpop.eup %3201  ;;  %v2296_v6 = vadd.f32 1.0, %v3200_v7 }
 0xb3c   : > { %v2295_v9 = vadd.f32 1.0, %v3202_v14 }
 0xb3d   : > { %v2298_v12 = vmul.f32 %v2296_v6, %v2282_v10 }
 0xb3e   : > { %v2297_v11 = vmul.f32 %v2295_v9, %v2281_v8 }
 0xb40   : > { %3036 = vmatprep.mubr.f32.mxu0 %v2297_v11 }
 0xb41   : > { %3037 = vmatmul.mubr.f32.vlgmr.msra.gmra.mrb[8].mxu0 %v2298_v12 }
 0xc14   : > { %v3038_v15 = vpop.f32.mrb[8].mxu0 }
 0xc15   : > { %v2393_v16 = vadd.f32 %v3038_v15, %v2834_v13  ;;  %v2387_v17 = vpop.f32.mrb[9].mxu0 }
 0xc16   : > { %v2388_v18 = vadd.f32 %v2834_v13, %v2387_v17 }
 0xc17   : > { %v2397_v19 = vadd.f32 %v2393_v16, %v4541_v33 }
 0xc18   : > { %v2396_v20 = vadd.f32 %v2388_v18, %v4537_v31 }
 0xc19   : > { %v2401_v21 = vsel %vm1113_vm1, %v2397_v19, 0.0 }
 0xc1a   : > { %2402 = vadd.xlane.f32.xlu1 %v2401_v21  ;;  %v2398_v22 = vsel %vm1113_vm1, %v2396_v20, 0.0 }
 0xc1b   : > { %2399 = vadd.xlane.f32.xlu0 %v2398_v22 }
 0xca7   : > { %v2403_v23 = vpop.xlane.xlu1 %2402 }
 0xca8   : > { %v2405_v24 = vmul.f32 0.03125, %v2403_v23  ;;  %v2400_v25 = vpop.xlane.xlu0 %2399 }
 0xca9   : > { %v2404_v26 = vmul.f32 0.03125, %v2400_v25 }
 0xcaa   : > { %v2407_v27 = vsub.f32 %v2397_v19, %v2405_v24 }
 0xcab   : > { %v2406_v28 = vsub.f32 %v2396_v20, %v2404_v26 }
 0xcac   : > { %v2409_v29 = vmul.f32 %v2407_v27, %v2407_v27 }
 0xcad   : > { %v2408_v30 = vmul.f32 %v2406_v28, %v2406_v28 }
 0xcae   : > { %v2413_v32 = vsel %vm1113_vm1, %v2409_v29, 0.0 }
 0xcaf   : > { %2414 = vadd.xlane.f32.xlu1 %v2413_v32  ;;  %v2410_v31 = vsel %vm1113_vm1, %v2408_v30, 0.0 }
 0xcb0   : > { %2411 = vadd.xlane.f32.xlu0 %v2410_v31 }
 0xd3c   : > { %v2415_v33 = vpop.xlane.xlu1 %2414 }
 0xd3d   : > { %v2417_v34 = vmul.f32 0.03125, %v2415_v33  ;;  %v2412_v35 = vpop.xlane.xlu0 %2411 }
 0xd3e   : > { %v2416_v36 = vmul.f32 0.03125, %v2412_v35 }
 0xd3f   : > { %v2419_v38 = vadd.f32 1e-12, %v2417_v34 }
 0xd40   : > { %v2418_v39 = vadd.f32 1e-12, %v2416_v36 }
 0xd41   : > { %3203 = vrsqrt.f32 %v2419_v38 }
 0xd42   : > { %3205 = vrsqrt.f32 %v2418_v39 }
 0xd4b   : > { %v3204_v40 = vpop.eup %3203 }
 0xd4c   : > { %v3206_v42 = vpop.eup %3205  ;;  %v2423_v43 = vmul.f32 %v3204_v40, %v2407_v27 }
 0xd4d   : > { %v2422_v44 = vmul.f32 %v3206_v42, %v2406_v28 }
 0xd4e   : > { %v2431_v45 = vmul.f32 %v2835_v41, %v2423_v43 }
 0xd4f   : > { %v2430_v46 = vmul.f32 %v2835_v41, %v2422_v44 }
 0xd50   : > { %v2439_v47 = vadd.f32 %v2836_v37, %v2431_v45 }
 0xd51   : > { %v2438_v48 = vadd.f32 %v2836_v37, %v2430_v46 }
 0xd52   : > { %2441 = vst.msk [vmem:[#allocation2 + $0x8] sm:$0xff] %vm1113_vm1, %v2439_v47  ;;  %2443 = vst.msk [vmem:[%s4677_s24 + $0x8] sm:$0xff] %vm1113_vm1, %v2439_v47 }
 0xd53   : > { %2440 = vst.msk [vmem:[#allocation2] sm:$0xff] %vm1113_vm1, %v2438_v48  ;;  %2442 = vst.msk [vmem:[%s4677_s24] sm:$0xff] %vm1113_vm1, %v2438_v48 }
 0xd54 PF: > { %s4678_s30 = sld [smem:[#allocation37_spill]]  ;;  %s4679_s0 = sld [smem:[#allocation35_spill]] }
 0xd55   : > { %s4680_s29 = sld [smem:[#allocation38_spill]]  ;;  %s4681_s27 = smov %s3681_s28 }
 0xd5a   : > { %p49_p7 = scmp.ge.s32.totalorder %s4678_s30, 4   ;;  %s4682_s28 = smov %s4679_s0 }
 0xd5c   :  { %51 = sbr.rel (!%p49_p7) target bundleno = 27 (0x1b), region = 303 }
 0xd63   :  { %2455 = vsyncpa [#allocation5], 1 }
 0xd64   :  { %2457 = vsyncpa [#allocation5 + $0x1], 1 }
 0xd65   :  { %2458 = vsyncpa [#allocation7], 1 }
 0xd66   :  { %2460 = vsyncpa [#allocation7 + $0x1], 1 }
 0xd67   :  { %2461 = vsyncpa [#allocation10], 1 }
 0xd68   :  { %2463 = vsyncpa [#allocation10 + $0x1], 1 }
 0xd69   :  { %2464 = vsyncpa [#allocation13], 1 }
 0xd6a   :  { %2466 = vsyncpa [#allocation13 + $0x1], 1 }
 0xd6b   :  { %2467 = vsyncpa [#allocation16], 1 }
 0xd6c   :  { %2469 = vsyncpa [#allocation16 + $0x1], 1 }
 0xd6d   :  { %2470 = vsyncpa [#allocation19], 1 }
 0xd6e   :  { %2472 = vsyncpa [#allocation19 + $0x1], 1 }
 0xd6f   :  { %2473 = vsyncpa [#allocation22], 1 }
 0xd70   :  { %2475 = vsyncpa [#allocation22 + $0x1], 1 }
 0xd71   :  { %2476 = vsyncpa [#allocation25], 1 }
 0xd72   :  { %2478 = vsyncpa [#allocation25 + $0x1], 1 }

// kernel: ere_forward.7
= control target key start
LH: loop header
LB: loop body
LE: loop exit
PB: predicated region body
PF: predicated region fallthrough
CT: control target
= control target key end

     0   :  { %vm48_vm0 = vcmask 261120   ;;  %v456_v7 = vmov 0   ;;  %s584_s0 = inlined_call_operand.vmem [shape: f32[16,32], index: 0, kind: input, shape index: {}]   ;;  %s585_s1 = inlined_call_operand.vmem [shape: f32[32,2], index: 1, kind: input, shape index: {}]   ;;  %s586_s2 = inlined_call_operand.vmem [shape: f32[1,2], index: 2, kind: input, shape index: {}]   ;;  %s587_s3 = inlined_call_operand.vmem [shape: f32[16,2], index: 3, kind: input, shape index: {}]   ;;  %s588_s4 = inlined_call_operand.vmem [shape: f32[16,32], index: 4, kind: input, shape index: {}]   ;;  %s589_s5 = inlined_call_operand.vmem [shape: f32[32,8], index: 5, kind: input, shape index: {}]   ;;  %s590_s6 = inlined_call_operand.vmem [shape: f32[1,8], index: 6, kind: input, shape index: {}]   ;;  %s591_s7 = inlined_call_operand.vmem [shape: f32[16,8], index: 7, kind: input, shape index: {}]   ;;  %s592_s8 = inlined_call_operand.vmem [shape: f32[16,1], index: 8, kind: input, shape index: {}]   ;;  %s593_s9 = inlined_call_operand.hbm [shape: f32[1,1], index: 9, kind: output, shape index: {}]  }
   0x1   :  { %v37_v0 = vld [vmem:[%s585_s1] sm:$0xff]  ;;  %v38_v1 = vld [vmem:[%s585_s1 + $0x8] sm:$0xff]  ;;  %v39_v5 = vld [vmem:[%s585_s1 + $0x10] sm:$0xff]  ;;  %413 = vset.pattern.permute.xlu0 %v456_v7 }
   0x2   :  { %v182_v2 = vld [vmem:[%s589_s5] sm:$0xff]  ;;  %v389_v3 = vpack.c.bf16 %v38_v1, %v37_v0  ;;  %v183_v4 = vld [vmem:[%s589_s5 + $0x8] sm:$0xff]  ;;  %v40_v6 = vld [vmem:[%s585_s1 + $0x18] sm:$0xff] }
   0x3   :  { %v397_v8 = vpack.c.bf16 %v183_v4, %v182_v2  ;;  %v393_v9 = vpack.c.bf16 %v40_v6, %v39_v5  ;;  %v184_v10 = vld [vmem:[%s589_s5 + $0x10] sm:$0xff]  ;;  %v185_v11 = vld [vmem:[%s589_s5 + $0x18] sm:$0xff]  ;;  %v35_v12 = vld [vmem:[%s584_s0] sm:$0xff] }
   0x4   :  { %390 = vmatprep.subr.bf16.mxu0 %v389_v3  ;;  %v401_v13 = vpack.c.bf16 %v185_v11, %v184_v10  ;;  %375 = vmatprep.mubr.msk.f32.mxu0 %vm48_vm0, %v35_v12  ;;  %v180_v14 = vld [vmem:[%s588_s4] sm:$0xff] }
   0x5   :  { %398 = vmatprep.subr.bf16.mxu1 %v397_v8  ;;  %392 = vmatpush3.bf16.msra.mxu0 %v389_v3  ;;  %v33_v15 = vld [vmem:[%s592_s8] sm:$0xff] }
   0x6   :  { %14 = vsyncpa [#allocation3], 0  ;;  %400 = vmatpush3.bf16.msra.mxu1 %v397_v8  ;;  %394 = vmatprep.subr.bf16.mxu0 %v393_v9  ;;  %v36_v16 = vld [vmem:[%s584_s0 + $0x8] sm:$0xff]  ;;  %vm314_vm1 = vcmask 7168   ;;  %v349_v22 = vld [vmem:[%s586_s2] ss:$0 sm:$0xff] }
   0x7   :  { %402 = vmatprep.subr.bf16.mxu1 %v401_v13  ;;  %386 = vmatprep.mubr.msk.f32.mxu1 %vm48_vm0, %v180_v14  ;;  %v34_v17 = vld [vmem:[%s592_s8 + $0x8] sm:$0xff]  ;;  %v315_v19 = vsel %vm314_vm1, %v33_v15, 0.0  ;;  %v352_v23 = vld [vmem:[%s590_s6] ss:$0 sm:$0xff]  ;;  %vm166_vm2 = vcmask 15360   ;;  %vm300_vm3 = vcmask 64512  }
   0x8   :  { %156 = vperm.xlu0 %413, %v33_v15   ;;  %v181_v18 = vld [vmem:[%s588_s4 + $0x8] sm:$0xff]  ;;  %v316_v20 = vsel %vm314_vm1, %v34_v17, 0.0  ;;  %v130_v54 = vld [vmem:[%s587_s3] sm:$0xff]  ;;  %s457_s22 = smov [#allocation2]   ;;  %vm333_vm4 = vcmask 0  }
   0x9   :  { %396 = vmatpush3.bf16.msra.mxu0 %v393_v9  ;;  %v317_v21 = vadd.f32 %v316_v20, %v315_v19  ;;  %v131_v52 = vld [vmem:[%s587_s3 + $0x8] sm:$0xff]  ;;  %v274_v57 = vld [vmem:[%s591_s7] sm:$0xff]  ;;  %s341_s23 = sshll.u32 %s457_s22, 4  ;;  %s342_s23 = int_to_ptr.vmem [resolvable:$true] %s341_s23 }
   0xa   :  { %404 = vmatpush3.bf16.msra.mxu1 %v401_v13  ;;  %v275_v53 = vld [vmem:[%s591_s7 + $0x8] sm:$0xff]  ;;  %s432_s24 = scalar_lea.vmem %s342_s23, 16  ;;  %s436_s25 = scalar_lea.vmem %s342_s23, 32 }
   0xb   :  { %p433_p0 = scmp.ne.s32.totalorder %s342_s23, %s432_s24  ;;  %p437_p1 = scmp.lt.s32.totalorder %s342_s23, %s342_s23 }
   0xc   :  { %376 = vmatmul.mubr.msk.f32.vlgmr.msra.gmra.mrb[0].mxu0 %vm48_vm0, %v36_v16  ;;  %161 = vperm.xlu0 %413, %v34_v17   ;;  %p438_p2 = scmp.lt.s32.totalorder %s436_s25, %s432_s24 }
   0xd   :  { %387 = vmatmul.mubr.msk.f32.vlgmr.msra.gmra.mrb[0].mxu1 %vm48_vm0, %v181_v18 }
   0xe   :  { %p439_p3 = por %p438_p2, %p437_p1 }
  0x10   :  { %p440_p4 = pnand %p439_p3, %p433_p0 }
  0x2b   :  { %318 = vadd.xlane.f32.xlu0 %v317_v21 }
  0x87   :  { %v157_v60 = vpop.permute.xlu0 %156 }
  0x8b   :  { %v162_v15 = vpop.permute.xlu0 %161 }
  0xdf   :  { %v377_v24 = vpop.f32.mrb[0].mxu0 }
  0xe0   :  { %v127_v25 = vadd.f32 %v377_v24, %v349_v22  ;;  %v388_v26 = vpop.f32.mrb[0].mxu1  ;;  %v121_v27 = vpop.f32.mrb[1].mxu0 }
  0xe1   :  { %v271_v28 = vadd.f32 %v388_v26, %v352_v23  ;;  %v122_v29 = vadd.f32 %v349_v22, %v121_v27  ;;  %v265_v30 = vpop.f32.mrb[1].mxu1 }
  0xe2   :  { %v139_v31 = vand.u32 2147483647, %v127_v25  ;;  %v266_v32 = vadd.f32 %v352_v23, %v265_v30  ;;  %v133_v55 = vmax.f32 %v127_v25, 0.0  ;;  %v135_v56 = vmul.f32 %v131_v52, %v127_v25 }
  0xe3   :  { %v283_v33 = vand.u32 2147483647, %v271_v28  ;;  %v138_v35 = vand.u32 2147483647, %v122_v29  ;;  %v277_v58 = vmax.f32 %v271_v28, 0.0  ;;  %v279_v59 = vmul.f32 %v275_v53, %v271_v28  ;;  %v319_v28 = vpop.xlane.xlu0 %318 }
  0xe4   :  { %v141_v34 = vsub.f32 0.0, %v139_v31  ;;  %v282_v37 = vand.u32 2147483647, %v266_v32  ;;  %v132_v61 = vmax.f32 %v122_v29, 0.0  ;;  %v134_v62 = vmul.f32 %v130_v54, %v122_v29 }
  0xe5   :  { %v285_v36 = vsub.f32 0.0, %v283_v33  ;;  %v140_v39 = vsub.f32 0.0, %v138_v35  ;;  %v276_v0 = vmax.f32 %v266_v32, 0.0  ;;  %v278_v1 = vmul.f32 %v274_v57, %v266_v32 }
  0xe6   :  { %v144_v38 = vmul.f32 1.442695, %v141_v34  ;;  %v284_v41 = vsub.f32 0.0, %v282_v37  ;;  %v137_v3 = vsub.f32 %v133_v55, %v135_v56  ;;  %v281_v6 = vsub.f32 %v277_v58, %v279_v59 }
  0xe7   :  { %v288_v40 = vmul.f32 1.442695, %v285_v36  ;;  %v142_v42 = vmul.f32 1.442695, %v140_v39  ;;  %v136_v9 = vsub.f32 %v132_v61, %v134_v62  ;;  %v280_v12 = vsub.f32 %v276_v0, %v278_v1 }
  0xe8   :  { %414 = vpow2.f32 %v144_v38  ;;  %v286_v43 = vmul.f32 1.442695, %v284_v41  ;;  %v320_v29 = vrot.slane %v319_v28, 4 }
  0xe9   :  { %416 = vpow2.f32 %v288_v40 }
  0xea   :  { %418 = vpow2.f32 %v142_v42  ;;  %v321_v30 = vadd.f32 %v320_v29, %v319_v28 }
  0xeb   :  { %420 = vpow2.f32 %v286_v43 }
  0xec   :  { %v322_v34 = vrot.slane %v321_v30, 2 }
  0xee   :  { %v323_v40 = vadd.f32 %v322_v34, %v321_v30 }
  0xf2   :  { %v415_v44 = vpop.eup %414 }
  0xf3   :  { %v417_v45 = vpop.eup %416  ;;  %v147_v46 = vadd.f32 1.0, %v415_v44 }
  0xf4   :  { %v419_v47 = vpop.eup %418  ;;  %v291_v48 = vadd.f32 1.0, %v417_v45  ;;  %v324_v45 = vrot.slane %v323_v40, 1 }
  0xf5   :  { %v421_v49 = vpop.eup %420  ;;  %v146_v50 = vadd.f32 1.0, %v419_v47  ;;  %422 = vlog2.f32 %v147_v46 }
  0xf6   :  { %v290_v51 = vadd.f32 1.0, %v421_v49  ;;  %424 = vlog2.f32 %v291_v48  ;;  %v325_v48 = vadd.f32 %v324_v45, %v323_v40 }
  0xf7   :  { %426 = vlog2.f32 %v146_v50 }
  0xf8   :  { %428 = vlog2.f32 %v290_v51 }
  0xff   :  { %v423_v63 = vpop.eup %422 }
 0x100   :  { %v425_v2 = vpop.eup %424  ;;  %v151_v4 = vmul.f32 0.6931472, %v423_v63 }
 0x101   :  { %v427_v5 = vpop.eup %426  ;;  %v295_v7 = vmul.f32 0.6931472, %v425_v2 }
 0x102   :  { %v429_v8 = vpop.eup %428  ;;  %v149_v10 = vmul.f32 0.6931472, %v427_v5  ;;  %v153_v11 = vadd.f32 %v151_v4, %v137_v3 }
 0x103   :  { %v293_v13 = vmul.f32 0.6931472, %v429_v8  ;;  %v297_v14 = vadd.f32 %v295_v7, %v281_v6 }
 0x104   :  { %v152_v16 = vadd.f32 %v149_v10, %v136_v9  ;;  %v165_v17 = vmul.f32 %v162_v15, %v153_v11 }
 0x105   :  { %v296_v18 = vadd.f32 %v293_v13, %v280_v12  ;;  %v299_v19 = vmul.f32 %v297_v14, %v162_v15 }
 0x106   :  { %v164_v20 = vmul.f32 %v157_v60, %v152_v16  ;;  %v168_v21 = vsel %vm166_vm2, %v165_v17, 0.0 }
 0x107   :  { %v298_v22 = vmul.f32 %v296_v18, %v157_v60  ;;  %v302_v23 = vsel %vm300_vm3, %v299_v19, 0.0 }
 0x108   :  { %v167_v24 = vsel %vm166_vm2, %v164_v20, 0.0 }
 0x109   :  { %v169_v25 = vadd.f32 %v168_v21, %v167_v24  ;;  %v301_v26 = vsel %vm300_vm3, %v298_v22, 0.0 }
 0x10a   :  { %v303_v27 = vadd.f32 %v302_v23, %v301_v26 }
 0x10b   :  { %170 = vadd.xlane.f32.xlu1 %v169_v25 }
 0x10f   :  { %304 = vadd.xlane.f32.xlu1 %v303_v27 }
 0x198   :  { %v171_v31 = vpop.xlane.xlu1 %170 }
 0x199   :  { %v172_v32 = vrot.slane %v171_v31, 4 }
 0x19b   :  { %v173_v33 = vadd.f32 %v172_v32, %v171_v31 }
 0x19c   :  { %v305_v35 = vpop.xlane.xlu1 %304 }
 0x19d   :  { %v174_v36 = vrot.slane %v173_v33, 2  ;;  %v306_v37 = vrot.slane %v305_v35, 4 }
 0x19f   :  { %v307_v38 = vadd.f32 %v306_v37, %v305_v35  ;;  %v175_v39 = vadd.f32 %v174_v36, %v173_v33 }
 0x1a1   :  { %v308_v41 = vrot.slane %v307_v38, 2  ;;  %v176_v42 = vrot.slane %v175_v39, 1 }
 0x1a3   :  { %v309_v43 = vadd.f32 %v308_v41, %v307_v38  ;;  %v177_v44 = vadd.f32 %v176_v42, %v175_v39 }
 0x1a5   :  { %405 = vpush %v177_v44  ;;  %v310_v46 = vrot.slane %v309_v43, 1 }
 0x1a7   :  { %v311_v47 = vadd.f32 %v310_v46, %v309_v43 }
 0x1a9   :  { %407 = vpush %v311_v47 }
 0x1aa   :  { %409 = vpush %v325_v48 }
 0x1d6   :  { %s406_s3 = spop %405 }
 0x1d7   :  { %v179_v52 = vstv %s406_s3 }
 0x1da   :  { %s408_s7 = spop %407 }
 0x1db   :  { %s410_s21 = spop %409  ;;  %v313_v50 = vstv %s408_s7 }
 0x1dc   :  { %v327_v49 = vstv %s410_s21  ;;  %v329_v51 = vmul.f32 0.25, %v313_v50 }
 0x1dd   :  { %430 = vrcp.f32 %v327_v49 }
 0x1de   :  { %v330_v53 = vadd.f32 %v329_v51, %v179_v52 }
 0x1e7   :  { %v431_v54 = vpop.eup %430 }
 0x1e8   :  { %v332_v55 = vmul.f32 %v431_v54, %v330_v53 }
 0x1ea   :  { %334 = vst.msk [vmem:[#allocation2] sm:$0x1] %vm333_vm4, %v332_v55 }
 0x1eb   :  { %443 = shalt.err (!%p440_p4)
}
 0x1ec   :  { %s444_s27 = scalar_lea.hbm %s593_s9, 16 }
 0x1ed   :  { %p445_p5 = scmp.ne.s32.totalorder %s593_s9, %s444_s27  ;;  %p448_p6 = scmp.lt.u32.totalorder %s444_s27, %s593_s9 }
 0x1ef   :  { %p450_p7 = pnand %p448_p6, %p445_p5 }
 0x1f1   :  { %453 = shalt.err (!%p450_p7)
}
 0x1f2   :  { %344 = dma.vmem_to_hbm [thread:$0]  %s342_s23, 16, %s593_s9, [#allocation3]  }
 0x1f3   :  { %454 = dma.done.wait [#allocation3], 16  }
 0x1f4   :  { %455 = vsyncadd [#allocation3], 4294967280 }
 0x1f5   :  { %348 = vsyncpa [#allocation3], 1 }

// kernel: ere_forward.6
= control target key start
LH: loop header
LB: loop body
LE: loop exit
PB: predicated region body
PF: predicated region fallthrough
CT: control target
= control target key end

     0   :  { %s4802_s27 = smov 0   ;;  %s5578_s0 = inlined_call_operand.vmem [shape: f32[16,32], index: 0, kind: input, shape index: {}]   ;;  %s5579_s1 = inlined_call_operand.vmem [shape: f32[2,1,8], index: 1, kind: input, shape index: {}]   ;;  %s5580_s2 = inlined_call_operand.vmem [shape: f32[2,32,32], index: 2, kind: input, shape index: {}]   ;;  %s5581_s3 = inlined_call_operand.vmem [shape: f32[2,1,32], index: 3, kind: input, shape index: {}]   ;;  %s5582_s4 = inlined_call_operand.vmem [shape: f32[2,32,32], index: 4, kind: input, shape index: {}]   ;;  %s5583_s5 = inlined_call_operand.vmem [shape: f32[2,1,32], index: 5, kind: input, shape index: {}]   ;;  %s5584_s6 = inlined_call_operand.vmem [shape: f32[2,32,32], index: 6, kind: input, shape index: {}]   ;;  %s5585_s7 = inlined_call_operand.vmem [shape: f32[2,1,32], index: 7, kind: input, shape index: {}]   ;;  %s5586_s8 = inlined_call_operand.vmem [shape: f32[2,32,32], index: 8, kind: input, shape index: {}]   ;;  %s5587_s9 = inlined_call_operand.vmem [shape: f32[2,1,32], index: 9, kind: input, shape index: {}]   ;;  %s5588_s10 = inlined_call_operand.vmem [shape: f32[2,1,32], index: 10, kind: input, shape index: {}]   ;;  %s5589_s11 = inlined_call_operand.vmem [shape: f32[2,1,32], index: 11, kind: input, shape index: {}]   ;;  %s5590_s12 = inlined_call_operand.vmem [shape: f32[2,32,2048], index: 12, kind: input, shape index: {}]   ;;  %s5591_s13 = inlined_call_operand.vmem [shape: f32[2,1,2048], index: 13, kind: input, shape index: {}]   ;;  %s5592_s14 = inlined_call_operand.vmem [shape: f32[2,2048,32], index: 14, kind: input, shape index: {}]   ;;  %s5593_s15 = inlined_call_operand.vmem [shape: f32[2,1,32], index: 15, kind: input, shape index: {}]   ;;  %s5594_s16 = inlined_call_operand.vmem [shape: f32[2,1,32], index: 16, kind: input, shape index: {}]   ;;  %s5595_s17 = inlined_call_operand.vmem [shape: f32[2,1,32], index: 17, kind: input, shape index: {}]   ;;  %s5596_s18 = inlined_call_operand.vmem [shape: f32[16,32], index: 18, kind: output, shape index: {}]  }
   0x1   :  { %5602 = sst [smem:[#allocation6_spill]] %s5578_s0 }
   0x2   :  { %5603 = sst [smem:[#allocation7_spill]] %s5579_s1 }
   0x3   :  { %5604 = sst [smem:[#allocation8_spill]] %s5580_s2 }
   0x4   :  { %5605 = sst [smem:[#allocation9_spill]] %s5581_s3 }
   0x5   :  { %5606 = sst [smem:[#allocation10_spill]] %s5582_s4 }
   0x6   :  { %5607 = sst [smem:[#allocation11_spill]] %s5583_s5 }
   0x7   :  { %5608 = sst [smem:[#allocation12_spill]] %s5584_s6 }
   0x8   :  { %5609 = sst [smem:[#allocation13_spill]] %s5586_s8 }
   0x9   :  { %5610 = sst [smem:[#allocation14_spill]] %s5590_s12 }
   0xa   :  { %5611 = sst [smem:[#allocation15_spill]] %s5591_s13 }
   0xb   :  { %5612 = sst [smem:[#allocation16_spill]] %s5595_s17 }
   0xc   :  { %5613 = sst [smem:[#allocation17_spill]] %s5596_s18 }
   0xd LB: > { %5614 = sst [smem:[#allocation4_spill]] %s4701_s27  ;;  %s3806_s28 = sadd.s32 4294967295, %s4701_s27   ;;  %s4701_s27 = sphi %s4802_s27, %s28_s27  }
   0xe   : > { %p3809_p0 = scmp.ge.s32.totalorder %s4701_s27, 1  ;;  %p638_p1 = scmp.lt.s32.totalorder %s4701_s27, 3 }
  0x10   : > { %p639_p2 = pnand %p3809_p0, %p638_p1 }
  0x12   : > { %642 = sbr.rel (%p639_p2) target bundleno = 3066 (0xbfa), region = 92 }
  0x19   : > { %p743_p3 = scmp.lt.s32.totalorder %s3806_s28, 1  ;;  %s5616_s22 = sld [smem:[#allocation8_spill]] }
  0x1a   : > { %s5617_s4 = sld [smem:[#allocation10_spill]]  ;;  %s5619_s6 = sld [smem:[#allocation12_spill]] }
  0x1b   : > { %s4810_s29 = scalar_select %p743_p3, %s3806_s28, 1 }
  0x1c   : > { %s5621_s8 = sld [smem:[#allocation13_spill]]  ;;  %s5622_s12 = sld [smem:[#allocation14_spill]] }
  0x1d   : > { %s3873_s30 = sshll.u32 %s4810_s29, 5  ;;  %s3820_s3 = sshll.u32 %s4810_s29, 4 }
  0x1e   : > { %s5623_s13 = sld [smem:[#allocation15_spill]]  ;;  %s3878_s24 = sshll.u32 %s4810_s29, 11 }
  0x1f   : > { %s4820_s2 = scalar_lea.vmem %s5616_s22, %s3873_s30  ;;  %s4873_s26 = scalar_lea.vmem %s5592_s14, %s3878_s24 }
  0x20   : > { %s4825_s25 = scalar_lea.vmem %s5617_s4, %s3873_s30  ;;  %s4834_s19 = scalar_lea.vmem %s5619_s6, %s3873_s30 }
  0x21   : > { %5620 = sst [smem:[#allocation5_spill]] %s4834_s19  ;;  %s3877_s19 = sshll.u32 %s4810_s29, 9 }
  0x22   : > { %s4843_s23 = scalar_lea.vmem %s5621_s8, %s3873_s30  ;;  %s4861_s22 = scalar_lea.vmem %s5622_s12, %s3877_s19 }
  0x23   : > { %s797_s6 = scalar_lea.vmem %s5593_s15, %s4810_s29  ;;  %s800_s19 = scalar_lea.vmem %s5594_s16, %s4810_s29 }
  0x24   : > { %s4867_s4 = scalar_lea.vmem %s5623_s13, %s3820_s3  ;;  %s5624_s12 = sld [smem:[#allocation16_spill]] }
  0x25   : > { %p3823_p4 = scmp.ne.s32.totalorder %s3806_s28, 0 }
  0x26   : > { %s5625_s13 = sld [smem:[#allocation6_spill]] (!%p3823_p4)  ;;  %vm810_vm0 = vcmask (!%p3823_p4), 261120  }
  0x27   : > { %807 = sbr.rel (%p3823_p4) target bundleno = 46 (0x2e), region = 96 }
  0x2a   : > { %s803_s30 = scalar_lea.vmem %s5624_s12, %s4810_s29 }
  0x2c   : > { %v808_v0 = vld [vmem:[%s5625_s13] sm:$0xff] (!%p3823_p4)  ;;  %v809_v1 = vld [vmem:[%s5625_s13 + $0x8] sm:$0xff] (!%p3823_p4) }
  0x2d   : > { %811 = vst.msk [vmem:[#allocation2] sm:$0xff] (!%p3823_p4), %vm810_vm0, %v808_v0  ;;  %812 = vst.msk [vmem:[#allocation2 + $0x8] sm:$0xff] (!%p3823_p4), %vm810_vm0, %v809_v1 }
  0x2e PF: > { %v920_v2 = vld [vmem:[%s4825_s25] sm:$0xff]  ;;  %v921_v3 = vld [vmem:[%s4825_s25 + $0x8] sm:$0xff]  ;;  %vm838_vm1 = vcmask 261120   ;;  %v922_v7 = vld [vmem:[%s4825_s25 + $0x10] sm:$0xff]  ;;  %v4703_v16 = vmov 0.0   ;;  %vm4704_vm2 = vmmov 0   ;;  %s5635_s3 = scalar_lea.vmem %s5589_s11, %s4810_s29 }
  0x2f   : > { %v828_v4 = vld [vmem:[%s4820_s2] sm:$0xff]  ;;  %v4315_v5 = vpack.c.bf16 %v921_v3, %v920_v2  ;;  %v829_v6 = vld [vmem:[%s4820_s2 + $0x8] sm:$0xff]  ;;  %v923_v8 = vld [vmem:[%s4825_s25 + $0x18] sm:$0xff]  ;;  %s5626_s12 = sld [smem:[#allocation11_spill]]  ;;  %s5628_s18 = sld [smem:[#allocation9_spill]]  ;;  %vm1090_vm3 = vcmask 130048  }
  0x30   : > { %v4307_v9 = vpack.c.bf16 %v829_v6, %v828_v4  ;;  %v4319_v10 = vpack.c.bf16 %v923_v8, %v922_v7  ;;  %v830_v11 = vld [vmem:[%s4820_s2 + $0x10] sm:$0xff]  ;;  %v831_v12 = vld [vmem:[%s4820_s2 + $0x18] sm:$0xff]  ;;  %s5630_s0 = sld [smem:[#allocation5_spill]]  ;;  %s4705_s20 = smov 112   ;;  %vm1259_vm4 = vcmask 64512   ;;  %vm1774_vm5 = vcmask 261248  }
  0x31   : > { %4316 = vmatprep.subr.bf16.mxu1 %v4315_v5  ;;  %v4311_v14 = vpack.c.bf16 %v831_v12, %v830_v11  ;;  %s5631_s1 = sld [smem:[#allocation7_spill]]  ;;  %s5633_s25 = scalar_lea.vmem %s5587_s9, %s4810_s29 }
  0x32   : > { %4318 = vmatpush3.bf16.msra.mxu1 %v4315_v5  ;;  %4308 = vmatprep.subr.bf16.mxu0 %v4307_v9 }
  0x33   : > { %4310 = vmatpush3.bf16.msra.mxu0 %v4307_v9  ;;  %4320 = vmatprep.subr.bf16.mxu1 %v4319_v10 }
  0x34   : > { %v4901_v13 = vld [vmem:[#allocation2] sm:$0xff]  ;;  %4312 = vmatprep.subr.bf16.mxu0 %v4311_v14  ;;  %v4907_v15 = vld [vmem:[#allocation2 + $0x8] sm:$0xff] }
  0x35   : > { %4242 = vmatprep.mubr.msk.f32.mxu1 %vm838_vm1, %v4901_v13  ;;  %4231 = vmatprep.mubr.msk.f32.mxu0 %vm838_vm1, %v4901_v13  ;;  %s5627_s28 = scalar_lea.vmem %s5626_s12, %s4810_s29  ;;  %s5629_s17 = scalar_lea.vmem %s5628_s18, %s4810_s29 }
  0x36   : > { %4322 = vmatpush3.bf16.msra.mxu1 %v4319_v10  ;;  %v3827_v17 = vld [vmem:[%s5627_s28] ss:$0 sm:$0xff]  ;;  %v1006_v28 = vld [vmem:[%s5630_s0 + $0x8] sm:$0xff]  ;;  %v1007_v29 = vld [vmem:[%s5630_s0 + $0x10] sm:$0xff]  ;;  %s5632_s12 = scalar_lea.vmem %s5585_s7, %s4810_s29  ;;  %s4706_s28 = smov 16  }
  0x37   : > { %4314 = vmatpush3.bf16.msra.mxu0 %v4311_v14  ;;  %4256 = vmatprep.subr.mxu1 %v4703_v16  ;;  %v3824_v19 = vld [vmem:[%s5629_s17] ss:$0 sm:$0xff]  ;;  %v1008_v31 = vld [vmem:[%s5630_s0 + $0x18] sm:$0xff]  ;;  %v4958_v39 = vld [vmem:[%s5631_s1 + $0x1] ss:$0 sm:$0xff] }
  0x38   : > { %v1005_v27 = vld [vmem:[%s5630_s0] sm:$0xff]  ;;  %v4327_v32 = vpack.c.bf16 %v1008_v31, %v1007_v29  ;;  %s5634_s0 = scalar_lea.vmem %s5588_s10, %s4810_s29 }
  0x39   : > { %4243 = vmatmul.mubr.msk.f32.vlgmr.msra.gmra.mrb[0].mxu1 %vm838_vm1, %v4907_v15  ;;  %v4323_v30 = vpack.c.bf16 %v1006_v28, %v1005_v27  ;;  %v4952_v34 = vld [vmem:[%s5631_s1] ss:$0 sm:$0xff] }
  0x3a   : > { %4232 = vmatmul.mubr.msk.f32.vlgmr.msra.gmra.mrb[0].mxu0 %vm838_vm1, %v4907_v15  ;;  %4258 = vmatprep.mubr.msk.f32.mxu1 %vm4704_vm2, %v4703_v16  ;;  %v3830_v59 = vld [vmem:[%s5632_s12] ss:$0 sm:$0xff] }
  0x3b   : > { %4253 = vmatprep.mubr.msk.f32.mxu0 %vm838_vm1, %v4901_v13  ;;  %4324 = vmatprep.subr.bf16.mxu0 %v4323_v30 }
  0x3c   : > { %4326 = vmatpush3.bf16.msra.mxu0 %v4323_v30 }
  0x3d   : > { %4328 = vmatprep.subr.bf16.mxu0 %v4327_v32 }
  0x40   : > { %4330 = vmatpush3.bf16.msra.mxu0 %v4327_v32 }
  0x41   : > { %4276 = vmatprep.subr.mxu0 %v4703_v16 }
  0x43   : > { %4254 = vmatmul.mubr.msk.f32.vlgmr.msra.gmra.mrb[2].mxu0 %vm838_vm1, %v4907_v15 }
  0x44   : > { %4278 = vmatprep.mubr.msk.f32.mxu0 %vm4704_vm2, %v4703_v16 }
 0x10c   : > { %v4244_v18 = vpop.f32.mrb[0].mxu1 }
 0x10d   : > { %v1002_v20 = vadd.f32 %v4244_v18, %v3827_v17  ;;  %v996_v21 = vpop.f32.mrb[1].mxu1  ;;  %v4233_v22 = vpop.f32.mrb[0].mxu0 }
 0x10e   : > { %v997_v23 = vadd.f32 %v3827_v17, %v996_v21  ;;  %v911_v24 = vpop.f32.mrb[1].mxu0  ;;  %v917_v26 = vadd.f32 %v4233_v22, %v3824_v19 }
 0x10f   : > { %1510 = vrot.lane.b32.xlu1 %v1002_v20, %s4705_s20  ;;  %v912_v25 = vadd.f32 %v3824_v19, %v911_v24 }
 0x110   : > { %4257 = vmatpush3.xpose.msk.msra.mxu1 %vm1090_vm3, %v997_v23 }
 0x111   : > { %4261 = vmatprep.subr.mxu1 %v4703_v16 }
 0x113   : > { %1430 = vrot.lane.b32.xlu1 %v912_v25, %s4705_s20  ;;  %4259 = vmatmul.mubr.msk.f32.vlgmr.msra.gmra.mrb[2].mxu1 %vm1090_vm3, %v912_v25 }
 0x114   : > { %4262 = vmatpush3.xpose.msk.msra.mxu1 %vm1090_vm3, %v1002_v20  ;;  %4263 = vmatprep.mubr.msk.f32.mxu1 %vm4704_vm2, %v4703_v16 }
 0x115   : > { %4266 = vmatprep.subr.mxu1 %v4703_v16 }
 0x116   : > { %v4255_v58 = vpop.f32.mrb[2].mxu0 }
 0x117   : > { %4264 = vmatmul.mubr.msk.f32.vlgmr.msra.gmra.mrb[4].mxu1 %vm1090_vm3, %v917_v26  ;;  %v1081_v60 = vpop.f32.mrb[3].mxu0  ;;  %v1087_v61 = vadd.f32 %v4255_v58, %v3830_v59 }
 0x118   : > { %4268 = vmatprep.mubr.msk.f32.mxu1 %vm4704_vm2, %v4703_v16  ;;  %v1082_v62 = vadd.f32 %v3830_v59, %v1081_v60 }
 0x11a   : > { %4267 = vmatpush3.msra.mxu1 %v1082_v62 }
 0x11b   : > { %4271 = vmatprep.subr.mxu1 %v4703_v16 }
 0x181   : > { %v1511_v49 = vpop.permute.xlu1 %1510 }
 0x185   : > { %v1431_v53 = vpop.permute.xlu1 %1430 }
 0x1e6   : > { %v1163_v33 = vpop.f32.mrb[2].mxu1 }
 0x1e7   : > { %v1243_v35 = vmul.f32 0.25, %v1163_v33  ;;  %v4260_v36 = vpop.f32.mrb[3].mxu1 }
 0x1e9   : > { %v1257_v37 = vadd.f32 %v4952_v34, %v1243_v35 }
 0x1ea   : > { %v1239_v38 = vpop.f32.mrb[4].mxu1 }
 0x1eb   : > { %v1244_v40 = vmul.f32 0.25, %v1239_v38  ;;  %v4265_v41 = vpop.f32.mrb[5].mxu1  ;;  %v1260_v42 = vsel %vm1259_vm4, %v1257_v37, -inf }
 0x1ec   : > { %1261 = vmax.xlane.f32.xlu0 %v1260_v42  ;;  %v1779_v41 = vld [vmem:[%s4843_s23] sm:$0xff]  ;;  %v1780_v42 = vld [vmem:[%s4843_s23 + $0x8] sm:$0xff] }
 0x1ed   : > { %v1258_v43 = vadd.f32 %v4958_v39, %v1244_v40 }
 0x1ef   : > { %v1263_v44 = vsel %vm1259_vm4, %v1258_v43, -inf }
 0x1f0   : > { %1264 = vmax.xlane.f32.xlu0 %v1263_v44  ;;  %v1781_v44 = vld [vmem:[%s4843_s23 + $0x10] sm:$0xff] }
 0x206   : > { %1432 = vrot.lane.b32.xlu0 %v997_v23, %s4705_s20 }
 0x279   : > { %v1262_v45 = vpop.xlane.xlu0 %1261 }
 0x27a   : > { %v1266_v46 = vsub.f32 %v1257_v37, %v1262_v45  ;;  %v1782_v45 = vld [vmem:[%s4843_s23 + $0x18] sm:$0xff] }
 0x27c   : > { %v1268_v47 = vmul.f32 1.442695, %v1266_v46  ;;  %v4335_v46 = vpack.c.bf16 %v1782_v45, %v1781_v44 }
 0x27d   : > { %v1265_v48 = vpop.xlane.xlu0 %1264 }
 0x27e   : > { %4671 = vpow2.f32 %v1268_v47  ;;  %v1267_v50 = vsub.f32 %v1258_v43, %v1265_v48  ;;  %v4331_v43 = vpack.c.bf16 %v1780_v42, %v1779_v41 }
 0x280   : > { %v1270_v51 = vmul.f32 1.442695, %v1267_v50 }
 0x281   : > { %v1433_v52 = vpop.permute.xlu0 %1432 }
 0x282   : > { %4673 = vpow2.f32 %v1270_v51  ;;  %4277 = vmatpush3.xpose.msk.msra.mxu0 %vm1090_vm3, %v1433_v52 }
 0x283   : > { %4286 = vmatprep.subr.mxu0 %v4703_v16 }
 0x285   : > { %4279 = vmatmul.mubr.msk.f32.vlgmr.msra.gmra.mrb[4].mxu0 %vm1090_vm3, %v1431_v53 }
 0x286   : > { %4288 = vmatprep.mubr.msk.f32.mxu0 %vm4704_vm2, %v4703_v16 }
 0x288   : > { %v4672_v54 = vpop.eup %4671 }
 0x289   : > { %v1272_v55 = vsel %vm1259_vm4, %v4672_v54, 0.0 }
 0x28a   : > { %1273 = vadd.xlane.f32.xlu1 %v1272_v55  ;;  %v3847_v55 = vld [vmem:[%s5633_s25] ss:$0 sm:$0xff] }
 0x28c   : > { %v4674_v56 = vpop.eup %4673 }
 0x28d   : > { %v1275_v57 = vsel %vm1259_vm4, %v4674_v56, 0.0 }
 0x28e   : > { %1276 = vadd.xlane.f32.xlu1 %v1275_v57 }
 0x29f   : > { %1508 = vrot.lane.b32.xlu1 %v917_v26, %s4705_s20 }
 0x317   : > { %v1274_v63 = vpop.xlane.xlu1 %1273 }
 0x318   : > { %4675 = vrcp.f32 %v1274_v63 }
 0x31b   : > { %v1277_v0 = vpop.xlane.xlu1 %1276 }
 0x31c   : > { %4677 = vrcp.f32 %v1277_v0 }
 0x31f   : > { %v1509_v5 = vpop.permute.xlu1 %1508 }
 0x322   : > { %v4676_v1 = vpop.eup %4675 }
 0x323   : > { %v1280_v2 = vmul.f32 %v4676_v1, %v4672_v54 }
 0x325   : > { %4269 = vmatmul.mubr.msk.f32.vlgmr.msra.gmra.mrb[6].mxu1 %vm1259_vm4, %v1280_v2 }
 0x326   : > { %v4678_v3 = vpop.eup %4677  ;;  %4272 = vmatpush3.msra.mxu1 %v1087_v61  ;;  %4273 = vmatprep.mubr.msk.f32.mxu1 %vm4704_vm2, %v4703_v16 }
 0x327   : > { %v1281_v4 = vmul.f32 %v4678_v3, %v4674_v56  ;;  %4281 = vmatprep.subr.mxu1 %v4703_v16 }
 0x329   : > { %4274 = vmatmul.mubr.msk.f32.vlgmr.msra.gmra.mrb[8].mxu1 %vm1259_vm4, %v1281_v4 }
 0x32a   : > { %4283 = vmatprep.mubr.msk.f32.mxu1 %vm4704_vm2, %v4703_v16 }
 0x32d   : > { %4282 = vmatpush3.xpose.msk.msra.mxu1 %vm1090_vm3, %v1511_v49 }
 0x32e   : > { %4291 = vmatprep.subr.mxu1 %v4703_v16 }
 0x330   : > { %4284 = vmatmul.mubr.msk.f32.vlgmr.msra.gmra.mrb[10].mxu1 %vm1090_vm3, %v1509_v5 }
 0x331   : > { %4293 = vmatprep.mubr.msk.f32.mxu1 %vm4704_vm2, %v4703_v16 }
 0x358   : > { %v1504_v6 = vpop.f32.mrb[4].mxu0 }
 0x359   : > { %v1586_v7 = vmul.f32 0.25, %v1504_v6  ;;  %v4280_v8 = vpop.f32.mrb[5].mxu0 }
 0x35a   : > { %v1916_v8 = vld [vmem:[%s4861_s22 + $0x8] sm:$0xff] }
 0x35b   : > { %v1588_v9 = vadd.f32 %v4952_v34, %v1586_v7 }
 0x35d   : > { %v1590_v10 = vsel %vm1259_vm4, %v1588_v9, -inf }
 0x35e   : > { %1591 = vmax.xlane.f32.xlu0 %v1590_v10  ;;  %v1918_v10 = vld [vmem:[%s4861_s22 + $0x18] sm:$0xff] }
 0x3eb   : > { %v1592_v11 = vpop.xlane.xlu0 %1591 }
 0x3ec   : > { %v1596_v12 = vsub.f32 %v1588_v9, %v1592_v11  ;;  %v1932_v9 = vld [vmem:[%s4861_s22 + $0x88] sm:$0xff] }
 0x3ed   : > { %v4339_v11 = vpack.c.bf16 %v1932_v9, %v1916_v8  ;;  %v1940_v8 = vld [vmem:[%s4861_s22 + $0xc8] sm:$0xff]  ;;  %v1926_v9 = vld [vmem:[%s4861_s22 + $0x58] sm:$0xff] }
 0x3ee   : > { %v1598_v14 = vmul.f32 1.442695, %v1596_v12  ;;  %v1934_v12 = vld [vmem:[%s4861_s22 + $0x98] sm:$0xff] }
 0x3f0   : > { %4679 = vpow2.f32 %v1598_v14  ;;  %v1915_v14 = vld [vmem:[%s4861_s22] sm:$0xff] }
 0x3f8   : > { %v1351_v17 = vpop.f32.mrb[6].mxu1 }
 0x3f9   : > { %1428 = vst.msk [vmem:[#allocation3] sm:$0xff] %vm1090_vm3, %v1351_v17  ;;  %v4270_v18 = vpop.f32.mrb[7].mxu1  ;;  %v1931_v17 = vld [vmem:[%s4861_s22 + $0x80] sm:$0xff] }
 0x3fa   : > { %v4680_v19 = vpop.eup %4679  ;;  %v4347_v18 = vpack.c.bf16 %v1934_v12, %v1918_v10  ;;  %v1923_v12 = vld [vmem:[%s4861_s22 + $0x40] sm:$0xff] }
 0x3fb   : > { %v1602_v20 = vsel %vm1259_vm4, %v4680_v19, 0.0 }
 0x3fc   : > { %1603 = vadd.xlane.f32.xlu0 %v1602_v20  ;;  %v1424_v21 = vpop.f32.mrb[8].mxu1  ;;  %v1917_v20 = vld [vmem:[%s4861_s22 + $0x10] sm:$0xff] }
 0x3fd   : > { %1429 = vst.msk [vmem:[#allocation3 + $0x8] sm:$0xff] %vm1090_vm3, %v1424_v21  ;;  %v4275_v22 = vpop.f32.mrb[9].mxu1  ;;  %v1933_v21 = vld [vmem:[%s4861_s22 + $0x90] sm:$0xff] }
 0x3fe   : > { %v4349_v22 = vpack.c.bf16 %v1933_v21, %v1917_v20 }
 0x403   : > { %v1582_v23 = vpop.f32.mrb[10].mxu1 }
 0x404   : > { %v1587_v24 = vmul.f32 0.25, %v1582_v23  ;;  %v4285_v25 = vpop.f32.mrb[11].mxu1  ;;  %v1948_v23 = vld [vmem:[%s4861_s22 + $0x108] sm:$0xff] }
 0x405   : > { %v1950_v25 = vld [vmem:[%s4861_s22 + $0x118] sm:$0xff] }
 0x406   : > { %v1589_v26 = vadd.f32 %v4958_v39, %v1587_v24  ;;  %v1964_v24 = vld [vmem:[%s4861_s22 + $0x188] sm:$0xff] }
 0x408   : > { %v1593_v27 = vsel %vm1259_vm4, %v1589_v26, -inf }
 0x409   : > { %1594 = vmax.xlane.f32.xlu1 %v1593_v27  ;;  %v1966_v27 = vld [vmem:[%s4861_s22 + $0x198] sm:$0xff] }
 0x41a   : > { %1690 = vrot.lane.b32.xlu1 %v1087_v61, %s4705_s20 }
 0x489   : > { %v1604_v34 = vpop.xlane.xlu0 %1603 }
 0x496   : > { %v1595_v28 = vpop.xlane.xlu1 %1594 }
 0x497   : > { %v1597_v29 = vsub.f32 %v1589_v26, %v1595_v28  ;;  %v4343_v26 = vpack.c.bf16 %v1964_v24, %v1948_v23  ;;  %v1947_v28 = vld [vmem:[%s4861_s22 + $0x100] sm:$0xff]  ;;  %v1972_v23 = vld [vmem:[%s4861_s22 + $0x1c8] sm:$0xff]  ;;  %v1958_v24 = vld [vmem:[%s4861_s22 + $0x158] sm:$0xff] }
 0x499   : > { %v1600_v30 = vmul.f32 1.442695, %v1597_v29  ;;  %v1963_v29 = vld [vmem:[%s4861_s22 + $0x180] sm:$0xff] }
 0x49a   : > { %v1691_v31 = vpop.permute.xlu1 %1690 }
 0x49b   : > { %4681 = vpow2.f32 %v1600_v30  ;;  %4292 = vmatpush3.msra.mxu1 %v1691_v31  ;;  %v4351_v30 = vpack.c.bf16 %v1966_v27, %v1950_v25  ;;  %v4345_v31 = vpack.c.bf16 %v1963_v29, %v1947_v28  ;;  %v1974_v25 = vld [vmem:[%s4861_s22 + $0x1d8] sm:$0xff]  ;;  %v1955_v28 = vld [vmem:[%s4861_s22 + $0x140] sm:$0xff] }
 0x49c   : > { %4683 = vrcp.f32 %v1604_v34  ;;  %4340 = vmatprep.subr.bf16.mxu1 %v4339_v11  ;;  %v1971_v29 = vld [vmem:[%s4861_s22 + $0x1c0] sm:$0xff] }
 0x4a5   : > { %v4682_v32 = vpop.eup %4681 }
 0x4a6   : > { %v1605_v33 = vsel %vm1259_vm4, %v4682_v32, 0.0  ;;  %v4684_v36 = vpop.eup %4683 }
 0x4a7   : > { %1606 = vadd.xlane.f32.xlu0 %v1605_v33  ;;  %v1610_v37 = vmul.f32 %v4684_v36, %v4680_v19  ;;  %v4341_v19 = vpack.c.bf16 %v1931_v17, %v1915_v14  ;;  %v1965_v33 = vld [vmem:[%s4861_s22 + $0x190] sm:$0xff]  ;;  %v1936_v36 = vld [vmem:[%s4861_s22 + $0xa8] sm:$0xff]  ;;  %v1939_v17 = vld [vmem:[%s4861_s22 + $0xc0] sm:$0xff] }
 0x4bd   : > { %1613 = vrot.lane.b32.xlu0 %v1082_v62, %s4705_s20 }
 0x534   : > { %v1607_v35 = vpop.xlane.xlu0 %1606 }
 0x535   : > { %4685 = vrcp.f32 %v1607_v35  ;;  %v1920_v35 = vld [vmem:[%s4861_s22 + $0x28] sm:$0xff] }
 0x538   : > { %v1614_v38 = vpop.permute.xlu0 %1613 }
 0x539   : > { %4287 = vmatpush3.msra.mxu0 %v1614_v38  ;;  %v4355_v38 = vpack.c.bf16 %v1936_v36, %v1920_v35  ;;  %v1944_v35 = vld [vmem:[%s4861_s22 + $0xe8] sm:$0xff]  ;;  %v1930_v36 = vld [vmem:[%s4861_s22 + $0x78] sm:$0xff] }
 0x53a   : > { %4289 = vmatmul.mubr.msk.f32.vlgmr.msra.gmra.mrb[6].mxu0 %vm1259_vm4, %v1610_v37  ;;  %4332 = vmatprep.subr.bf16.mxu0 %v4331_v43  ;;  %v1922_v37 = vld [vmem:[%s4861_s22 + $0x38] sm:$0xff] }
 0x53b   : > { %4334 = vmatpush3.bf16.msra.mxu0 %v4331_v43 }
 0x53c   : > { %4336 = vmatprep.subr.bf16.mxu0 %v4335_v46 }
 0x53f   : > { %v4686_v39 = vpop.eup %4685  ;;  %4338 = vmatpush3.bf16.msra.mxu0 %v4335_v46 }
 0x540   : > { %v1611_v40 = vmul.f32 %v4686_v39, %v4682_v32  ;;  %4348 = vmatprep.subr.bf16.mxu0 %v4347_v18  ;;  %v1949_v32 = vld [vmem:[%s4861_s22 + $0x110] sm:$0xff]  ;;  %v1938_v39 = vld [vmem:[%s4861_s22 + $0xb8] sm:$0xff] }
 0x541   : > { %v4353_v34 = vpack.c.bf16 %v1965_v33, %v1949_v32  ;;  %v1925_v18 = vld [vmem:[%s4861_s22 + $0x50] sm:$0xff]  ;;  %v4383_v33 = vpack.c.bf16 %v1974_v25, %v1958_v24  ;;  %v2768_v24 = vld [vmem:[%s4873_s26 + $0x1a8] sm:$0xff] }
 0x542   : > { %4294 = vmatmul.mubr.msk.f32.vlgmr.msra.gmra.mrb[12].mxu1 %vm1259_vm4, %v1611_v40  ;;  %v4363_v40 = vpack.c.bf16 %v1938_v39, %v1922_v37  ;;  %v1946_v37 = vld [vmem:[%s4861_s22 + $0xf8] sm:$0xff] }
 0x543   : > { %2131 = vmatprep.mubr.f32.mxu1 %v4703_v16  ;;  %4342 = vmatpush1.bf16.msra.mxu1 %v4341_v19  ;;  %v1941_v19 = vld [vmem:[%s4861_s22 + $0xd0] sm:$0xff] }
 0x544   : > { %4344 = vmatprep.subr.bf16.mxu1 %v4343_v26  ;;  %v4373_v26 = vpack.c.bf16 %v1939_v17, %v1923_v12  ;;  %v4381_v27 = vpack.c.bf16 %v1941_v19, %v1925_v18  ;;  %v2718_v12 = vld [vmem:[%s4873_s26 + $0x18] sm:$0xff]  ;;  %v2749_v19 = vld [vmem:[%s4873_s26 + $0x110] sm:$0xff] }
 0x547   : > { %4346 = vmatpush1.bf16.msra.mxu1 %v4345_v31  ;;  %v1973_v31 = vld [vmem:[%s4861_s22 + $0x1d0] sm:$0xff] }
 0x548   : > { %4356 = vmatprep.subr.bf16.mxu1 %v4355_v38  ;;  %v4377_v38 = vpack.c.bf16 %v1971_v29, %v1955_v28  ;;  %v2720_v28 = vld [vmem:[%s4873_s26 + $0x28] sm:$0xff] }
 0x60d   : > { %v1685_v47 = vpop.f32.mrb[6].mxu0 }
 0x60e   : > { %1768 = vrot.lane.b32.xlu1 %v1685_v47, %s4706_s28  ;;  %v4290_v48 = vpop.f32.mrb[7].mxu0 }
 0x60f   : > { %v3850_v48 = vld [vmem:[%s5634_s0] ss:$0 sm:$0xff] }
 0x615   : > { %v1762_v49 = vpop.f32.mrb[12].mxu1 }
 0x616   : > { %1770 = vrot.lane.b32.xlu1 %v1762_v49, %s4706_s28  ;;  %v4295_v50 = vpop.f32.mrb[13].mxu1  ;;  %v1919_v49 = vld [vmem:[%s4861_s22 + $0x20] sm:$0xff]  ;;  %s5637_s28 = sld [smem:[#allocation17_spill]] }
 0x680   : > { %v1769_v51 = vpop.permute.xlu1 %1768 }
 0x681   : > { %1775 = vst.msk [vmem:[#allocation3] sm:$0xff] %vm1774_vm5, %v1769_v51  ;;  %v1935_v51 = vld [vmem:[%s4861_s22 + $0xa0] sm:$0xff] }
 0x688   : > { %v1771_v52 = vpop.permute.xlu1 %1770  ;;  %v1777_v53 = vld [vmem:[#allocation3] sm:$0xff] }
 0x689   : > { %1776 = vst.msk [vmem:[#allocation3 + $0x8] sm:$0xff] %vm1774_vm5, %v1771_v52  ;;  %4304 = vmatprep.mubr.msk.f32.mxu0 %vm838_vm1, %v1777_v53  ;;  %v1921_v52 = vld [vmem:[%s4861_s22 + $0x30] sm:$0xff] }
 0x68a   : > { %v1937_v53 = vld [vmem:[%s4861_s22 + $0xb0] sm:$0xff] }
 0x690   : > { %v1778_v54 = vld [vmem:[#allocation3 + $0x8] sm:$0xff] }
 0x691   : > { %4305 = vmatmul.mubr.msk.f32.vlgmr.msra.gmra.mrb[8].mxu0 %vm838_vm1, %v1778_v54  ;;  %v3851_v54 = vld [vmem:[%s5635_s3] ss:$0 sm:$0xff] }
 0x692   : > { %2208 = vmatprep.mubr.f32.mxu0 %v4703_v16  ;;  %4350 = vmatpush1.bf16.msra.mxu0 %v4349_v22  ;;  %v1956_v22 = vld [vmem:[%s4861_s22 + $0x148] sm:$0xff] }
 0x693   : > { %4352 = vmatprep.subr.bf16.mxu0 %v4351_v30  ;;  %v1957_v30 = vld [vmem:[%s4861_s22 + $0x150] sm:$0xff]  ;;  %v4375_v32 = vpack.c.bf16 %v1972_v23, %v1956_v22  ;;  %v2736_v22 = vld [vmem:[%s4873_s26 + $0xa8] sm:$0xff]  ;;  %v2767_v23 = vld [vmem:[%s4873_s26 + $0x1a0] sm:$0xff] }
 0x694   : > { %v4385_v39 = vpack.c.bf16 %v1973_v31, %v1957_v30  ;;  %v4443_v30 = vpack.c.bf16 %v2768_v24, %v2767_v23  ;;  %v2751_v31 = vld [vmem:[%s4873_s26 + $0x120] sm:$0xff]  ;;  %v2777_v23 = vld [vmem:[%s4873_s26 + $0x1f0] sm:$0xff] }
 0x696   : > { %4354 = vmatpush1.bf16.msra.mxu0 %v4353_v34  ;;  %v1928_v34 = vld [vmem:[%s4861_s22 + $0x68] sm:$0xff] }
 0x697   : > { %4364 = vmatprep.subr.bf16.mxu0 %v4363_v40  ;;  %v1927_v40 = vld [vmem:[%s4861_s22 + $0x60] sm:$0xff] }
 0x764   : > { %v4306_v56 = vpop.f32.mrb[8].mxu0 }
 0x765   : > { %v1867_v57 = vadd.f32 %v4306_v56, %v3847_v55  ;;  %v1861_v58 = vpop.f32.mrb[9].mxu0 }
 0x766   : > { %v1862_v59 = vadd.f32 %v3847_v55, %v1861_v58  ;;  %v1952_v55 = vld [vmem:[%s4861_s22 + $0x128] sm:$0xff]  ;;  %v1954_v58 = vld [vmem:[%s4861_s22 + $0x138] sm:$0xff] }
 0x767   : > { %v1871_v60 = vadd.f32 %v1867_v57, %v4907_v15  ;;  %v1968_v57 = vld [vmem:[%s4861_s22 + $0x1a8] sm:$0xff] }
 0x768   : > { %v1870_v61 = vadd.f32 %v1862_v59, %v4901_v13  ;;  %v1970_v59 = vld [vmem:[%s4861_s22 + $0x1b8] sm:$0xff] }
 0x769   : > { %v1875_v62 = vsel %vm838_vm1, %v1871_v60, 0.0 }
 0x76a   : > { %1876 = vadd.xlane.f32.xlu1 %v1875_v62  ;;  %v1872_v63 = vsel %vm838_vm1, %v1870_v61, 0.0  ;;  %v4365_v62 = vpack.c.bf16 %v1937_v53, %v1921_v52  ;;  %v1959_v52 = vld [vmem:[%s4861_s22 + $0x160] sm:$0xff] }
 0x76b   : > { %1873 = vadd.xlane.f32.xlu0 %v1872_v63  ;;  %v1951_v63 = vld [vmem:[%s4861_s22 + $0x120] sm:$0xff] }
 0x76c   : > { %v1975_v53 = vld [vmem:[%s4861_s22 + $0x1e0] sm:$0xff] }
 0x7f7   : > { %v1877_v0 = vpop.xlane.xlu1 %1876 }
 0x7f8   : > { %v1880_v1 = vmul.f32 0.03125, %v1877_v0  ;;  %v1874_v2 = vpop.xlane.xlu0 %1873 }
 0x7f9   : > { %v1879_v3 = vmul.f32 0.03125, %v1874_v2  ;;  %v1967_v2 = vld [vmem:[%s4861_s22 + $0x1a0] sm:$0xff] }
 0x7fa   : > { %v5019_v4 = vsub.f32 %v1871_v60, %v1880_v1  ;;  %v4361_v10 = vpack.c.bf16 %v1967_v2, %v1951_v63  ;;  %v2716_v2 = vld [vmem:[%s4873_s26 + $0x8] sm:$0xff] }
 0x7fb   : > { %v1881_v15 = vsub.f32 %v1870_v61, %v1879_v3  ;;  %v4357_v61 = vpack.c.bf16 %v1935_v51, %v1919_v49  ;;  %v1953_v3 = vld [vmem:[%s4861_s22 + $0x130] sm:$0xff]  ;;  %v1978_v49 = vld [vmem:[%s4861_s22 + $0x1f8] sm:$0xff] }
 0x7fc   : > { %v1884_v6 = vmul.f32 %v5019_v4, %v5019_v4 }
 0x7fd   : > { %v1883_v13 = vmul.f32 %v1881_v15, %v1881_v15 }
 0x7fe   : > { %v1888_v7 = vsel %vm838_vm1, %v1884_v6, 0.0  ;;  %v1924_v6 = vld [vmem:[%s4861_s22 + $0x48] sm:$0xff] }
 0x7ff   : > { %v1885_v5 = vsel %vm838_vm1, %v1883_v13, 0.0  ;;  %v4359_v13 = vpack.c.bf16 %v1968_v57, %v1952_v55  ;;  %v4371_v20 = vpack.c.bf16 %v1940_v8, %v1924_v6  ;;  %v1977_v55 = vld [vmem:[%s4861_s22 + $0x1f0] sm:$0xff] }
 0x800   : > { %1886 = vadd.xlane.f32.xlu0 %v1885_v5  ;;  %v4367_v5 = vpack.c.bf16 %v1970_v59, %v1954_v58  ;;  %v2731_v58 = vld [vmem:[%s4873_s26 + $0x80] sm:$0xff]  ;;  %v2732_v59 = vld [vmem:[%s4873_s26 + $0x88] sm:$0xff]  ;;  %v2733_v6 = vld [vmem:[%s4873_s26 + $0x90] sm:$0xff] }
 0x801   : > { %v2765_v8 = vld [vmem:[%s4873_s26 + $0x190] sm:$0xff] }
 0x804   : > { %1889 = vadd.xlane.f32.xlu0 %v1888_v7 }
 0x88d   : > { %v1887_v41 = vpop.xlane.xlu0 %1886 }
 0x88e   : > { %v1891_v42 = vmul.f32 0.03125, %v1887_v41  ;;  %v1943_v41 = vld [vmem:[%s4861_s22 + $0xe0] sm:$0xff] }
 0x890   : > { %v1893_v43 = vadd.f32 1e-05, %v1891_v42  ;;  %v1929_v42 = vld [vmem:[%s4861_s22 + $0x70] sm:$0xff] }
 0x891   : > { %v1890_v44 = vpop.xlane.xlu0 %1889 }
 0x892   : > { %4687 = vrsqrt.f32 %v1893_v43  ;;  %v1892_v45 = vmul.f32 0.03125, %v1890_v44  ;;  %v1945_v43 = vld [vmem:[%s4861_s22 + $0xf0] sm:$0xff]  ;;  %v4387_v44 = vpack.c.bf16 %v1944_v35, %v1928_v34  ;;  %v2770_v35 = vld [vmem:[%s4873_s26 + $0x1b8] sm:$0xff] }
 0x893   : > { %v4397_v51 = vpack.c.bf16 %v1945_v43, %v1929_v42  ;;  %v2769_v34 = vld [vmem:[%s4873_s26 + $0x1b0] sm:$0xff]  ;;  %v2754_v43 = vld [vmem:[%s4873_s26 + $0x138] sm:$0xff] }
 0x894   : > { %v1894_v46 = vadd.f32 1e-05, %v1892_v45  ;;  %v4395_v45 = vpack.c.bf16 %v1946_v37, %v1930_v36  ;;  %v2753_v42 = vld [vmem:[%s4873_s26 + $0x130] sm:$0xff] }
 0x896   : > { %4689 = vrsqrt.f32 %v1894_v46  ;;  %v1960_v46 = vld [vmem:[%s4861_s22 + $0x168] sm:$0xff] }
 0x89c   : > { %v4688_v47 = vpop.eup %4687 }
 0x89d   : > { %v1897_v50 = vmul.f32 %v4688_v47, %v1881_v15  ;;  %v1969_v15 = vld [vmem:[%s4861_s22 + $0x1b0] sm:$0xff]  ;;  %v1976_v47 = vld [vmem:[%s4861_s22 + $0x1e8] sm:$0xff] }
 0x89e   : > { %v4369_v11 = vpack.c.bf16 %v1969_v15, %v1953_v3  ;;  %v4403_v3 = vpack.c.bf16 %v2732_v59, %v2731_v58  ;;  %v2773_v58 = vld [vmem:[%s4873_s26 + $0x1d0] sm:$0xff]  ;;  %v2774_v59 = vld [vmem:[%s4873_s26 + $0x1d8] sm:$0xff] }
 0x89f   : > { %v1905_v56 = vmul.f32 %v3850_v48, %v1897_v50  ;;  %v4389_v50 = vpack.c.bf16 %v1943_v41, %v1927_v40  ;;  %v4447_v41 = vpack.c.bf16 %v2770_v35, %v2769_v34  ;;  %v2827_v34 = vld [vmem:[%s4873_s26 + $0x380] sm:$0xff] }
 0x8a0   : > { %v4690_v60 = vpop.eup %4689 }
 0x8a1   : > { %v5064_v0 = vadd.f32 %v3851_v54, %v1905_v56  ;;  %v1898_v1 = vmul.f32 %v4690_v60, %v5019_v4  ;;  %v1942_v4 = vld [vmem:[%s4861_s22 + $0xd8] sm:$0xff]  ;;  %v4391_v56 = vpack.c.bf16 %v1976_v47, %v1960_v46  ;;  %v2763_v60 = vld [vmem:[%s4873_s26 + $0x180] sm:$0xff]  ;;  %v2772_v47 = vld [vmem:[%s4873_s26 + $0x1c8] sm:$0xff] }
 0x8a2   : > { %v4379_v21 = vpack.c.bf16 %v1942_v4, %v1926_v9  ;;  %v2766_v9 = vld [vmem:[%s4873_s26 + $0x198] sm:$0xff]  ;;  %v2771_v46 = vld [vmem:[%s4873_s26 + $0x1c0] sm:$0xff] }
 0x8a3   : > { %v1906_v7 = vmul.f32 %v3850_v48, %v1898_v1  ;;  %3852 = vmatmul.mubr.msk.f32.vlgmr.msra.gmra.mrb[14].mxu1 %vm838_vm1, %v5064_v0  ;;  %3854 = vmatmul.mubr.msk.f32.vlgmr.msra.gmra.mrb[10].mxu0 %vm838_vm1, %v5064_v0  ;;  %v1962_v48 = vld [vmem:[%s4861_s22 + $0x178] sm:$0xff]  ;;  %v2715_v1 = vld [vmem:[%s4873_s26] sm:$0xff]  ;;  %v4439_v18 = vpack.c.bf16 %v2766_v9, %v2765_v8 }
 0x8a4   : > { %4358 = vmatpush1.bf16.msra.mxu1 %v4357_v61  ;;  %4366 = vmatpush1.bf16.msra.mxu0 %v4365_v62  ;;  %v4399_v57 = vpack.c.bf16 %v1978_v49, %v1962_v48  ;;  %v2764_v61 = vld [vmem:[%s4873_s26 + $0x188] sm:$0xff]  ;;  %v4393_v62 = vpack.c.bf16 %v1975_v53, %v1959_v52  ;;  %v4405_v4 = vpack.c.bf16 %v2716_v2, %v2715_v1 }
 0x8a5   : > { %v5079_v14 = vadd.f32 %v3851_v54, %v1906_v7  ;;  %2137 = vmatprep.mubr.f32.mxu1 %v4703_v16  ;;  %2214 = vmatprep.mubr.f32.mxu0 %v4703_v16  ;;  %v1961_v54 = vld [vmem:[%s4861_s22 + $0x170] sm:$0xff]  ;;  %v4435_v15 = vpack.c.bf16 %v2764_v61, %v2763_v60  ;;  %v2734_v7 = vld [vmem:[%s4873_s26 + $0x98] sm:$0xff]  ;;  %v4449_v49 = vpack.c.bf16 %v2754_v43, %v2753_v42  ;;  %v5223_v42 = vld [vmem:[%s4867_s4] sm:$0xff] }
 0x8a6   : > { %4360 = vmatprep.subr.bf16.mxu1 %v4359_v13  ;;  %4368 = vmatprep.subr.bf16.mxu0 %v4367_v5  ;;  %v4401_v63 = vpack.c.bf16 %v1977_v55, %v1961_v54  ;;  %v2747_v13 = vld [vmem:[%s4873_s26 + $0x100] sm:$0xff]  ;;  %v2748_v5 = vld [vmem:[%s4873_s26 + $0x108] sm:$0xff]  ;;  %v4407_v17 = vpack.c.bf16 %v2734_v7, %v2733_v6  ;;  %v4451_v53 = vpack.c.bf16 %v2772_v47, %v2771_v46 }
 0x8a7   : > { %3853 = vmatmul.mubr.msk.f32.gmra.mrb[16].mxu1 %vm838_vm1, %v5079_v14  ;;  %3855 = vmatmul.mubr.msk.f32.gmra.mrb[12].mxu0 %vm838_vm1, %v5079_v14  ;;  %v2755_v54 = vld [vmem:[%s4873_s26 + $0x140] sm:$0xff]  ;;  %v2756_v55 = vld [vmem:[%s4873_s26 + $0x148] sm:$0xff]  ;;  %v4455_v2 = vpack.c.bf16 %v2774_v59, %v2773_v58 }
 0x8a8   : > { %4362 = vmatpush1.bf16.msra.mxu1 %v4361_v10  ;;  %4370 = vmatpush1.bf16.msra.mxu0 %v4369_v11  ;;  %v4437_v10 = vpack.c.bf16 %v2748_v5, %v2747_v13  ;;  %v2717_v11 = vld [vmem:[%s4873_s26 + $0x10] sm:$0xff]  ;;  %v4453_v61 = vpack.c.bf16 %v2756_v55, %v2755_v54  ;;  %v2743_v13 = vld [vmem:[%s4873_s26 + $0xe0] sm:$0xff]  ;;  %v2744_v5 = vld [vmem:[%s4873_s26 + $0xe8] sm:$0xff] }
 0x8a9   : > { %2285 = vmatprep.mubr.f32.mxu1 %v4703_v16  ;;  %2362 = vmatprep.mubr.f32.mxu0 %v4703_v16  ;;  %v4409_v25 = vpack.c.bf16 %v2718_v12, %v2717_v11  ;;  %v2775_v6 = vld [vmem:[%s4873_s26 + $0x1e0] sm:$0xff]  ;;  %v2776_v7 = vld [vmem:[%s4873_s26 + $0x1e8] sm:$0xff] }
 0x8aa   : > { %4372 = vmatprep.subr.bf16.mxu1 %v4371_v20  ;;  %4380 = vmatprep.subr.bf16.mxu0 %v4379_v21  ;;  %v2750_v20 = vld [vmem:[%s4873_s26 + $0x118] sm:$0xff]  ;;  %v2735_v21 = vld [vmem:[%s4873_s26 + $0xa0] sm:$0xff]  ;;  %v4459_v11 = vpack.c.bf16 %v2776_v7, %v2775_v6  ;;  %v2728_v12 = vld [vmem:[%s4873_s26 + $0x68] sm:$0xff] }
 0x8ab   : > { %3856 = vmatmul.mubr.msk.f32.vlgmr.msra.gmra.mrb[18].mxu1 %vm838_vm1, %v5064_v0  ;;  %3858 = vmatmul.mubr.msk.f32.vlgmr.msra.gmra.mrb[14].mxu0 %vm838_vm1, %v5064_v0  ;;  %v4411_v29 = vpack.c.bf16 %v2736_v22, %v2735_v21  ;;  %v2745_v21 = vld [vmem:[%s4873_s26 + $0xf0] sm:$0xff]  ;;  %v2746_v22 = vld [vmem:[%s4873_s26 + $0xf8] sm:$0xff]  ;;  %v2811_v54 = vld [vmem:[%s4873_s26 + $0x300] sm:$0xff] }
 0x8ac   : > { %4374 = vmatpush1.bf16.msra.mxu1 %v4373_v26  ;;  %4382 = vmatpush1.bf16.msra.mxu0 %v4381_v27  ;;  %v4441_v26 = vpack.c.bf16 %v2750_v20, %v2749_v19  ;;  %v2719_v27 = vld [vmem:[%s4873_s26 + $0x20] sm:$0xff]  ;;  %v4431_v24 = vpack.c.bf16 %v2746_v22, %v2745_v21  ;;  %v2812_v55 = vld [vmem:[%s4873_s26 + $0x308] sm:$0xff]  ;;  %v2781_v6 = vld [vmem:[%s4873_s26 + $0x210] sm:$0xff] }
 0x8ad   : > { %2291 = vmatprep.mubr.f32.mxu1 %v4703_v16  ;;  %2368 = vmatprep.mubr.f32.mxu0 %v4703_v16  ;;  %v4413_v36 = vpack.c.bf16 %v2720_v28, %v2719_v27  ;;  %v2730_v27 = vld [vmem:[%s4873_s26 + $0x78] sm:$0xff] }
 0x8ae   : > { %4376 = vmatprep.subr.bf16.mxu1 %v4375_v32  ;;  %4384 = vmatprep.subr.bf16.mxu0 %v4383_v33  ;;  %v2752_v32 = vld [vmem:[%s4873_s26 + $0x128] sm:$0xff]  ;;  %v2737_v33 = vld [vmem:[%s4873_s26 + $0xb0] sm:$0xff] }
 0x8af   : > { %3857 = vmatmul.mubr.msk.f32.gmra.mrb[20].mxu1 %vm838_vm1, %v5079_v14  ;;  %3859 = vmatmul.mubr.msk.f32.gmra.mrb[16].mxu0 %vm838_vm1, %v5079_v14  ;;  %v4445_v37 = vpack.c.bf16 %v2752_v32, %v2751_v31  ;;  %v2762_v31 = vld [vmem:[%s4873_s26 + $0x178] sm:$0xff] }
 0x8b0   : > { %4378 = vmatpush1.bf16.msra.mxu1 %v4377_v38  ;;  %4386 = vmatpush1.bf16.msra.mxu0 %v4385_v39  ;;  %v2721_v38 = vld [vmem:[%s4873_s26 + $0x30] sm:$0xff]  ;;  %v2722_v39 = vld [vmem:[%s4873_s26 + $0x38] sm:$0xff] }
 0x8b1   : > { %2439 = vmatprep.mubr.f32.mxu1 %v4703_v16  ;;  %2516 = vmatprep.mubr.f32.mxu0 %v4703_v16  ;;  %v4417_v48 = vpack.c.bf16 %v2722_v39, %v2721_v38  ;;  %v1981_v38 = vlaneseq }
 0x8b2   : > { %4388 = vmatprep.subr.bf16.mxu1 %v4387_v44  ;;  %4396 = vmatprep.subr.bf16.mxu0 %v4395_v45  ;;  %v2739_v44 = vld [vmem:[%s4873_s26 + $0xc0] sm:$0xff]  ;;  %v2740_v45 = vld [vmem:[%s4873_s26 + $0xc8] sm:$0xff] }
 0x8b3   : > { %3860 = vmatmul.mubr.msk.f32.vlgmr.msra.gmra.mrb[22].mxu1 %vm838_vm1, %v5064_v0  ;;  %3862 = vmatmul.mubr.msk.f32.vlgmr.msra.gmra.mrb[18].mxu0 %vm838_vm1, %v5064_v0  ;;  %v4419_v52 = vpack.c.bf16 %v2740_v45, %v2739_v44  ;;  %v5218_v39 = vshrl.u32 %v1981_v38, 7 }
 0x8b4   : > { %4390 = vmatpush1.bf16.msra.mxu1 %v4389_v50  ;;  %4398 = vmatpush1.bf16.msra.mxu0 %v4397_v51  ;;  %v2723_v50 = vld [vmem:[%s4873_s26 + $0x40] sm:$0xff]  ;;  %v2724_v51 = vld [vmem:[%s4873_s26 + $0x48] sm:$0xff] }
 0x8b5   : > { %2445 = vmatprep.mubr.f32.mxu1 %v4703_v16  ;;  %2522 = vmatprep.mubr.f32.mxu0 %v4703_v16  ;;  %v4421_v60 = vpack.c.bf16 %v2724_v51, %v2723_v50  ;;  %v1987_v43 = vsub.s32 1, %v5218_v39  ;;  %v1995_v44 = vsub.s32 3, %v5218_v39  ;;  %v2780_v50 = vld [vmem:[%s4873_s26 + $0x208] sm:$0xff]  ;;  %v2003_v51 = vsub.s32 5, %v5218_v39 }
 0x8b6   : > { %4392 = vmatprep.subr.bf16.mxu1 %v4391_v56  ;;  %4400 = vmatprep.subr.bf16.mxu0 %v4399_v57  ;;  %v2741_v56 = vld [vmem:[%s4873_s26 + $0xd0] sm:$0xff]  ;;  %v2742_v57 = vld [vmem:[%s4873_s26 + $0xd8] sm:$0xff] }
 0x8b7   : > { %3861 = vmatmul.mubr.msk.f32.gmra.mrb[24].mxu1 %vm838_vm1, %v5079_v14  ;;  %3863 = vmatmul.mubr.msk.f32.gmra.mrb[20].mxu0 %vm838_vm1, %v5079_v14  ;;  %v4423_v1 = vpack.c.bf16 %v2742_v57, %v2741_v56  ;;  %v1988_v47 = vrot.slane %v5223_v42, %v1987_v43  ;;  %v2797_v56 = vld [vmem:[%s4873_s26 + $0x290] sm:$0xff] }
 0x8b8   : > { %4394 = vmatpush1.bf16.msra.mxu1 %v4393_v62  ;;  %4402 = vmatpush1.bf16.msra.mxu0 %v4401_v63  ;;  %v2725_v62 = vld [vmem:[%s4873_s26 + $0x50] sm:$0xff]  ;;  %v2726_v63 = vld [vmem:[%s4873_s26 + $0x58] sm:$0xff] }
 0x8b9   : > { %2593 = vmatprep.mubr.f32.mxu1 %v4703_v16  ;;  %2670 = vmatprep.mubr.f32.mxu0 %v4703_v16  ;;  %v4425_v8 = vpack.c.bf16 %v2726_v63, %v2725_v62  ;;  %v2829_v62 = vld [vmem:[%s4873_s26 + $0x390] sm:$0xff]  ;;  %v2830_v63 = vld [vmem:[%s4873_s26 + $0x398] sm:$0xff] }
 0x8ba   : > { %4404 = vmatprep.subr.bf16.mxu1 %v4403_v3  ;;  %4436 = vmatprep.subr.bf16.mxu0 %v4435_v15  ;;  %v2757_v3 = vld [vmem:[%s4873_s26 + $0x150] sm:$0xff]  ;;  %v2758_v15 = vld [vmem:[%s4873_s26 + $0x158] sm:$0xff] }
 0x8bb   : > { %3864 = vmatmul.mubr.msk.f32.vlgmr.msra.gmra.mrb[26].mxu1 %vm838_vm1, %v5064_v0  ;;  %3866 = vmatmul.mubr.msk.f32.vlgmr.msra.gmra.mrb[22].mxu0 %vm838_vm1, %v5064_v0  ;;  %v4457_v9 = vpack.c.bf16 %v2758_v15, %v2757_v3  ;;  %v2011_v3 = vsub.s32 7, %v5218_v39 }
 0x8bc   : > { %2599 = vmatprep.mubr.f32.mxu1 %v4703_v16  ;;  %2676 = vmatprep.mubr.f32.mxu0 %v4703_v16  ;;  %v2738_v16 = vld [vmem:[%s4873_s26 + $0xb8] sm:$0xff] }
 0x8bd   : > { %4406 = vmatpush3.bf16.msra.mxu1 %v4405_v4  ;;  %4438 = vmatpush3.bf16.msra.mxu0 %v4437_v10  ;;  %v4415_v40 = vpack.c.bf16 %v2738_v16, %v2737_v33  ;;  %v2727_v4 = vld [vmem:[%s4873_s26 + $0x60] sm:$0xff]  ;;  %v4427_v10 = vpack.c.bf16 %v2744_v5, %v2743_v13  ;;  %v2796_v16 = vld [vmem:[%s4873_s26 + $0x288] sm:$0xff]  ;;  %v4501_v13 = vpack.c.bf16 %v2812_v55, %v2811_v54  ;;  %v2801_v55 = vld [vmem:[%s4873_s26 + $0x2b0] sm:$0xff] }
 0x8be   : > { %4408 = vmatprep.subr.bf16.mxu1 %v4407_v17  ;;  %4440 = vmatprep.subr.bf16.mxu0 %v4439_v18  ;;  %v2759_v17 = vld [vmem:[%s4873_s26 + $0x160] sm:$0xff]  ;;  %v2760_v18 = vld [vmem:[%s4873_s26 + $0x168] sm:$0xff]  ;;  %v4429_v19 = vpack.c.bf16 %v2728_v12, %v2727_v4  ;;  %v5252_v5 = vrot.slane %v5223_v42, %v2003_v51  ;;  %v2782_v12 = vld [vmem:[%s4873_s26 + $0x218] sm:$0xff] }
 0x8bf   : > { %3865 = vmatmul.mubr.msk.f32.gmra.mrb[28].mxu1 %vm838_vm1, %v5079_v14  ;;  %3867 = vmatmul.mubr.msk.f32.gmra.mrb[24].mxu0 %vm838_vm1, %v5079_v14  ;;  %v4461_v20 = vpack.c.bf16 %v2760_v18, %v2759_v17  ;;  %v2795_v33 = vld [vmem:[%s4873_s26 + $0x280] sm:$0xff]  ;;  %v2813_v17 = vld [vmem:[%s4873_s26 + $0x310] sm:$0xff]  ;;  %v5276_v54 = vld [vmem:[%s4867_s4 + $0x8] sm:$0xff] }
 0x8c0   : > { %v4467_v35 = vpack.c.bf16 %v2796_v16, %v2795_v33  ;;  %v2784_v33 = vld [vmem:[%s4873_s26 + $0x228] sm:$0xff] }
 0x8c1   : > { %4410 = vmatpush3.bf16.msra.mxu1 %v4409_v25  ;;  %4442 = vmatpush3.bf16.msra.mxu0 %v4441_v26  ;;  %v2778_v25 = vld [vmem:[%s4873_s26 + $0x1f8] sm:$0xff]  ;;  %v2729_v26 = vld [vmem:[%s4873_s26 + $0x70] sm:$0xff] }
 0x8c2   : > { %4412 = vmatprep.subr.bf16.mxu1 %v4411_v29  ;;  %4444 = vmatprep.subr.bf16.mxu0 %v4443_v30  ;;  %v4463_v28 = vpack.c.bf16 %v2778_v25, %v2777_v23  ;;  %v4433_v29 = vpack.c.bf16 %v2730_v27, %v2729_v26  ;;  %v2761_v30 = vld [vmem:[%s4873_s26 + $0x170] sm:$0xff]  ;;  %v2799_v25 = vld [vmem:[%s4873_s26 + $0x2a0] sm:$0xff] }
 0x8c3   : > { %v4465_v32 = vpack.c.bf16 %v2762_v31, %v2761_v30  ;;  %v2831_v30 = vld [vmem:[%s4873_s26 + $0x3a0] sm:$0xff]  ;;  %v2832_v31 = vld [vmem:[%s4873_s26 + $0x3a8] sm:$0xff] }
 0x8c5   : > { %4414 = vmatpush3.bf16.msra.mxu1 %v4413_v36  ;;  %4446 = vmatpush3.bf16.msra.mxu0 %v4445_v37  ;;  %v2828_v36 = vld [vmem:[%s4873_s26 + $0x388] sm:$0xff] }
 0x8c6   : > { %4416 = vmatprep.subr.bf16.mxu1 %v4415_v40  ;;  %4448 = vmatprep.subr.bf16.mxu0 %v4447_v41  ;;  %v4499_v37 = vpack.c.bf16 %v2828_v36, %v2827_v34  ;;  %v1983_v40 = vsub.s32 0, %v5218_v39  ;;  %v1991_v41 = vsub.s32 2, %v5218_v39 }
 0x8c8   : > { %v1984_v45 = vrot.slane %v5223_v42, %v1983_v40  ;;  %v1992_v46 = vrot.slane %v5223_v42, %v1991_v41 }
 0x8c9   : > { %4418 = vmatpush3.bf16.msra.mxu1 %v4417_v48  ;;  %4450 = vmatpush3.bf16.msra.mxu0 %v4449_v49  ;;  %v1996_v48 = vrot.slane %v5223_v42, %v1995_v44  ;;  %v2779_v49 = vld [vmem:[%s4873_s26 + $0x200] sm:$0xff] }
 0x8ca   : > { %4420 = vmatprep.subr.bf16.mxu1 %v4419_v52  ;;  %4452 = vmatprep.subr.bf16.mxu0 %v4451_v53  ;;  %v4469_v15 = vpack.c.bf16 %v2780_v50, %v2779_v49 }
 0x8cd   : > { %4422 = vmatpush3.bf16.msra.mxu1 %v4421_v60  ;;  %4454 = vmatpush3.bf16.msra.mxu0 %v4453_v61  ;;  %v2798_v61 = vld [vmem:[%s4873_s26 + $0x298] sm:$0xff] }
 0x8ce   : > { %4424 = vmatprep.subr.bf16.mxu1 %v4423_v1  ;;  %4456 = vmatprep.subr.bf16.mxu0 %v4455_v2 }
 0x8d1   : > { %4426 = vmatpush3.bf16.msra.mxu1 %v4425_v8  ;;  %4458 = vmatpush3.bf16.msra.mxu0 %v4457_v9 }
 0x8d2   : > { %4428 = vmatprep.subr.bf16.mxu1 %v4427_v10  ;;  %4460 = vmatprep.subr.bf16.mxu0 %v4459_v11  ;;  %v4471_v10 = vpack.c.bf16 %v2798_v61, %v2797_v56  ;;  %v4503_v11 = vpack.c.bf16 %v2830_v63, %v2829_v62 }
 0x8d5   : > { %4430 = vmatpush3.bf16.msra.mxu1 %v4429_v19  ;;  %4462 = vmatpush3.bf16.msra.mxu0 %v4461_v20 }
 0x8d6   : > { %4432 = vmatprep.subr.bf16.mxu1 %v4431_v24  ;;  %4464 = vmatprep.subr.bf16.mxu0 %v4463_v28  ;;  %v2814_v24 = vld [vmem:[%s4873_s26 + $0x318] sm:$0xff]  ;;  %v5262_v28 = vrot.slane %v5223_v42, %v2011_v3 }
 0x8d7   : > { %v4505_v38 = vpack.c.bf16 %v2814_v24, %v2813_v17  ;;  %v2803_v17 = vld [vmem:[%s4873_s26 + $0x2c0] sm:$0xff] }
 0x8d8   : > { %v2787_v24 = vld [vmem:[%s4873_s26 + $0x240] sm:$0xff] }
 0x8d9   : > { %4434 = vmatpush3.bf16.msra.mxu1 %v4433_v29  ;;  %4466 = vmatpush3.bf16.msra.mxu0 %v4465_v32  ;;  %v2800_v29 = vld [vmem:[%s4873_s26 + $0x2a8] sm:$0xff]  ;;  %v2783_v32 = vld [vmem:[%s4873_s26 + $0x220] sm:$0xff] }
 0x8da   : > { %4468 = vmatprep.subr.bf16.mxu1 %v4467_v35  ;;  %4500 = vmatprep.subr.bf16.mxu0 %v4499_v37  ;;  %v4473_v37 = vpack.c.bf16 %v2782_v12, %v2781_v6  ;;  %v2786_v6 = vld [vmem:[%s4873_s26 + $0x238] sm:$0xff] }
 0x8db   : > { %v2818_v12 = vld [vmem:[%s4873_s26 + $0x338] sm:$0xff] }
 0x976   : > { %v2133_v52 = vpop.f32.mrb[14].mxu1  ;;  %v2210_v53 = vpop.f32.mrb[10].mxu0 }
 0x977   : > { %v2134_v57 = vadd.f32 %v2133_v52, %v1984_v45  ;;  %v2211_v58 = vadd.f32 %v2210_v53, %v1992_v46  ;;  %v2135_v59 = vpop.f32.mrb[15].mxu1  ;;  %v2212_v60 = vpop.f32.mrb[11].mxu0  ;;  %v4475_v52 = vpack.c.bf16 %v2800_v29, %v2799_v25  ;;  %v4507_v53 = vpack.c.bf16 %v2832_v31, %v2831_v30  ;;  %v2788_v25 = vld [vmem:[%s4873_s26 + $0x248] sm:$0xff] }
 0x978   : > { %v2136_v1 = vadd.f32 %v2135_v59, %v1988_v47  ;;  %v2213_v2 = vadd.f32 %v2212_v60, %v1996_v48  ;;  %v2833_v59 = vld [vmem:[%s4873_s26 + $0x3b0] sm:$0xff]  ;;  %v2834_v60 = vld [vmem:[%s4873_s26 + $0x3b8] sm:$0xff] }
 0x979   : > { %v2683_v18 = vmax.f32 %v2134_v57, 0.0  ;;  %v2685_v19 = vmax.f32 %v2211_v58, 0.0  ;;  %v2802_v58 = vld [vmem:[%s4873_s26 + $0x2b8] sm:$0xff] }
 0x97a   : > { %v2684_v7 = vmax.f32 %v2136_v1, 0.0  ;;  %v2686_v8 = vmax.f32 %v2213_v2, 0.0  ;;  %v2139_v9 = vpop.f32.mrb[16].mxu1  ;;  %v2216_v4 = vpop.f32.mrb[12].mxu0  ;;  %v4477_v2 = vpack.c.bf16 %v2784_v33, %v2783_v32  ;;  %v2819_v32 = vld [vmem:[%s4873_s26 + $0x340] sm:$0xff]  ;;  %v2820_v33 = vld [vmem:[%s4873_s26 + $0x348] sm:$0xff] }
 0x97b   : > { %v2140_v20 = vadd.f32 %v2139_v9, %v1984_v45  ;;  %v2217_v21 = vadd.f32 %v2216_v4, %v1992_v46  ;;  %v2141_v22 = vpop.f32.mrb[17].mxu1  ;;  %v2218_v23 = vpop.f32.mrb[13].mxu0  ;;  %v2815_v45 = vld [vmem:[%s4873_s26 + $0x320] sm:$0xff]  ;;  %v2816_v46 = vld [vmem:[%s4873_s26 + $0x328] sm:$0xff]  ;;  %v2024_v9 = vrot.slane %v5276_v54, %v1991_v41  ;;  %v4479_v4 = vpack.c.bf16 %v2802_v58, %v2801_v55  ;;  %v2789_v55 = vld [vmem:[%s4873_s26 + $0x250] sm:$0xff] }
 0x97c   : > { %v2142_v26 = vadd.f32 %v2141_v22, %v1988_v47  ;;  %v2219_v27 = vadd.f32 %v2218_v23, %v1996_v48  ;;  %3041 = vmatprep.mubr.f32.mxu1 %v2684_v7  ;;  %3116 = vmatprep.mubr.f32.mxu0 %v2686_v8 }
 0x97d   : > { %3042 = vmatmul.mubr.f32.vlgmr.msra.gmra.mrb[30].mxu1 %v2683_v18  ;;  %3117 = vmatmul.mubr.f32.vlgmr.msra.gmra.mrb[26].mxu0 %v2685_v19  ;;  %v2699_v47 = vmax.f32 %v2140_v20, 0.0  ;;  %v2701_v48 = vmax.f32 %v2217_v21, 0.0  ;;  %v2804_v18 = vld [vmem:[%s4873_s26 + $0x2c8] sm:$0xff]  ;;  %v2835_v19 = vld [vmem:[%s4873_s26 + $0x3c0] sm:$0xff] }
 0x97e   : > { %v2700_v16 = vmax.f32 %v2142_v26, 0.0  ;;  %v2702_v34 = vmax.f32 %v2219_v27, 0.0  ;;  %4470 = vmatpush3.bf16.msra.mxu1 %v4469_v15  ;;  %4502 = vmatpush3.bf16.msra.mxu0 %v4501_v13  ;;  %v5269_v35 = vpop.f32.mrb[18].mxu1  ;;  %v5271_v36 = vpop.f32.mrb[14].mxu0  ;;  %v4509_v15 = vpack.c.bf16 %v2816_v46, %v2815_v45  ;;  %v2785_v13 = vld [vmem:[%s4873_s26 + $0x230] sm:$0xff]  ;;  %v2836_v20 = vld [vmem:[%s4873_s26 + $0x3c8] sm:$0xff]  ;;  %v4483_v30 = vpack.c.bf16 %v2804_v18, %v2803_v17 }
 0x97f   : > { %v2289_v49 = vpop.f32.mrb[19].mxu1  ;;  %v2366_v50 = vpop.f32.mrb[15].mxu0  ;;  %4472 = vmatprep.subr.bf16.mxu1 %v4471_v10  ;;  %4504 = vmatprep.subr.bf16.mxu0 %v4503_v11  ;;  %v4511_v10 = vpack.c.bf16 %v2834_v60, %v2833_v59  ;;  %v2817_v11 = vld [vmem:[%s4873_s26 + $0x330] sm:$0xff]  ;;  %v4481_v22 = vpack.c.bf16 %v2786_v6, %v2785_v13  ;;  %v4515_v31 = vpack.c.bf16 %v2836_v20, %v2835_v19  ;;  %v2838_v46 = vld [vmem:[%s4873_s26 + $0x3d8] sm:$0xff]  ;;  %v2808_v13 = vld [vmem:[%s4873_s26 + $0x2e8] sm:$0xff] }
 0x980   : > { %v2290_v56 = vadd.f32 %v2289_v49, %v5252_v5  ;;  %v2367_v57 = vadd.f32 %v2366_v50, %v5262_v28  ;;  %3046 = vmatprep.mubr.f32.mxu1 %v2700_v16  ;;  %3121 = vmatprep.mubr.f32.mxu0 %v2702_v34  ;;  %v4513_v23 = vpack.c.bf16 %v2818_v12, %v2817_v11  ;;  %v2805_v16 = vld [vmem:[%s4873_s26 + $0x2d0] sm:$0xff]  ;;  %v1999_v34 = vsub.s32 4, %v5218_v39  ;;  %v2791_v20 = vld [vmem:[%s4873_s26 + $0x260] sm:$0xff] }
 0x981   : > { %3047 = vmatmul.mubr.f32.gmra.mrb[32].mxu1 %v2699_v47  ;;  %3122 = vmatmul.mubr.f32.gmra.mrb[28].mxu0 %v2701_v48  ;;  %v2837_v45 = vld [vmem:[%s4873_s26 + $0x3d0] sm:$0xff]  ;;  %v4485_v47 = vpack.c.bf16 %v2788_v25, %v2787_v24  ;;  %v4517_v50 = vpack.c.bf16 %v2820_v33, %v2819_v32  ;;  %v2036_v6 = vrot.slane %v5276_v54, %v2003_v51  ;;  %v2792_v51 = vld [vmem:[%s4873_s26 + $0x268] sm:$0xff]  ;;  %v2810_v32 = vld [vmem:[%s4873_s26 + $0x2f8] sm:$0xff] }
 0x982   : > { %v2688_v61 = vmax.f32 %v2290_v56, 0.0  ;;  %v2690_v62 = vmax.f32 %v2367_v57, 0.0  ;;  %4474 = vmatpush3.bf16.msra.mxu1 %v4473_v37  ;;  %4506 = vmatpush3.bf16.msra.mxu0 %v4505_v38  ;;  %v5284_v63 = vpop.f32.mrb[20].mxu1  ;;  %v5286_v1 = vpop.f32.mrb[16].mxu0  ;;  %v2007_v37 = vsub.s32 6, %v5218_v39  ;;  %v2806_v38 = vld [vmem:[%s4873_s26 + $0x2d8] sm:$0xff] }
 0x983   : > { %v5290_v7 = vpop.f32.mrb[21].mxu1  ;;  %v5292_v8 = vpop.f32.mrb[17].mxu0  ;;  %4476 = vmatprep.subr.bf16.mxu1 %v4475_v52  ;;  %4508 = vmatprep.subr.bf16.mxu0 %v4507_v53  ;;  %v2032_v52 = vrot.slane %v5276_v54, %v1999_v34  ;;  %v2790_v56 = vld [vmem:[%s4873_s26 + $0x258] sm:$0xff]  ;;  %v2821_v57 = vld [vmem:[%s4873_s26 + $0x350] sm:$0xff] }
 0x984   : > { %3191 = vmatprep.mubr.f32.mxu1 %v2688_v61  ;;  %3266 = vmatprep.mubr.f32.mxu0 %v2690_v62  ;;  %v2040_v53 = vrot.slane %v5276_v54, %v2007_v37  ;;  %v4487_v61 = vpack.c.bf16 %v2806_v38, %v2805_v16  ;;  %v4519_v62 = vpack.c.bf16 %v2838_v46, %v2837_v45  ;;  %v2841_v38 = vld [vmem:[%s4873_s26 + $0x3f0] sm:$0xff]  ;;  %v2842_v45 = vld [vmem:[%s4873_s26 + $0x3f8] sm:$0xff] }
 0x985   : > { %v4489_v17 = vpack.c.bf16 %v2790_v56, %v2789_v55  ;;  %v2000_v46 = vrot.slane %v5223_v42, %v1999_v34  ;;  %v4493_v55 = vpack.c.bf16 %v2792_v51, %v2791_v20  ;;  %v2844_v20 = vld [vmem:[%s4873_s26 + $0x408] sm:$0xff] }
 0x986   : > { %4478 = vmatpush3.bf16.msra.mxu1 %v4477_v2  ;;  %4510 = vmatpush3.bf16.msra.mxu0 %v4509_v15  ;;  %v5303_v21 = vpop.f32.mrb[22].mxu1  ;;  %v2518_v41 = vpop.f32.mrb[18].mxu0  ;;  %v2822_v2 = vld [vmem:[%s4873_s26 + $0x358] sm:$0xff]  ;;  %v2807_v15 = vld [vmem:[%s4873_s26 + $0x2e0] sm:$0xff] }
 0x987   : > { %v5307_v26 = vadd.f32 %v2518_v41, %v2024_v9  ;;  %v5309_v27 = vpop.f32.mrb[23].mxu1  ;;  %v5311_v29 = vpop.f32.mrb[19].mxu0  ;;  %4480 = vmatprep.subr.bf16.mxu1 %v4479_v4  ;;  %4512 = vmatprep.subr.bf16.mxu0 %v4511_v10  ;;  %v2839_v4 = vld [vmem:[%s4873_s26 + $0x3e0] sm:$0xff]  ;;  %v2840_v10 = vld [vmem:[%s4873_s26 + $0x3e8] sm:$0xff]  ;;  %v4521_v18 = vpack.c.bf16 %v2822_v2, %v2821_v57  ;;  %v4491_v19 = vpack.c.bf16 %v2808_v13, %v2807_v15  ;;  %v2825_v2 = vld [vmem:[%s4873_s26 + $0x370] sm:$0xff] }
 0x988   : > { %v2823_v41 = vld [vmem:[%s4873_s26 + $0x360] sm:$0xff]  ;;  %v4523_v25 = vpack.c.bf16 %v2840_v10, %v2839_v4  ;;  %v4527_v13 = vpack.c.bf16 %v2842_v45, %v2841_v38  ;;  %v2826_v4 = vld [vmem:[%s4873_s26 + $0x378] sm:$0xff]  ;;  %v2296_v45 = vadd.f32 %v5290_v7, %v5252_v5 }
 0x989   : > { %v2859_v10 = vld [vmem:[%s4873_s26 + $0x480] sm:$0xff]  ;;  %v4529_v51 = vpack.c.bf16 %v2826_v4, %v2825_v2  ;;  %v2894_v38 = vld [vmem:[%s4873_s26 + $0x598] sm:$0xff] }
 0x98a   : > { %4482 = vmatpush3.bf16.msra.mxu1 %v4481_v22  ;;  %4514 = vmatpush3.bf16.msra.mxu0 %v4513_v23  ;;  %v5321_v48 = vpop.f32.mrb[24].mxu1  ;;  %v2524_v49 = vpop.f32.mrb[20].mxu0 }
 0x98b   : > { %v5328_v58 = vadd.f32 %v2524_v49, %v2024_v9  ;;  %v5330_v59 = vpop.f32.mrb[25].mxu1  ;;  %v5332_v60 = vpop.f32.mrb[21].mxu0  ;;  %4484 = vmatprep.subr.bf16.mxu1 %v4483_v30  ;;  %4516 = vmatprep.subr.bf16.mxu0 %v4515_v31  ;;  %v2044_v9 = vrot.slane %v5276_v54, %v2011_v3  ;;  %v2824_v30 = vld [vmem:[%s4873_s26 + $0x368] sm:$0xff]  ;;  %v2809_v31 = vld [vmem:[%s4873_s26 + $0x2f0] sm:$0xff] }
 0x98c   : > { %v4525_v56 = vpack.c.bf16 %v2824_v30, %v2823_v41  ;;  %v4495_v57 = vpack.c.bf16 %v2810_v32, %v2809_v31  ;;  %v2862_v31 = vld [vmem:[%s4873_s26 + $0x498] sm:$0xff]  ;;  %v2893_v32 = vld [vmem:[%s4873_s26 + $0x590] sm:$0xff] }
 0x98e   : > { %4486 = vmatpush3.bf16.msra.mxu1 %v4485_v47  ;;  %4518 = vmatpush3.bf16.msra.mxu0 %v4517_v50  ;;  %v2595_v11 = vpop.f32.mrb[26].mxu1  ;;  %v2672_v12 = vpop.f32.mrb[22].mxu0  ;;  %v2008_v47 = vrot.slane %v5223_v42, %v2007_v37 }
 0x98f   : > { %v5348_v22 = vadd.f32 %v2595_v11, %v2032_v52  ;;  %v5350_v3 = vadd.f32 %v2672_v12, %v2040_v53  ;;  %v2597_v23 = vpop.f32.mrb[27].mxu1  ;;  %v2674_v24 = vpop.f32.mrb[23].mxu0  ;;  %4488 = vmatprep.subr.bf16.mxu1 %v4487_v61  ;;  %4520 = vmatprep.subr.bf16.mxu0 %v4519_v62  ;;  %v2793_v61 = vld [vmem:[%s4873_s26 + $0x270] sm:$0xff]  ;;  %v2794_v62 = vld [vmem:[%s4873_s26 + $0x278] sm:$0xff]  ;;  %v2860_v11 = vld [vmem:[%s4873_s26 + $0x488] sm:$0xff] }
 0x990   : > { %v5355_v33 = vadd.f32 %v2597_v23, %v2036_v6  ;;  %v5357_v16 = vadd.f32 %v2674_v24, %v2044_v9  ;;  %v4531_v41 = vpack.c.bf16 %v2860_v11, %v2859_v10  ;;  %v2875_v23 = vld [vmem:[%s4873_s26 + $0x500] sm:$0xff]  ;;  %v2876_v24 = vld [vmem:[%s4873_s26 + $0x508] sm:$0xff] }
 0x991   : > { %v4565_v5 = vpack.c.bf16 %v2876_v24, %v2875_v23  ;;  %v2847_v11 = vld [vmem:[%s4873_s26 + $0x420] sm:$0xff]  ;;  %v2865_v23 = vld [vmem:[%s4873_s26 + $0x4b0] sm:$0xff]  ;;  %v2866_v24 = vld [vmem:[%s4873_s26 + $0x4b8] sm:$0xff] }
 0x992   : > { %4490 = vmatpush3.bf16.msra.mxu1 %v4489_v17  ;;  %4522 = vmatpush3.bf16.msra.mxu0 %v4521_v18  ;;  %v2601_v49 = vpop.f32.mrb[28].mxu1  ;;  %v2678_v50 = vpop.f32.mrb[24].mxu0  ;;  %v2891_v18 = vld [vmem:[%s4873_s26 + $0x580] sm:$0xff] }
 0x993   : > { %v5366_v34 = vadd.f32 %v2601_v49, %v2032_v52  ;;  %v5368_v42 = vadd.f32 %v2678_v50, %v2040_v53  ;;  %v2603_v37 = vpop.f32.mrb[29].mxu1  ;;  %v2680_v15 = vpop.f32.mrb[25].mxu0  ;;  %4492 = vmatprep.subr.bf16.mxu1 %v4491_v19  ;;  %4524 = vmatprep.subr.bf16.mxu0 %v4523_v25  ;;  %v2892_v52 = vld [vmem:[%s4873_s26 + $0x588] sm:$0xff]  ;;  %v2843_v53 = vld [vmem:[%s4873_s26 + $0x400] sm:$0xff]  ;;  %v4497_v19 = vpack.c.bf16 %v2794_v62, %v2793_v61  ;;  %v2861_v25 = vld [vmem:[%s4873_s26 + $0x490] sm:$0xff]  ;;  %v2704_v61 = vmax.f32 %v2296_v45, 0.0 }
 0x994   : > { %v5373_v12 = vadd.f32 %v2603_v37, %v2036_v6  ;;  %v5375_v17 = vadd.f32 %v2680_v15, %v2044_v9  ;;  %v2288_v6 = vadd.f32 %v5269_v35, %v2000_v46  ;;  %v2365_v9 = vadd.f32 %v5271_v36, %v2008_v47  ;;  %v2877_v15 = vld [vmem:[%s4873_s26 + $0x510] sm:$0xff] }
 0x995   : > { %v4563_v30 = vpack.c.bf16 %v2892_v52, %v2891_v18  ;;  %v2373_v49 = vadd.f32 %v5292_v8, %v5262_v28  ;;  %v5396_v35 = vrot.slane %v5276_v54, %v1987_v43  ;;  %v5401_v36 = vrot.slane %v5276_v54, %v1995_v44  ;;  %v2845_v44 = vld [vmem:[%s4873_s26 + $0x410] sm:$0xff]  ;;  %v2848_v18 = vld [vmem:[%s4873_s26 + $0x428] sm:$0xff] }
 0x996   : > { %4494 = vmatpush3.bf16.msra.mxu1 %v4493_v55  ;;  %4526 = vmatpush3.bf16.msra.mxu0 %v4525_v56  ;;  %v4533_v50 = vpack.c.bf16 %v2844_v20, %v2843_v53  ;;  %v4535_v7 = vpack.c.bf16 %v2862_v31, %v2861_v25  ;;  %v4567_v28 = vpack.c.bf16 %v2894_v38, %v2893_v32  ;;  %v2687_v8 = vmax.f32 %v2288_v6, 0.0  ;;  %v2897_v25 = vld [vmem:[%s4873_s26 + $0x5b0] sm:$0xff]  ;;  %v2898_v6 = vld [vmem:[%s4873_s26 + $0x5b8] sm:$0xff] }
 0x997   : > { %4496 = vmatprep.subr.bf16.mxu1 %v4495_v57  ;;  %4528 = vmatprep.subr.bf16.mxu0 %v4527_v13  ;;  %v2689_v55 = vmax.f32 %v2365_v9, 0.0  ;;  %v2294_v43 = vadd.f32 %v5284_v63, %v2000_v46  ;;  %v2371_v56 = vadd.f32 %v5286_v1, %v2008_v47  ;;  %v2846_v57 = vld [vmem:[%s4873_s26 + $0x418] sm:$0xff]  ;;  %v2706_v62 = vmax.f32 %v2373_v49, 0.0  ;;  %v2863_v63 = vld [vmem:[%s4873_s26 + $0x4a0] sm:$0xff]  ;;  %v2864_v1 = vld [vmem:[%s4873_s26 + $0x4a8] sm:$0xff] }
 0x998   : > { %v2444_v2 = vadd.f32 %v5309_v27, %v5396_v35  ;;  %v2521_v37 = vadd.f32 %v5311_v29, %v5401_v36  ;;  %v2878_v13 = vld [vmem:[%s4873_s26 + $0x518] sm:$0xff]  ;;  %v2895_v46 = vld [vmem:[%s4873_s26 + $0x5a0] sm:$0xff]  ;;  %v2896_v47 = vld [vmem:[%s4873_s26 + $0x5a8] sm:$0xff]  ;;  %v4537_v29 = vpack.c.bf16 %v2846_v57, %v2845_v44  ;;  %v4539_v20 = vpack.c.bf16 %v2864_v1, %v2863_v63 }
 0x999   : > { %v2703_v4 = vmax.f32 %v2294_v43, 0.0  ;;  %v2705_v27 = vmax.f32 %v2371_v56, 0.0  ;;  %v4569_v10 = vpack.c.bf16 %v2878_v13, %v2877_v15  ;;  %v4541_v9 = vpack.c.bf16 %v2848_v18, %v2847_v11  ;;  %v2849_v31 = vld [vmem:[%s4873_s26 + $0x430] sm:$0xff]  ;;  %v2850_v32 = vld [vmem:[%s4873_s26 + $0x438] sm:$0xff]  ;;  %v2851_v56 = vld [vmem:[%s4873_s26 + $0x440] sm:$0xff] }
 0x99a   : > { %4498 = vmatpush3.bf16.msra.mxu1 %v4497_v19  ;;  %4530 = vmatpush3.bf16.msra.mxu0 %v4529_v51  ;;  %v2692_v52 = vmax.f32 %v2444_v2, 0.0  ;;  %v2694_v53 = vmax.f32 %v2521_v37, 0.0  ;;  %v4571_v19 = vpack.c.bf16 %v2896_v47, %v2895_v46  ;;  %v2879_v51 = vld [vmem:[%s4873_s26 + $0x520] sm:$0xff]  ;;  %v4543_v38 = vpack.c.bf16 %v2866_v24, %v2865_v23  ;;  %v2881_v49 = vld [vmem:[%s4873_s26 + $0x530] sm:$0xff]  ;;  %v2852_v44 = vld [vmem:[%s4873_s26 + $0x448] sm:$0xff] }
 0x99b   : > { %4532 = vmatprep.subr.bf16.mxu1 %v4531_v41  ;;  %4564 = vmatprep.subr.bf16.mxu0 %v4563_v30  ;;  %v2880_v41 = vld [vmem:[%s4873_s26 + $0x528] sm:$0xff]  ;;  %v4575_v45 = vpack.c.bf16 %v2898_v6, %v2897_v25  ;;  %v2869_v37 = vld [vmem:[%s4873_s26 + $0x4d0] sm:$0xff]  ;;  %v2870_v15 = vld [vmem:[%s4873_s26 + $0x4d8] sm:$0xff]  ;;  %v4549_v1 = vpack.c.bf16 %v2852_v44, %v2851_v56 }
 0x99c   : > { %v4573_v30 = vpack.c.bf16 %v2880_v41, %v2879_v51  ;;  %v2884_v2 = vld [vmem:[%s4873_s26 + $0x548] sm:$0xff]  ;;  %v2901_v13 = vld [vmem:[%s4873_s26 + $0x5d0] sm:$0xff]  ;;  %v2902_v63 = vld [vmem:[%s4873_s26 + $0x5d8] sm:$0xff] }
 0x99d   : > { %3192 = vmatmul.mubr.f32.vlgmr.msra.gmra.mrb[34].mxu1 %v2687_v8  ;;  %3267 = vmatmul.mubr.f32.vlgmr.msra.gmra.mrb[30].mxu0 %v2689_v55  ;;  %v2900_v8 = vld [vmem:[%s4873_s26 + $0x5c8] sm:$0xff]  ;;  %v4545_v55 = vpack.c.bf16 %v2850_v32, %v2849_v31  ;;  %v2853_v47 = vld [vmem:[%s4873_s26 + $0x450] sm:$0xff]  ;;  %v2886_v11 = vld [vmem:[%s4873_s26 + $0x558] sm:$0xff] }
 0x99e   : > { %3196 = vmatprep.mubr.f32.mxu1 %v2704_v61  ;;  %3271 = vmatprep.mubr.f32.mxu0 %v2706_v62  ;;  %v2883_v62 = vld [vmem:[%s4873_s26 + $0x540] sm:$0xff]  ;;  %v2856_v23 = vld [vmem:[%s4873_s26 + $0x468] sm:$0xff]  ;;  %v2874_v31 = vld [vmem:[%s4873_s26 + $0x4f8] sm:$0xff] }
 0x99f   : > { %4534 = vmatpush3.bf16.msra.mxu1 %v4533_v50  ;;  %4566 = vmatpush3.bf16.msra.mxu0 %v4565_v5  ;;  %v2882_v50 = vld [vmem:[%s4873_s26 + $0x538] sm:$0xff]  ;;  %v2867_v5 = vld [vmem:[%s4873_s26 + $0x4c0] sm:$0xff]  ;;  %v4581_v46 = vpack.c.bf16 %v2884_v2, %v2883_v62  ;;  %v2905_v32 = vld [vmem:[%s4873_s26 + $0x5f0] sm:$0xff] }
 0x9a0   : > { %4536 = vmatprep.subr.bf16.mxu1 %v4535_v7  ;;  %4568 = vmatprep.subr.bf16.mxu0 %v4567_v28  ;;  %v2868_v7 = vld [vmem:[%s4873_s26 + $0x4c8] sm:$0xff]  ;;  %v2899_v28 = vld [vmem:[%s4873_s26 + $0x5c0] sm:$0xff]  ;;  %v4577_v43 = vpack.c.bf16 %v2882_v50, %v2881_v49  ;;  %v2857_v50 = vld [vmem:[%s4873_s26 + $0x470] sm:$0xff] }
 0x9a1   : > { %3197 = vmatmul.mubr.f32.gmra.mrb[36].mxu1 %v2703_v4  ;;  %3272 = vmatmul.mubr.f32.gmra.mrb[32].mxu0 %v2705_v27  ;;  %v4547_v57 = vpack.c.bf16 %v2868_v7, %v2867_v5  ;;  %v4579_v61 = vpack.c.bf16 %v2900_v8, %v2899_v28  ;;  %v2854_v4 = vld [vmem:[%s4873_s26 + $0x458] sm:$0xff]  ;;  %v4551_v27 = vpack.c.bf16 %v2870_v15, %v2869_v37  ;;  %v2871_v18 = vld [vmem:[%s4873_s26 + $0x4e0] sm:$0xff]  ;;  %v2924_v44 = vld [vmem:[%s4873_s26 + $0x688] sm:$0xff] }
 0x9a2   : > { %3341 = vmatprep.mubr.f32.mxu1 %v2692_v52  ;;  %3416 = vmatprep.mubr.f32.mxu0 %v2694_v53  ;;  %v2872_v52 = vld [vmem:[%s4873_s26 + $0x4e8] sm:$0xff]  ;;  %v2903_v53 = vld [vmem:[%s4873_s26 + $0x5e0] sm:$0xff]  ;;  %v2858_v5 = vld [vmem:[%s4873_s26 + $0x478] sm:$0xff]  ;;  %v2016_v7 = vrot.slane %v5276_v54, %v1983_v40 }
 0x9a3   : > { %4538 = vmatpush3.bf16.msra.mxu1 %v4537_v29  ;;  %4570 = vmatpush3.bf16.msra.mxu0 %v4569_v10  ;;  %v4583_v29 = vpack.c.bf16 %v2902_v63, %v2901_v13  ;;  %v2885_v10 = vld [vmem:[%s4873_s26 + $0x550] sm:$0xff]  ;;  %v2855_v41 = vld [vmem:[%s4873_s26 + $0x460] sm:$0xff]  ;;  %v4555_v24 = vpack.c.bf16 %v2872_v52, %v2871_v18  ;;  %v4561_v39 = vpack.c.bf16 %v2858_v5, %v2857_v50  ;;  %v2908_v15 = vld [vmem:[%s4873_s26 + $0x608] sm:$0xff] }
 0x9a4   : > { %4540 = vmatprep.subr.bf16.mxu1 %v4539_v20  ;;  %4572 = vmatprep.subr.bf16.mxu0 %v4571_v19  ;;  %v2904_v20 = vld [vmem:[%s4873_s26 + $0x5e8] sm:$0xff]  ;;  %v4553_v19 = vpack.c.bf16 %v2854_v4, %v2853_v47  ;;  %v4585_v51 = vpack.c.bf16 %v2886_v11, %v2885_v10  ;;  %v2887_v6 = vld [vmem:[%s4873_s26 + $0x560] sm:$0xff]  ;;  %v2442_v54 = vadd.f32 %v5303_v21, %v2016_v7  ;;  %v2925_v47 = vld [vmem:[%s4873_s26 + $0x690] sm:$0xff] }
 0x9a5   : > { %v4587_v25 = vpack.c.bf16 %v2904_v20, %v2903_v53  ;;  %v2923_v56 = vld [vmem:[%s4873_s26 + $0x680] sm:$0xff]  ;;  %v2450_v13 = vadd.f32 %v5330_v59, %v5396_v35  ;;  %v2527_v63 = vadd.f32 %v5332_v60, %v5401_v36  ;;  %v2926_v4 = vld [vmem:[%s4873_s26 + $0x698] sm:$0xff]  ;;  %v2693_v59 = vmax.f32 %v5307_v26, 0.0  ;;  %v2909_v36 = vld [vmem:[%s4873_s26 + $0x610] sm:$0xff] }
 0x9a6   : > { %v4595_v62 = vpack.c.bf16 %v2924_v44, %v2923_v56  ;;  %v2907_v37 = vld [vmem:[%s4873_s26 + $0x600] sm:$0xff]  ;;  %v2958_v21 = vld [vmem:[%s4873_s26 + $0x798] sm:$0xff]  ;;  %v2691_v10 = vmax.f32 %v2442_v54, 0.0  ;;  %v2448_v60 = vadd.f32 %v5321_v48, %v2016_v7  ;;  %v4599_v53 = vpack.c.bf16 %v2926_v4, %v2925_v47  ;;  %v2928_v26 = vld [vmem:[%s4873_s26 + $0x6a8] sm:$0xff] }
 0x9a7   : > { %4542 = vmatpush3.bf16.msra.mxu1 %v4541_v9  ;;  %4574 = vmatpush3.bf16.msra.mxu0 %v4573_v30  ;;  %v2888_v9 = vld [vmem:[%s4873_s26 + $0x568] sm:$0xff]  ;;  %v2873_v30 = vld [vmem:[%s4873_s26 + $0x4f0] sm:$0xff]  ;;  %v2910_v11 = vld [vmem:[%s4873_s26 + $0x618] sm:$0xff]  ;;  %v2708_v18 = vmax.f32 %v2450_v13, 0.0  ;;  %v2710_v52 = vmax.f32 %v2527_v63, 0.0 }
 0x9a8   : > { %4544 = vmatprep.subr.bf16.mxu1 %v4543_v38  ;;  %4576 = vmatprep.subr.bf16.mxu0 %v4575_v45  ;;  %v2906_v38 = vld [vmem:[%s4873_s26 + $0x5f8] sm:$0xff]  ;;  %v4557_v45 = vpack.c.bf16 %v2856_v23, %v2855_v41  ;;  %v4589_v49 = vpack.c.bf16 %v2888_v9, %v2887_v6  ;;  %v4559_v28 = vpack.c.bf16 %v2874_v31, %v2873_v30  ;;  %v2927_v41 = vld [vmem:[%s4873_s26 + $0x6a0] sm:$0xff]  ;;  %v2960_v23 = vld [vmem:[%s4873_s26 + $0x7a8] sm:$0xff] }
 0x9a9   : > { %v4591_v8 = vpack.c.bf16 %v2906_v38, %v2905_v32  ;;  %v2959_v48 = vld [vmem:[%s4873_s26 + $0x7a0] sm:$0xff]  ;;  %v4601_v6 = vpack.c.bf16 %v2910_v11, %v2909_v36  ;;  %v2912_v31 = vld [vmem:[%s4873_s26 + $0x628] sm:$0xff]  ;;  %v2696_v32 = vmax.f32 %v5355_v33, 0.0  ;;  %v2698_v38 = vmax.f32 %v5357_v16, 0.0  ;;  %v2929_v5 = vld [vmem:[%s4873_s26 + $0x6b0] sm:$0xff] }
 0x9aa   : > { %v2911_v30 = vld [vmem:[%s4873_s26 + $0x620] sm:$0xff]  ;;  %v2944_v50 = vld [vmem:[%s4873_s26 + $0x728] sm:$0xff]  ;;  %v2930_v7 = vld [vmem:[%s4873_s26 + $0x6b8] sm:$0xff] }
 0x9ab   : > { %4546 = vmatpush3.bf16.msra.mxu1 %v4545_v55  ;;  %4578 = vmatpush3.bf16.msra.mxu0 %v4577_v43  ;;  %v2889_v55 = vld [vmem:[%s4873_s26 + $0x570] sm:$0xff]  ;;  %v2890_v43 = vld [vmem:[%s4873_s26 + $0x578] sm:$0xff]  ;;  %v4605_v33 = vpack.c.bf16 %v2912_v31, %v2911_v30  ;;  %v4607_v56 = vpack.c.bf16 %v2930_v7, %v2929_v5  ;;  %v2963_v54 = vld [vmem:[%s4873_s26 + $0x7c0] sm:$0xff] }
 0x9ac   : > { %4548 = vmatprep.subr.bf16.mxu1 %v4547_v57  ;;  %4580 = vmatprep.subr.bf16.mxu0 %v4579_v61  ;;  %v2955_v57 = vld [vmem:[%s4873_s26 + $0x780] sm:$0xff]  ;;  %v2956_v61 = vld [vmem:[%s4873_s26 + $0x788] sm:$0xff]  ;;  %v4593_v40 = vpack.c.bf16 %v2890_v43, %v2889_v55  ;;  %v2913_v55 = vld [vmem:[%s4873_s26 + $0x630] sm:$0xff] }
 0x9ad   : > { %v4627_v2 = vpack.c.bf16 %v2956_v61, %v2955_v57  ;;  %v2914_v43 = vld [vmem:[%s4873_s26 + $0x638] sm:$0xff]  ;;  %v2945_v57 = vld [vmem:[%s4873_s26 + $0x730] sm:$0xff]  ;;  %v2916_v13 = vld [vmem:[%s4873_s26 + $0x648] sm:$0xff] }
 0x9ae   : > { %v2946_v61 = vld [vmem:[%s4873_s26 + $0x738] sm:$0xff]  ;;  %v2948_v47 = vld [vmem:[%s4873_s26 + $0x748] sm:$0xff]  ;;  %v2933_v4 = vld [vmem:[%s4873_s26 + $0x6d0] sm:$0xff] }
 0x9af   : > { %4550 = vmatpush3.bf16.msra.mxu1 %v4549_v1  ;;  %4582 = vmatpush3.bf16.msra.mxu0 %v4581_v46  ;;  %v2939_v1 = vld [vmem:[%s4873_s26 + $0x700] sm:$0xff]  ;;  %v2940_v46 = vld [vmem:[%s4873_s26 + $0x708] sm:$0xff]  ;;  %v2937_v30 = vld [vmem:[%s4873_s26 + $0x6f0] sm:$0xff] }
 0x9b0   : > { %4552 = vmatprep.subr.bf16.mxu1 %v4551_v27  ;;  %4584 = vmatprep.subr.bf16.mxu0 %v4583_v29  ;;  %v2957_v27 = vld [vmem:[%s4873_s26 + $0x790] sm:$0xff]  ;;  %v4597_v29 = vpack.c.bf16 %v2908_v15, %v2907_v37  ;;  %v4629_v35 = vpack.c.bf16 %v2940_v46, %v2939_v1  ;;  %v4641_v37 = vpack.c.bf16 %v2946_v61, %v2945_v57  ;;  %v2915_v15 = vld [vmem:[%s4873_s26 + $0x640] sm:$0xff]  ;;  %v2938_v31 = vld [vmem:[%s4873_s26 + $0x6f8] sm:$0xff]  ;;  %v2711_v57 = vmax.f32 %v5366_v34, 0.0 }
 0x9b1   : > { %v4631_v20 = vpack.c.bf16 %v2958_v21, %v2957_v27  ;;  %v2947_v46 = vld [vmem:[%s4873_s26 + $0x740] sm:$0xff]  ;;  %v2934_v27 = vld [vmem:[%s4873_s26 + $0x6d8] sm:$0xff]  ;;  %v2965_v21 = vld [vmem:[%s4873_s26 + $0x7d0] sm:$0xff]  ;;  %v2713_v61 = vmax.f32 %v5368_v42, 0.0 }
 0x9b2   : > { %v4615_v36 = vpack.c.bf16 %v2934_v27, %v2933_v4  ;;  %v2922_v7 = vld [vmem:[%s4873_s26 + $0x678] sm:$0xff] }
 0x9b3   : > { %4554 = vmatpush3.bf16.msra.mxu1 %v4553_v19  ;;  %4586 = vmatpush3.bf16.msra.mxu0 %v4585_v51  ;;  %v2941_v19 = vld [vmem:[%s4873_s26 + $0x710] sm:$0xff]  ;;  %v2942_v51 = vld [vmem:[%s4873_s26 + $0x718] sm:$0xff] }
 0x9b4   : > { %4556 = vmatprep.subr.bf16.mxu1 %v4555_v24  ;;  %4588 = vmatprep.subr.bf16.mxu0 %v4587_v25  ;;  %v2707_v24 = vmax.f32 %v2448_v60, 0.0  ;;  %v2709_v25 = vmax.f32 %v5328_v58, 0.0  ;;  %v4633_v9 = vpack.c.bf16 %v2942_v51, %v2941_v19  ;;  %v2943_v58 = vld [vmem:[%s4873_s26 + $0x720] sm:$0xff]  ;;  %v2917_v60 = vld [vmem:[%s4873_s26 + $0x650] sm:$0xff]  ;;  %v2968_v51 = vld [vmem:[%s4873_s26 + $0x7e8] sm:$0xff] }
 0x9b5   : > { %v4637_v16 = vpack.c.bf16 %v2944_v50, %v2943_v58  ;;  %v2967_v19 = vld [vmem:[%s4873_s26 + $0x7e0] sm:$0xff]  ;;  %v2921_v58 = vld [vmem:[%s4873_s26 + $0x670] sm:$0xff]  ;;  %v4623_v50 = vpack.c.bf16 %v2938_v31, %v2937_v30 }
 0x9b7   : > { %4558 = vmatpush3.bf16.msra.mxu1 %v4557_v45  ;;  %4590 = vmatpush3.bf16.msra.mxu0 %v4589_v49  ;;  %v4603_v45 = vpack.c.bf16 %v2928_v26, %v2927_v41  ;;  %v4635_v49 = vpack.c.bf16 %v2960_v23, %v2959_v48  ;;  %v2919_v48 = vld [vmem:[%s4873_s26 + $0x660] sm:$0xff]  ;;  %v2920_v23 = vld [vmem:[%s4873_s26 + $0x668] sm:$0xff] }
 0x9b8   : > { %4560 = vmatprep.subr.bf16.mxu1 %v4559_v28  ;;  %4592 = vmatprep.subr.bf16.mxu0 %v4591_v8  ;;  %v2961_v28 = vld [vmem:[%s4873_s26 + $0x7b0] sm:$0xff]  ;;  %v2962_v8 = vld [vmem:[%s4873_s26 + $0x7b8] sm:$0xff] }
 0x9b9   : > { %v4639_v44 = vpack.c.bf16 %v2962_v8, %v2961_v28  ;;  %v2953_v28 = vld [vmem:[%s4873_s26 + $0x770] sm:$0xff]  ;;  %v2954_v8 = vld [vmem:[%s4873_s26 + $0x778] sm:$0xff] }
 0x9bb   : > { %4562 = vmatpush3.bf16.msra.mxu1 %v4561_v39  ;;  %4594 = vmatpush3.bf16.msra.mxu0 %v4593_v40  ;;  %v2931_v39 = vld [vmem:[%s4873_s26 + $0x6c0] sm:$0xff]  ;;  %v2932_v40 = vld [vmem:[%s4873_s26 + $0x6c8] sm:$0xff] }
 0x9bc   : > { %4596 = vmatprep.subr.bf16.mxu1 %v4595_v62  ;;  %4628 = vmatprep.subr.bf16.mxu0 %v4627_v2  ;;  %v2964_v62 = vld [vmem:[%s4873_s26 + $0x7c8] sm:$0xff]  ;;  %v4609_v2 = vpack.c.bf16 %v2914_v43, %v2913_v55  ;;  %v4611_v63 = vpack.c.bf16 %v2932_v40, %v2931_v39  ;;  %v2695_v55 = vmax.f32 %v5348_v22, 0.0  ;;  %v2697_v43 = vmax.f32 %v5350_v3, 0.0  ;;  %v3868_v22 = vld [vmem:[%s797_s6] ss:$0 sm:$0xff] }
 0x9bd   : > { %v4643_v1 = vpack.c.bf16 %v2964_v62, %v2963_v54 }
 0x9be   : > { %3342 = vmatmul.mubr.f32.vlgmr.msra.gmra.mrb[38].mxu1 %v2691_v10  ;;  %3417 = vmatmul.mubr.f32.vlgmr.msra.gmra.mrb[34].mxu0 %v2693_v59  ;;  %v4613_v10 = vpack.c.bf16 %v2916_v13, %v2915_v15  ;;  %v4645_v59 = vpack.c.bf16 %v2948_v47, %v2947_v46 }
 0x9bf   : > { %3346 = vmatprep.mubr.f32.mxu1 %v2708_v18  ;;  %3421 = vmatprep.mubr.f32.mxu0 %v2710_v52  ;;  %v2949_v18 = vld [vmem:[%s4873_s26 + $0x750] sm:$0xff]  ;;  %v2950_v52 = vld [vmem:[%s4873_s26 + $0x758] sm:$0xff] }
 0x9c0   : > { %4598 = vmatpush3.bf16.msra.mxu1 %v4597_v29  ;;  %4630 = vmatpush3.bf16.msra.mxu0 %v4629_v35  ;;  %v2966_v29 = vld [vmem:[%s4873_s26 + $0x7d8] sm:$0xff]  ;;  %v4649_v26 = vpack.c.bf16 %v2950_v52, %v2949_v18 }
 0x9c1   : > { %4600 = vmatprep.subr.bf16.mxu1 %v4599_v53  ;;  %4632 = vmatprep.subr.bf16.mxu0 %v4631_v20  ;;  %v2918_v35 = vld [vmem:[%s4873_s26 + $0x658] sm:$0xff]  ;;  %v4647_v11 = vpack.c.bf16 %v2966_v29, %v2965_v21  ;;  %v2935_v53 = vld [vmem:[%s4873_s26 + $0x6e0] sm:$0xff]  ;;  %v2936_v20 = vld [vmem:[%s4873_s26 + $0x6e8] sm:$0xff] }
 0x9c2   : > { %3347 = vmatmul.mubr.f32.gmra.mrb[40].mxu1 %v2707_v24  ;;  %3422 = vmatmul.mubr.f32.gmra.mrb[36].mxu0 %v2709_v25  ;;  %v4617_v41 = vpack.c.bf16 %v2918_v35, %v2917_v60  ;;  %v4619_v24 = vpack.c.bf16 %v2936_v20, %v2935_v53  ;;  %v4651_v25 = vpack.c.bf16 %v2968_v51, %v2967_v19 }
 0x9c3   : > { %3491 = vmatprep.mubr.f32.mxu1 %v2696_v32  ;;  %3566 = vmatprep.mubr.f32.mxu0 %v2698_v38  ;;  %v2969_v32 = vld [vmem:[%s4873_s26 + $0x7f0] sm:$0xff]  ;;  %v2970_v38 = vld [vmem:[%s4873_s26 + $0x7f8] sm:$0xff] }
 0x9c4   : > { %4602 = vmatpush3.bf16.msra.mxu1 %v4601_v6  ;;  %4634 = vmatpush3.bf16.msra.mxu0 %v4633_v9  ;;  %v2951_v6 = vld [vmem:[%s4873_s26 + $0x760] sm:$0xff]  ;;  %v2952_v9 = vld [vmem:[%s4873_s26 + $0x768] sm:$0xff]  ;;  %v4655_v5 = vpack.c.bf16 %v2970_v38, %v2969_v32 }
 0x9c5   : > { %4604 = vmatprep.subr.bf16.mxu1 %v4603_v45  ;;  %4636 = vmatprep.subr.bf16.mxu0 %v4635_v49  ;;  %v4621_v45 = vpack.c.bf16 %v2920_v23, %v2919_v48  ;;  %v4653_v49 = vpack.c.bf16 %v2952_v9, %v2951_v6 }
 0x9c8   : > { %4606 = vmatpush3.bf16.msra.mxu1 %v4605_v33  ;;  %4638 = vmatpush3.bf16.msra.mxu0 %v4637_v16  ;;  %v4625_v33 = vpack.c.bf16 %v2922_v7, %v2921_v58  ;;  %v4657_v16 = vpack.c.bf16 %v2954_v8, %v2953_v28 }
 0x9c9   : > { %4608 = vmatprep.subr.bf16.mxu1 %v4607_v56  ;;  %4640 = vmatprep.subr.bf16.mxu0 %v4639_v44  ;;  %v2712_v56 = vmax.f32 %v5373_v12, 0.0  ;;  %v2714_v44 = vmax.f32 %v5375_v17, 0.0 }
 0x9cc   : > { %4610 = vmatpush3.bf16.msra.mxu1 %v4609_v2  ;;  %4642 = vmatpush3.bf16.msra.mxu0 %v4641_v37 }
 0x9cd   : > { %4612 = vmatprep.subr.bf16.mxu1 %v4611_v63  ;;  %4644 = vmatprep.subr.bf16.mxu0 %v4643_v1 }
 0x9d0   : > { %4614 = vmatpush3.bf16.msra.mxu1 %v4613_v10  ;;  %4646 = vmatpush3.bf16.msra.mxu0 %v4645_v59 }
 0x9d1   : > { %4616 = vmatprep.subr.bf16.mxu1 %v4615_v36  ;;  %4648 = vmatprep.subr.bf16.mxu0 %v4647_v11 }
 0x9d4   : > { %4618 = vmatpush3.bf16.msra.mxu1 %v4617_v41  ;;  %4650 = vmatpush3.bf16.msra.mxu0 %v4649_v26 }
 0x9d5   : > { %4620 = vmatprep.subr.bf16.mxu1 %v4619_v24  ;;  %4652 = vmatprep.subr.bf16.mxu0 %v4651_v25 }
 0x9d8   : > { %4622 = vmatpush3.bf16.msra.mxu1 %v4621_v45  ;;  %4654 = vmatpush3.bf16.msra.mxu0 %v4653_v49 }
 0x9d9   : > { %4624 = vmatprep.subr.bf16.mxu1 %v4623_v50  ;;  %4656 = vmatprep.subr.bf16.mxu0 %v4655_v5 }
 0x9dc   : > { %4626 = vmatpush3.bf16.msra.mxu1 %v4625_v33  ;;  %4658 = vmatpush3.bf16.msra.mxu0 %v4657_v16 }
 0x9df   : > { %3492 = vmatmul.mubr.f32.vlgmr.msra.gmra.mrb[42].mxu1 %v2695_v55  ;;  %3567 = vmatmul.mubr.f32.vlgmr.msra.gmra.mrb[38].mxu0 %v2697_v43 }
 0x9e0   : > { %3496 = vmatprep.mubr.f32.mxu1 %v2712_v56  ;;  %3571 = vmatprep.mubr.f32.mxu0 %v2714_v44 }
 0x9e3   : > { %3497 = vmatmul.mubr.f32.gmra.mrb[44].mxu1 %v2711_v57  ;;  %3572 = vmatmul.mubr.f32.gmra.mrb[40].mxu0 %v2713_v61 }
 0xa50   : > { %v3951_v39 = vpop.f32.mrb[30].mxu1  ;;  %v3989_v40 = vpop.f32.mrb[26].mxu0 }
 0xa51   : > { %v3952_v3 = vpop.f32.mrb[31].mxu1  ;;  %v3990_v12 = vpop.f32.mrb[27].mxu0 }
 0xa52   : > { %v3953_v17 = vadd.f32 %v3952_v3, %v3951_v39  ;;  %v3991_v54 = vadd.f32 %v3990_v12, %v3989_v40 }
 0xa54   : > { %v3044_v62 = vadd.f32 %v3953_v17, %v3868_v22  ;;  %v3954_v2 = vpop.f32.mrb[32].mxu1  ;;  %v3992_v37 = vpop.f32.mrb[28].mxu0 }
 0xa55   : > { %v3955_v15 = vpop.f32.mrb[33].mxu1  ;;  %v3993_v34 = vpop.f32.mrb[29].mxu0 }
 0xa56   : > { %v3119_v13 = vadd.f32 %v3991_v54, %v3044_v62  ;;  %v3956_v42 = vadd.f32 %v3955_v15, %v3954_v2  ;;  %v3994_v63 = vadd.f32 %v3993_v34, %v3992_v37 }
 0xa58   : > { %v3049_v1 = vadd.f32 %v3956_v42, %v3868_v22 }
 0xa5a   : > { %v3124_v46 = vadd.f32 %v3994_v63, %v3049_v1 }
 0xa70   : > { %v4027_v47 = vpop.f32.mrb[34].mxu1  ;;  %v4065_v4 = vpop.f32.mrb[30].mxu0 }
 0xa71   : > { %v4028_v27 = vpop.f32.mrb[35].mxu1  ;;  %v4066_v21 = vpop.f32.mrb[31].mxu0 }
 0xa72   : > { %v4029_v29 = vadd.f32 %v4028_v27, %v4027_v47  ;;  %v4067_v10 = vadd.f32 %v4066_v21, %v4065_v4 }
 0xa74   : > { %v3194_v59 = vadd.f32 %v4029_v29, %v3119_v13  ;;  %v4030_v60 = vpop.f32.mrb[36].mxu1  ;;  %v4068_v35 = vpop.f32.mrb[32].mxu0 }
 0xa75   : > { %v4031_v36 = vpop.f32.mrb[37].mxu1  ;;  %v4069_v11 = vpop.f32.mrb[33].mxu0 }
 0xa76   : > { %v3269_v18 = vadd.f32 %v4067_v10, %v3194_v59  ;;  %v4032_v52 = vadd.f32 %v4031_v36, %v4030_v60  ;;  %v4070_v53 = vadd.f32 %v4069_v11, %v4068_v35  ;;  %v3869_v10 = vld [vmem:[%s800_s19] ss:$0 sm:$0xff] }
 0xa77   : > { %v3870_v60 = vld [vmem:[%s803_s30] ss:$0 sm:$0xff] }
 0xa78   : > { %v3199_v20 = vadd.f32 %v4032_v52, %v3124_v46 }
 0xa7a   : > { %v3274_v19 = vadd.f32 %v4070_v53, %v3199_v20 }
 0xa91   : > { %v4103_v51 = vpop.f32.mrb[38].mxu1  ;;  %v4141_v41 = vpop.f32.mrb[34].mxu0 }
 0xa92   : > { %v4104_v26 = vpop.f32.mrb[39].mxu1  ;;  %v4142_v48 = vpop.f32.mrb[35].mxu0 }
 0xa93   : > { %v4105_v23 = vadd.f32 %v4104_v26, %v4103_v51  ;;  %v4143_v24 = vadd.f32 %v4142_v48, %v4141_v41 }
 0xa95   : > { %v3344_v25 = vadd.f32 %v4105_v23, %v3269_v18  ;;  %v4106_v6 = vpop.f32.mrb[40].mxu1  ;;  %v4144_v9 = vpop.f32.mrb[36].mxu0 }
 0xa96   : > { %v4107_v30 = vpop.f32.mrb[41].mxu1  ;;  %v4145_v31 = vpop.f32.mrb[37].mxu0 }
 0xa97   : > { %v3419_v32 = vadd.f32 %v4143_v24, %v3344_v25  ;;  %v4108_v38 = vadd.f32 %v4107_v30, %v4106_v6  ;;  %v4146_v45 = vadd.f32 %v4145_v31, %v4144_v9 }
 0xa99   : > { %v3349_v49 = vadd.f32 %v4108_v38, %v3274_v19 }
 0xa9b   : > { %v3424_v58 = vadd.f32 %v4146_v45, %v3349_v49 }
 0xab2   : > { %v4179_v50 = vpop.f32.mrb[42].mxu1  ;;  %v4217_v5 = vpop.f32.mrb[38].mxu0 }
 0xab3   : > { %v4180_v7 = vpop.f32.mrb[43].mxu1  ;;  %v4218_v28 = vpop.f32.mrb[39].mxu0 }
 0xab4   : > { %v4181_v8 = vadd.f32 %v4180_v7, %v4179_v50  ;;  %v4219_v33 = vadd.f32 %v4218_v28, %v4217_v5 }
 0xab6   : > { %v3494_v16 = vadd.f32 %v4181_v8, %v3419_v32  ;;  %v4182_v55 = vpop.f32.mrb[44].mxu1  ;;  %v4220_v43 = vpop.f32.mrb[40].mxu0 }
 0xab7   : > { %v4183_v56 = vpop.f32.mrb[45].mxu1  ;;  %v4221_v44 = vpop.f32.mrb[41].mxu0 }
 0xab8   : > { %v3569_v57 = vadd.f32 %v4219_v33, %v3494_v16  ;;  %v4184_v61 = vadd.f32 %v4183_v56, %v4182_v55  ;;  %v4222_v39 = vadd.f32 %v4221_v44, %v4220_v43 }
 0xaba   : > { %v3499_v40 = vadd.f32 %v4184_v61, %v3424_v58  ;;  %v3577_v22 = vadd.f32 %v3569_v57, %v5064_v0 }
 0xabc   : > { %v3574_v3 = vadd.f32 %v4222_v39, %v3499_v40  ;;  %v3579_v12 = vsel %vm838_vm1, %v3577_v22, 0.0 }
 0xabd   : > { %3580 = vadd.xlane.f32.xlu0 %v3579_v12 }
 0xabe   : > { %v3578_v17 = vadd.f32 %v3574_v3, %v5079_v14 }
 0xac0   : > { %v3582_v54 = vsel %vm838_vm1, %v3578_v17, 0.0 }
 0xac1   : > { %3583 = vadd.xlane.f32.xlu1 %v3582_v54 }
 0xb4a   : > { %v3581_v62 = vpop.xlane.xlu0 %3580 }
 0xb4b   : > { %v3585_v2 = vmul.f32 0.03125, %v3581_v62 }
 0xb4d   : > { %v3587_v37 = vsub.f32 %v3577_v22, %v3585_v2 }
 0xb4e   : > { %v3584_v15 = vpop.xlane.xlu1 %3583 }
 0xb4f   : > { %v3586_v34 = vmul.f32 0.03125, %v3584_v15  ;;  %v3589_v13 = vmul.f32 %v3587_v37, %v3587_v37 }
 0xb51   : > { %v3588_v42 = vsub.f32 %v3578_v17, %v3586_v34  ;;  %v3591_v63 = vsel %vm838_vm1, %v3589_v13, 0.0 }
 0xb52   : > { %3592 = vadd.xlane.f32.xlu0 %v3591_v63 }
 0xb53   : > { %v3590_v0 = vmul.f32 %v3588_v42, %v3588_v42 }
 0xb55   : > { %v3594_v1 = vsel %vm838_vm1, %v3590_v0, 0.0 }
 0xb56   : > { %3595 = vadd.xlane.f32.xlu1 %v3594_v1 }
 0xbdf   : > { %v3593_v14 = vpop.xlane.xlu0 %3592 }
 0xbe0   : > { %v3597_v46 = vmul.f32 0.03125, %v3593_v14 }
 0xbe2   : > { %v3599_v47 = vadd.f32 1e-05, %v3597_v46 }
 0xbe3   : > { %v3596_v4 = vpop.xlane.xlu1 %3595 }
 0xbe4   : > { %4691 = vrsqrt.f32 %v3599_v47  ;;  %v3598_v27 = vmul.f32 0.03125, %v3596_v4 }
 0xbe6   : > { %v3600_v21 = vadd.f32 1e-05, %v3598_v27 }
 0xbe8   : > { %4693 = vrsqrt.f32 %v3600_v21 }
 0xbee   : > { %v4692_v29 = vpop.eup %4691 }
 0xbef   : > { %v3603_v59 = vmul.f32 %v4692_v29, %v3587_v37 }
 0xbf1   : > { %v3611_v35 = vmul.f32 %v3869_v10, %v3603_v59 }
 0xbf2   : > { %v4694_v36 = vpop.eup %4693 }
 0xbf3   : > { %v3619_v11 = vadd.f32 %v3870_v60, %v3611_v35  ;;  %v3604_v18 = vmul.f32 %v4694_v36, %v3588_v42 }
 0xbf5   : > { %3621 = vst.msk [vmem:[#allocation2] sm:$0xff] %vm838_vm1, %v3619_v11  ;;  %3623 = vst.msk [vmem:[%s5637_s28] sm:$0xff] %vm838_vm1, %v3619_v11  ;;  %v3612_v52 = vmul.f32 %v3869_v10, %v3604_v18 }
 0xbf7   : > { %v3620_v53 = vadd.f32 %v3870_v60, %v3612_v52 }
 0xbf9   : > { %3622 = vst.msk [vmem:[#allocation2 + $0x8] sm:$0xff] %vm838_vm1, %v3620_v53  ;;  %3624 = vst.msk [vmem:[%s5637_s28 + $0x8] sm:$0xff] %vm838_vm1, %v3620_v53 }
 0xbfa PF: > { %s5638_s29 = sld [smem:[#allocation4_spill]] }
 0xc00   : > { %s28_s27 = sadd.s32 1, %s5638_s29  }
 0xc01   : > { %p25_p5 = scmp.ge.s32.totalorder %s28_s27, 4  }
 0xc03   :  { %27 = sbr.rel (!%p25_p5) target bundleno = 13 (0xd), region = 167 }

</bundles_post_ra>
